<compile_context>
chip_gen: v5e
topology: v5e:2x2
jax: 0.10.0
libtpu: 0.0.40
codegen_flags: <defaults>
</compile_context>

<pallas_src>
import math
import numpy as np
import jax
import jax.numpy as jnp
from jax.experimental import pallas as pl
from jax.experimental.pallas import tpu as pltpu

FEATURES = 4                                  # input channels of `feats`
OUT_FEATURES = 128                            # stand-in for the default 512
SIZES = (1, 2, 3, 6)
N_STAGES = len(SIZES)
PRIOR_CH = N_STAGES * OUT_FEATURES            # channels of the concatenated priors
STAGE_IN = N_STAGES * FEATURES + N_STAGES     # stage input cols + per-stage bias col
N_POOL = sum(s * s for s in SIZES)            # 50 pooled pixels across all stages
N_POOL_PAD = 64                               # padded to a full bf16 sublane tile
N_TAPS = 9                                    # 3x3 conv taps
M_ROWS = N_TAPS * N_POOL_PAD                  # rows of the M_cat scratch (576)
KF = N_TAPS * FEATURES + 1                    # im2col'ed feats cols + bias column
BN_EPS = 1e-5


# ----------------------------------------------------------------------------
# Small helpers (host / XLA side)
# ----------------------------------------------------------------------------
def adaptive_avg_pool_nhwc(x, s):
    """Matches torch AdaptiveAvgPool2d bin boundaries (reference path only)."""
    N, H, W, C = x.shape

    def bins(L):
        return [(int(math.floor(i * L / s)), int(math.ceil((i + 1) * L / s)))
                for i in range(s)]

    rows = []
    for (h0, h1) in bins(H):
        cols = []
        for (w0, w1) in bins(W):
            cols.append(jnp.mean(x[:, h0:h1, w0:w1, :], axis=(1, 2)))
        rows.append(jnp.stack(cols, axis=1))
    return jnp.stack(rows, axis=1)


def pool_matrix(s, L):
    """(s, L) averaging matrix matching torch AdaptiveAvgPool2d bins (numpy)."""
    A = np.zeros((s, L), np.float32)
    for i in range(s):
        a = int(math.floor(i * L / s))
        b = int(math.ceil((i + 1) * L / s))
        A[i, a:b] = 1.0 / (b - a)
    return A


def interp_matrix(out_len, in_len):
    """1-D bilinear interpolation matrix, align_corners=True (numpy, f32)."""
    R = np.zeros((out_len, in_len), np.float32)
    if in_len == 1:
        R[:, 0] = 1.0
    else:
        for i in range(out_len):
            coord = i * (in_len - 1) / (out_len - 1)
            i0 = int(math.floor(coord))
            i1 = min(i0 + 1, in_len - 1)
            w1 = coord - i0
            R[i, i0] += 1.0 - w1
            R[i, i1] += w1
    return R


def fold_bn(w, gamma, beta, mean, var):
    """Fold eval-mode BN into conv weight (last axis = out channels) + bias."""
    scale = gamma / jnp.sqrt(var + BN_EPS)
    return w * scale, beta - mean * scale


def build_pooled_stages(x):
    """(N, N_POOL_PAD, STAGE_IN) f32: all pooled pixels (adaptive-average bins
    realised as two small averaging matmuls per stage), each stage's channels
    in its own column block plus a per-stage bias-indicator column (=1).
    Zero-padded 50 -> 64 rows so every per-tap kernel matmul writes a full,
    bf16-tile-aligned 64-row block of the M_cat scratch."""
    N, H, W, C = x.shape
    blocks = []
    for si, s in enumerate(SIZES):
        Ah = jnp.asarray(pool_matrix(s, H))
        Aw = jnp.asarray(pool_matrix(s, W))
        p = jnp.einsum("ih,nhwc,jw->nijc", Ah, x, Aw).reshape(N, s * s, C)
        blk = jnp.zeros((N, s * s, STAGE_IN), jnp.float32)
        blk = blk.at[:, :, FEATURES * si:FEATURES * (si + 1)].set(p)
        blk = blk.at[:, :, N_STAGES * FEATURES + si].set(1.0)
        blocks.append(blk)
    pooled = jnp.concatenate(blocks, axis=1)                     # (N, 50, 20)
    return jnp.pad(pooled, ((0, 0), (0, N_POOL_PAD - N_POOL), (0, 0)))


def build_stage_weight(stage_params):
    """(STAGE_IN, PRIOR_CH): block-diagonal folded 1x1-conv+BN weights; the
    folded biases live in the per-stage indicator rows."""
    Wb = jnp.zeros((STAGE_IN, PRIOR_CH), jnp.float32)
    for si, (wf, bf) in enumerate(stage_params):
        Wb = Wb.at[FEATURES * si:FEATURES * (si + 1),
                   OUT_FEATURES * si:OUT_FEATURES * (si + 1)].set(wf)
        Wb = Wb.at[N_STAGES * FEATURES + si,
                   OUT_FEATURES * si:OUT_FEATURES * (si + 1)].set(bf)
    return Wb


def build_u_cat(H, W):
    """(H*WP, 9*N_POOL_PAD) bf16 operator.  For tap t=(kh,kw), columns
    [t*64, t*64+50) hold the bilinear (align_corners=True) upsample weights of
    every stage's pooled grid onto the zero-padded (H+2, W+2) grid, row-shifted
    by kh*WP+kw.  Applying it AFTER the per-tap folded 3x3 weights
    (conv-then-upsample reassociation) reproduces
    upsample -> concat -> 3x3 conv (padding=1, zero halo) exactly."""
    WP = W + 2
    HWP = H * WP
    u_full = np.zeros(((H + 2) * WP + 2, N_POOL), np.float32)   # +2 tap slack
    rows = ((np.arange(H)[:, None] + 1) * WP
            + (np.arange(W)[None, :] + 1)).reshape(-1)
    col = 0
    for s in SIZES:
        Rh = interp_matrix(H, s)                                  # (H, s)
        Rw = interp_matrix(W, s)                                  # (W, s)
        blk = np.einsum("hi,wj->hwij", Rh, Rw).reshape(H * W, s * s)
        u_full[rows, col:col + s * s] = blk
        col += s * s
    U = np.zeros((HWP, M_ROWS), np.float32)
    for kh in range(3):
        for kw in range(3):
            t = kh * 3 + kw
            off = kh * WP + kw
            U[:, t * N_POOL_PAD: t * N_POOL_PAD + N_POOL] = u_full[off: off + HWP, :]
    return jnp.asarray(U, dtype=jnp.bfloat16)


def build_feats_cols(x):
    """(N, H*WP, KF) bf16: im2col of the zero-padded feats for all 9 conv taps
    on the flattened padded-width grid, plus a trailing ones column that
    carries the folded bottleneck-BN bias."""
    N, H, W, C = x.shape
    WP = W + 2
    HWP = H * WP
    xp = jnp.pad(x, ((0, 0), (1, 1), (1, 1), (0, 0))).reshape(N, (H + 2) * WP, C)
    xp = jnp.pad(xp, ((0, 0), (0, 2), (0, 0)))                    # tap slack
    cols = [xp[:, kh * WP + kw: kh * WP + kw + HWP, :]
            for kh in range(3) for kw in range(3)]
    cols.append(jnp.ones((N, HWP, 1), jnp.float32))
    return jnp.concatenate(cols, axis=-1).astype(jnp.bfloat16)


# ----------------------------------------------------------------------------
# Parameter construction (deterministic, synthetic)
# ----------------------------------------------------------------------------
def init_params(key):
    params = {"stages": []}
    cin_bottleneck = FEATURES + N_STAGES * OUT_FEATURES
    for _ in SIZES:
        key, k1, k2, k3, k4, k5 = jax.random.split(key, 6)
        w = jax.random.normal(k1, (FEATURES, OUT_FEATURES), jnp.float32) * 0.1
        gamma = 1.0 + 0.1 * jax.random.normal(k2, (OUT_FEATURES,), jnp.float32)
        beta = 0.1 * jax.random.normal(k3, (OUT_FEATURES,), jnp.float32)
        mean = 0.1 * jax.random.normal(k4, (OUT_FEATURES,), jnp.float32)
        var = 0.5 + jax.random.uniform(k5, (OUT_FEATURES,), jnp.float32)
        params["stages"].append(fold_bn(w, gamma, beta, mean, var))
    key, k1, k2, k3, k4, k5 = jax.random.split(key, 6)
    wb = jax.random.normal(k1, (3, 3, cin_bottleneck, OUT_FEATURES), jnp.float32) * 0.05
    gamma = 1.0 + 0.1 * jax.random.normal(k2, (OUT_FEATURES,), jnp.float32)
    beta = 0.1 * jax.random.normal(k3, (OUT_FEATURES,), jnp.float32)
    mean = 0.1 * jax.random.normal(k4, (OUT_FEATURES,), jnp.float32)
    var = 0.5 + jax.random.uniform(k5, (OUT_FEATURES,), jnp.float32)
    params["bottleneck_w"], params["bottleneck_b"] = fold_bn(wb, gamma, beta, mean, var)
    return params


# ----------------------------------------------------------------------------
# Fused PSPModule forward (single Pallas kernel)
# ----------------------------------------------------------------------------
def psp_module_forward(feats_nchw, params):
    # NCHW -> NHWC (channels on lanes) for the TPU kernel.
    x = jnp.transpose(feats_nchw, (0, 2, 3, 1)).astype(jnp.float32)
    N, H, W, C = x.shape
    WP = W + 2
    HWP = H * WP                                   # output rows at padded width

    # ---- tiny XLA-side prep (pool matrices, im2col; no concat/pad of Cin) ---
    pooled = build_pooled_stages(x)                             # (N, 64, 20) f32
    w_stage = build_stage_weight(params["stages"])              # (20, PRIOR_CH) f32
    u_cat = build_u_cat(H, W)                                   # (HWP, 576) bf16
    wb = params["bottleneck_w"]                                 # (3,3, PRIOR_CH+C, OUT)
    w_prior = wb[:, :, :PRIOR_CH, :].reshape(
        N_TAPS, PRIOR_CH, OUT_FEATURES).astype(jnp.bfloat16)    # (9, 512, 128) bf16
    w_feat = jnp.concatenate(
        [wb[:, :, PRIOR_CH:, :].reshape(N_TAPS * C, OUT_FEATURES),
         params["bottleneck_b"].reshape(1, OUT_FEATURES)],
        axis=0).astype(jnp.bfloat16)                            # (37, 128) bf16, bias row last
    fcols = build_feats_cols(x)                                 # (N, HWP, 37) bf16

    def kernel(pooled_ref, wstg_ref, wp_ref, ucat_ref, fcols_ref, wf_ref,
               o_ref, m_ref):
        # (a) pyramid stages: folded 1x1 conv + BN of every pooled pixel
        #     (block-diagonal stage weight + bias-indicator rows).  f32, tiny.
        zb = jnp.dot(pooled_ref[0], wstg_ref[...],
                     preferred_element_type=jnp.float32).astype(jnp.bfloat16)  # (64, PRIOR_CH)

        # (b) conv-before-upsample: per-tap folded 3x3 weights applied on the
        #     tiny pooled grid.  Nine 64x512x128 dots, each writing one fully
        #     aligned 64-row block of the M_cat scratch (bf16 tile boundaries).
        for t in range(N_TAPS):
            m_ref[pl.ds(t * N_POOL_PAD, N_POOL_PAD), :] = jnp.dot(
                zb, wp_ref[t],
                preferred_element_type=jnp.float32).astype(jnp.bfloat16)

        # (c) one big dot applies the tap-shifted bilinear upsample operator
        #     and sums the 9 taps for the priors (halo rows are zero in U_cat,
        #     realising padding=1); one K=37 dot handles all 9 feats taps plus
        #     the folded BN bias via the trailing ones column.
        acc = jnp.dot(ucat_ref[...], m_ref[...],
                      preferred_element_type=jnp.float32)        # (HWP, OUT) f32
        acc = acc + jnp.dot(fcols_ref[0], wf_ref[...],
                            preferred_element_type=jnp.float32)
        # OUT_FEATURES == 128 lanes -> every store is an unmasked, lane-dense vst.
        o_ref[...] = acc.reshape(1, HWP, OUT_FEATURES).astype(o_ref.dtype)

    out_flat = pl.pallas_call(
        kernel,
        out_shape=jax.ShapeDtypeStruct((N, HWP, OUT_FEATURES), jnp.float32),
        grid_spec=pltpu.PrefetchScalarGridSpec(
            num_scalar_prefetch=0,
            grid=(N,),
            in_specs=[
                pl.BlockSpec((1, N_POOL_PAD, STAGE_IN), lambda n: (n, 0, 0)),
                pl.BlockSpec((STAGE_IN, PRIOR_CH), lambda n: (0, 0)),
                pl.BlockSpec((N_TAPS, PRIOR_CH, OUT_FEATURES), lambda n: (0, 0, 0)),
                pl.BlockSpec((HWP, M_ROWS), lambda n: (0, 0)),
                pl.BlockSpec((1, HWP, KF), lambda n: (n, 0, 0)),
                pl.BlockSpec((KF, OUT_FEATURES), lambda n: (0, 0)),
            ],
            out_specs=pl.BlockSpec((1, HWP, OUT_FEATURES), lambda n: (n, 0, 0)),
            scratch_shapes=[pltpu.VMEM((M_ROWS, OUT_FEATURES), jnp.bfloat16)],
        ),
        compiler_params=pltpu.CompilerParams(dimension_semantics=("parallel",)),
    )(pooled, w_stage, w_prior, u_cat, fcols, w_feat)

    # Crop the 2 halo columns (computed at padded width) and go back to NCHW.
    out = out_flat.reshape(N, H, WP, OUT_FEATURES)[:, :, :W, :]
    # TODO(synk): Dropout2d(0.1) is identity in eval mode; training-mode
    # channel dropout is not implemented here.
    return jnp.transpose(out, (0, 3, 1, 2))


# ----------------------------------------------------------------------------
# Pure-XLA f32 reference (for a correctness check)
# ----------------------------------------------------------------------------
def psp_reference(feats_nchw, params):
    x = jnp.transpose(feats_nchw, (0, 2, 3, 1)).astype(jnp.float32)
    N, H, W, C = x.shape
    priors = []
    for si, s in enumerate(SIZES):
        wf, bf = params["stages"][si]
        pooled = adaptive_avg_pool_nhwc(x, s)
        y = jnp.einsum("nijc,co->nijo", pooled, wf) + bf
        Rh = jnp.asarray(interp_matrix(H, s))
        Rw = jnp.asarray(interp_matrix(W, s))
        priors.append(jnp.einsum("hi,nijo,wj->nhwo", Rh, y, Rw))
    priors.append(x)
    cat = jnp.concatenate(priors, axis=-1)
    cat = jnp.pad(cat, ((0, 0), (1, 1), (1, 1), (0, 0)))
    out = jax.lax.conv_general_dilated(
        cat, params["bottleneck_w"], window_strides=(1, 1), padding="VALID",
        dimension_numbers=("NHWC", "HWIO", "NHWC")) + params["bottleneck_b"]
    return jnp.transpose(out, (0, 3, 1, 2))


if __name__ == "__main__":
    key = jax.random.PRNGKey(0)
    key, kx, kp = jax.random.split(key, 3)
    x_nchw = jax.random.normal(kx, (2, FEATURES, 16, 16), jnp.float32)
    params = init_params(kp)

    out = jax.block_until_ready(psp_module_forward(x_nchw, params))
    assert out.shape == (2, OUT_FEATURES, 16, 16), out.shape
    assert bool(jnp.all(jnp.isfinite(out)))

    ref = jax.block_until_ready(psp_reference(x_nchw, params))
    max_err = float(jnp.max(jnp.abs(out - ref)))
    # Loose tolerance: the bottleneck / upsample path runs in bf16 on the MXU.
    assert max_err < 0.1, f"max abs error vs f32 reference: {max_err}"

    print("KERNEL_OK")
</pallas_src>

<mosaic_0001>
module attributes {stable_mosaic.version = 11 : i64} {
  func.func @kernel(%arg0: i32, %arg1: memref<1x64x20xf32, #tpu.memory_space<vmem>>, %arg2: memref<20x512xf32, #tpu.memory_space<vmem>>, %arg3: memref<9x512x128xbf16, #tpu.memory_space<vmem>>, %arg4: memref<288x576xbf16, #tpu.memory_space<vmem>>, %arg5: memref<1x288x37xbf16, #tpu.memory_space<vmem>>, %arg6: memref<37x128xbf16, #tpu.memory_space<vmem>>, %arg7: memref<1x288x128xf32, #tpu.memory_space<vmem>>, %arg8: memref<576x128xbf16, #tpu.memory_space<vmem>>) attributes {dimension_semantics = [#tpu.dimension_semantics<parallel>], iteration_bounds = array<i64: 2>, scalar_prefetch = 0 : i64, scratch_operands = 1 : i64, tpu.core_type = #tpu.core_type<tc>, window_params = [{transform_indices = @transform_0, window_bounds = array<i64: 1, 64, 20>}, {pipeline_mode = #tpu.pipeline_mode<synchronous>, transform_indices = @transform_1, window_bounds = array<i64: 20, 512>}, {pipeline_mode = #tpu.pipeline_mode<synchronous>, transform_indices = @transform_2, window_bounds = array<i64: 9, 512, 128>}, {pipeline_mode = #tpu.pipeline_mode<synchronous>, transform_indices = @transform_3, window_bounds = array<i64: 288, 576>}, {transform_indices = @transform_4, window_bounds = array<i64: 1, 288, 37>}, {pipeline_mode = #tpu.pipeline_mode<synchronous>, transform_indices = @transform_5, window_bounds = array<i64: 37, 128>}, {transform_indices = @transform_6, window_bounds = array<i64: 1, 288, 128>}]} {
    %c0 = arith.constant 0 : index
    %c0_0 = arith.constant 0 : index
    %c0_1 = arith.constant 0 : index
    %0 = vector.load %arg1[%c0, %c0_0, %c0_1] : memref<1x64x20xf32, #tpu.memory_space<vmem>>, vector<1x64x20xf32>
    %1 = vector.shape_cast %0 : vector<1x64x20xf32> to vector<64x20xf32>
    %c0_2 = arith.constant 0 : index
    %c0_3 = arith.constant 0 : index
    %2 = vector.load %arg2[%c0_2, %c0_3] : memref<20x512xf32, #tpu.memory_space<vmem>>, vector<20x512xf32>
    %cst = arith.constant dense<0.000000e+00> : vector<64x512xf32>
    %3 = tpu.matmul %1, %2, %cst {dimension_numbers = #tpu.dot_dimension_numbers<[1], [0], [0], [1], [0, 0, 1, 1], [], []>} : vector<64x20xf32>, vector<20x512xf32>, vector<64x512xf32> -> vector<64x512xf32>
    %4 = arith.truncf %3 : vector<64x512xf32> to vector<64x512xbf16>
    %c0_4 = arith.constant 0 : index
    %c0_5 = arith.constant 0 : index
    %c0_6 = arith.constant 0 : index
    %5 = vector.load %arg3[%c0_4, %c0_5, %c0_6] : memref<9x512x128xbf16, #tpu.memory_space<vmem>>, vector<1x512x128xbf16>
    %6 = vector.shape_cast %5 : vector<1x512x128xbf16> to vector<512x128xbf16>
    %cst_7 = arith.constant dense<0.000000e+00> : vector<64x128xf32>
    %7 = tpu.matmul %4, %6, %cst_7 {dimension_numbers = #tpu.dot_dimension_numbers<[1], [0], [0], [1], [0, 0, 1, 1], [], []>} : vector<64x512xbf16>, vector<512x128xbf16>, vector<64x128xf32> -> vector<64x128xf32>
    %8 = arith.truncf %7 : vector<64x128xf32> to vector<64x128xbf16>
    %c0_8 = arith.constant 0 : index
    %c0_9 = arith.constant 0 : index
    %9 = vector.load %arg8[%c0_8, %c0_9] : memref<576x128xbf16, #tpu.memory_space<vmem>>, vector<64x128xbf16>
    tpu.vector_store %arg8[%c0_8, %c0_9], %8 {strides = array<i32>} : memref<576x128xbf16, #tpu.memory_space<vmem>>, vector<64x128xbf16>,
    %c1 = arith.constant 1 : index
    %c0_10 = arith.constant 0 : index
    %c0_11 = arith.constant 0 : index
    %10 = vector.load %arg3[%c1, %c0_10, %c0_11] : memref<9x512x128xbf16, #tpu.memory_space<vmem>>, vector<1x512x128xbf16>
    %11 = vector.shape_cast %10 : vector<1x512x128xbf16> to vector<512x128xbf16>
    %cst_12 = arith.constant dense<0.000000e+00> : vector<64x128xf32>
    %12 = tpu.matmul %4, %11, %cst_12 {dimension_numbers = #tpu.dot_dimension_numbers<[1], [0], [0], [1], [0, 0, 1, 1], [], []>} : vector<64x512xbf16>, vector<512x128xbf16>, vector<64x128xf32> -> vector<64x128xf32>
    %13 = arith.truncf %12 : vector<64x128xf32> to vector<64x128xbf16>
    %c64 = arith.constant 64 : index
    %c0_13 = arith.constant 0 : index
    %14 = vector.load %arg8[%c64, %c0_13] : memref<576x128xbf16, #tpu.memory_space<vmem>>, vector<64x128xbf16>
    tpu.vector_store %arg8[%c64, %c0_13], %13 {strides = array<i32>} : memref<576x128xbf16, #tpu.memory_space<vmem>>, vector<64x128xbf16>,
    %c2 = arith.constant 2 : index
    %c0_14 = arith.constant 0 : index
    %c0_15 = arith.constant 0 : index
    %15 = vector.load %arg3[%c2, %c0_14, %c0_15] : memref<9x512x128xbf16, #tpu.memory_space<vmem>>, vector<1x512x128xbf16>
    %16 = vector.shape_cast %15 : vector<1x512x128xbf16> to vector<512x128xbf16>
    %cst_16 = arith.constant dense<0.000000e+00> : vector<64x128xf32>
    %17 = tpu.matmul %4, %16, %cst_16 {dimension_numbers = #tpu.dot_dimension_numbers<[1], [0], [0], [1], [0, 0, 1, 1], [], []>} : vector<64x512xbf16>, vector<512x128xbf16>, vector<64x128xf32> -> vector<64x128xf32>
    %18 = arith.truncf %17 : vector<64x128xf32> to vector<64x128xbf16>
    %c128 = arith.constant 128 : index
    %c0_17 = arith.constant 0 : index
    %19 = vector.load %arg8[%c128, %c0_17] : memref<576x128xbf16, #tpu.memory_space<vmem>>, vector<64x128xbf16>
    tpu.vector_store %arg8[%c128, %c0_17], %18 {strides = array<i32>} : memref<576x128xbf16, #tpu.memory_space<vmem>>, vector<64x128xbf16>,
    %c3 = arith.constant 3 : index
    %c0_18 = arith.constant 0 : index
    %c0_19 = arith.constant 0 : index
    %20 = vector.load %arg3[%c3, %c0_18, %c0_19] : memref<9x512x128xbf16, #tpu.memory_space<vmem>>, vector<1x512x128xbf16>
    %21 = vector.shape_cast %20 : vector<1x512x128xbf16> to vector<512x128xbf16>
    %cst_20 = arith.constant dense<0.000000e+00> : vector<64x128xf32>
    %22 = tpu.matmul %4, %21, %cst_20 {dimension_numbers = #tpu.dot_dimension_numbers<[1], [0], [0], [1], [0, 0, 1, 1], [], []>} : vector<64x512xbf16>, vector<512x128xbf16>, vector<64x128xf32> -> vector<64x128xf32>
    %23 = arith.truncf %22 : vector<64x128xf32> to vector<64x128xbf16>
    %c192 = arith.constant 192 : index
    %c0_21 = arith.constant 0 : index
    %24 = vector.load %arg8[%c192, %c0_21] : memref<576x128xbf16, #tpu.memory_space<vmem>>, vector<64x128xbf16>
    tpu.vector_store %arg8[%c192, %c0_21], %23 {strides = array<i32>} : memref<576x128xbf16, #tpu.memory_space<vmem>>, vector<64x128xbf16>,
    %c4 = arith.constant 4 : index
    %c0_22 = arith.constant 0 : index
    %c0_23 = arith.constant 0 : index
    %25 = vector.load %arg3[%c4, %c0_22, %c0_23] : memref<9x512x128xbf16, #tpu.memory_space<vmem>>, vector<1x512x128xbf16>
    %26 = vector.shape_cast %25 : vector<1x512x128xbf16> to vector<512x128xbf16>
    %cst_24 = arith.constant dense<0.000000e+00> : vector<64x128xf32>
    %27 = tpu.matmul %4, %26, %cst_24 {dimension_numbers = #tpu.dot_dimension_numbers<[1], [0], [0], [1], [0, 0, 1, 1], [], []>} : vector<64x512xbf16>, vector<512x128xbf16>, vector<64x128xf32> -> vector<64x128xf32>
    %28 = arith.truncf %27 : vector<64x128xf32> to vector<64x128xbf16>
    %c256 = arith.constant 256 : index
    %c0_25 = arith.constant 0 : index
    %29 = vector.load %arg8[%c256, %c0_25] : memref<576x128xbf16, #tpu.memory_space<vmem>>, vector<64x128xbf16>
    tpu.vector_store %arg8[%c256, %c0_25], %28 {strides = array<i32>} : memref<576x128xbf16, #tpu.memory_space<vmem>>, vector<64x128xbf16>,
    %c5 = arith.constant 5 : index
    %c0_26 = arith.constant 0 : index
    %c0_27 = arith.constant 0 : index
    %30 = vector.load %arg3[%c5, %c0_26, %c0_27] : memref<9x512x128xbf16, #tpu.memory_space<vmem>>, vector<1x512x128xbf16>
    %31 = vector.shape_cast %30 : vector<1x512x128xbf16> to vector<512x128xbf16>
    %cst_28 = arith.constant dense<0.000000e+00> : vector<64x128xf32>
    %32 = tpu.matmul %4, %31, %cst_28 {dimension_numbers = #tpu.dot_dimension_numbers<[1], [0], [0], [1], [0, 0, 1, 1], [], []>} : vector<64x512xbf16>, vector<512x128xbf16>, vector<64x128xf32> -> vector<64x128xf32>
    %33 = arith.truncf %32 : vector<64x128xf32> to vector<64x128xbf16>
    %c320 = arith.constant 320 : index
    %c0_29 = arith.constant 0 : index
    %34 = vector.load %arg8[%c320, %c0_29] : memref<576x128xbf16, #tpu.memory_space<vmem>>, vector<64x128xbf16>
    tpu.vector_store %arg8[%c320, %c0_29], %33 {strides = array<i32>} : memref<576x128xbf16, #tpu.memory_space<vmem>>, vector<64x128xbf16>,
    %c6 = arith.constant 6 : index
    %c0_30 = arith.constant 0 : index
    %c0_31 = arith.constant 0 : index
    %35 = vector.load %arg3[%c6, %c0_30, %c0_31] : memref<9x512x128xbf16, #tpu.memory_space<vmem>>, vector<1x512x128xbf16>
    %36 = vector.shape_cast %35 : vector<1x512x128xbf16> to vector<512x128xbf16>
    %cst_32 = arith.constant dense<0.000000e+00> : vector<64x128xf32>
    %37 = tpu.matmul %4, %36, %cst_32 {dimension_numbers = #tpu.dot_dimension_numbers<[1], [0], [0], [1], [0, 0, 1, 1], [], []>} : vector<64x512xbf16>, vector<512x128xbf16>, vector<64x128xf32> -> vector<64x128xf32>
    %38 = arith.truncf %37 : vector<64x128xf32> to vector<64x128xbf16>
    %c384 = arith.constant 384 : index
    %c0_33 = arith.constant 0 : index
    %39 = vector.load %arg8[%c384, %c0_33] : memref<576x128xbf16, #tpu.memory_space<vmem>>, vector<64x128xbf16>
    tpu.vector_store %arg8[%c384, %c0_33], %38 {strides = array<i32>} : memref<576x128xbf16, #tpu.memory_space<vmem>>, vector<64x128xbf16>,
    %c7 = arith.constant 7 : index
    %c0_34 = arith.constant 0 : index
    %c0_35 = arith.constant 0 : index
    %40 = vector.load %arg3[%c7, %c0_34, %c0_35] : memref<9x512x128xbf16, #tpu.memory_space<vmem>>, vector<1x512x128xbf16>
    %41 = vector.shape_cast %40 : vector<1x512x128xbf16> to vector<512x128xbf16>
    %cst_36 = arith.constant dense<0.000000e+00> : vector<64x128xf32>
    %42 = tpu.matmul %4, %41, %cst_36 {dimension_numbers = #tpu.dot_dimension_numbers<[1], [0], [0], [1], [0, 0, 1, 1], [], []>} : vector<64x512xbf16>, vector<512x128xbf16>, vector<64x128xf32> -> vector<64x128xf32>
    %43 = arith.truncf %42 : vector<64x128xf32> to vector<64x128xbf16>
    %c448 = arith.constant 448 : index
    %c0_37 = arith.constant 0 : index
    %44 = vector.load %arg8[%c448, %c0_37] : memref<576x128xbf16, #tpu.memory_space<vmem>>, vector<64x128xbf16>
    tpu.vector_store %arg8[%c448, %c0_37], %43 {strides = array<i32>} : memref<576x128xbf16, #tpu.memory_space<vmem>>, vector<64x128xbf16>,
    %c8 = arith.constant 8 : index
    %c0_38 = arith.constant 0 : index
    %c0_39 = arith.constant 0 : index
    %45 = vector.load %arg3[%c8, %c0_38, %c0_39] : memref<9x512x128xbf16, #tpu.memory_space<vmem>>, vector<1x512x128xbf16>
    %46 = vector.shape_cast %45 : vector<1x512x128xbf16> to vector<512x128xbf16>
    %cst_40 = arith.constant dense<0.000000e+00> : vector<64x128xf32>
    %47 = tpu.matmul %4, %46, %cst_40 {dimension_numbers = #tpu.dot_dimension_numbers<[1], [0], [0], [1], [0, 0, 1, 1], [], []>} : vector<64x512xbf16>, vector<512x128xbf16>, vector<64x128xf32> -> vector<64x128xf32>
    %48 = arith.truncf %47 : vector<64x128xf32> to vector<64x128xbf16>
    %c512 = arith.constant 512 : index
    %c0_41 = arith.constant 0 : index
    %49 = vector.load %arg8[%c512, %c0_41] : memref<576x128xbf16, #tpu.memory_space<vmem>>, vector<64x128xbf16>
    tpu.vector_store %arg8[%c512, %c0_41], %48 {strides = array<i32>} : memref<576x128xbf16, #tpu.memory_space<vmem>>, vector<64x128xbf16>,
    %c0_42 = arith.constant 0 : index
    %c0_43 = arith.constant 0 : index
    %50 = vector.load %arg4[%c0_42, %c0_43] : memref<288x576xbf16, #tpu.memory_space<vmem>>, vector<288x576xbf16>
    %c0_44 = arith.constant 0 : index
    %c0_45 = arith.constant 0 : index
    %51 = vector.load %arg8[%c0_44, %c0_45] : memref<576x128xbf16, #tpu.memory_space<vmem>>, vector<576x128xbf16>
    %cst_46 = arith.constant dense<0.000000e+00> : vector<288x128xf32>
    %52 = tpu.matmul %50, %51, %cst_46 {dimension_numbers = #tpu.dot_dimension_numbers<[1], [0], [0], [1], [0, 0, 1, 1], [], []>} : vector<288x576xbf16>, vector<576x128xbf16>, vector<288x128xf32> -> vector<288x128xf32>
    %c0_47 = arith.constant 0 : index
    %c0_48 = arith.constant 0 : index
    %c0_49 = arith.constant 0 : index
    %53 = vector.load %arg5[%c0_47, %c0_48, %c0_49] : memref<1x288x37xbf16, #tpu.memory_space<vmem>>, vector<1x288x37xbf16>
    %54 = vector.shape_cast %53 : vector<1x288x37xbf16> to vector<288x37xbf16>
    %c0_50 = arith.constant 0 : index
    %c0_51 = arith.constant 0 : index
    %55 = vector.load %arg6[%c0_50, %c0_51] : memref<37x128xbf16, #tpu.memory_space<vmem>>, vector<37x128xbf16>
    %cst_52 = arith.constant dense<0.000000e+00> : vector<288x128xf32>
    %56 = tpu.matmul %54, %55, %cst_52 {dimension_numbers = #tpu.dot_dimension_numbers<[1], [0], [0], [1], [0, 0, 1, 1], [], []>} : vector<288x37xbf16>, vector<37x128xbf16>, vector<288x128xf32> -> vector<288x128xf32>
    %57 = arith.addf %52, %56 : vector<288x128xf32>
    %58 = vector.shape_cast %57 : vector<288x128xf32> to vector<1x288x128xf32>
    %c0_53 = arith.constant 0 : index
    %c0_54 = arith.constant 0 : index
    %c0_55 = arith.constant 0 : index
    %59 = vector.load %arg7[%c0_53, %c0_54, %c0_55] : memref<1x288x128xf32, #tpu.memory_space<vmem>>, vector<1x288x128xf32>
    tpu.vector_store %arg7[%c0_53, %c0_54, %c0_55], %58 {strides = array<i32>} : memref<1x288x128xf32, #tpu.memory_space<vmem>>, vector<1x288x128xf32>,
    return
  }
  func.func @transform_0(%arg0: i32) -> (i32, i32, i32) {
    %c0_i32 = arith.constant 0 : i32
    %c0_i32_0 = arith.constant 0 : i32
    %c0_i32_1 = arith.constant 0 : i32
    return %arg0, %c0_i32, %c0_i32_0 : i32, i32, i32
  }
  func.func @transform_1(%arg0: i32) -> (i32, i32) {
    %c0_i32 = arith.constant 0 : i32
    %c0_i32_0 = arith.constant 0 : i32
    %c0_i32_1 = arith.constant 0 : i32
    return %c0_i32, %c0_i32_0 : i32, i32
  }
  func.func @transform_2(%arg0: i32) -> (i32, i32, i32) {
    %c0_i32 = arith.constant 0 : i32
    %c0_i32_0 = arith.constant 0 : i32
    %c0_i32_1 = arith.constant 0 : i32
    %c0_i32_2 = arith.constant 0 : i32
    return %c0_i32, %c0_i32_0, %c0_i32_1 : i32, i32, i32
  }
  func.func @transform_3(%arg0: i32) -> (i32, i32) {
    %c0_i32 = arith.constant 0 : i32
    %c0_i32_0 = arith.constant 0 : i32
    %c0_i32_1 = arith.constant 0 : i32
    return %c0_i32, %c0_i32_0 : i32, i32
  }
  func.func @transform_4(%arg0: i32) -> (i32, i32, i32) {
    %c0_i32 = arith.constant 0 : i32
    %c0_i32_0 = arith.constant 0 : i32
    %c0_i32_1 = arith.constant 0 : i32
    return %arg0, %c0_i32, %c0_i32_0 : i32, i32, i32
  }
  func.func @transform_5(%arg0: i32) -> (i32, i32) {
    %c0_i32 = arith.constant 0 : i32
    %c0_i32_0 = arith.constant 0 : i32
    %c0_i32_1 = arith.constant 0 : i32
    return %c0_i32, %c0_i32_0 : i32, i32
  }
  func.func @transform_6(%arg0: i32) -> (i32, i32, i32) {
    %c0_i32 = arith.constant 0 : i32
    %c0_i32_0 = arith.constant 0 : i32
    %c0_i32_1 = arith.constant 0 : i32
    return %arg0, %c0_i32, %c0_i32_0 : i32, i32, i32
  }
}

</mosaic_0001>

<bundles_post_ra>
// kernel: tpu_custom_call.1
= control target key start
LH: loop header
LB: loop body
LE: loop exit
PB: predicated region body
PF: predicated region fallthrough
CT: control target
= control target key end

     0   :  { %s9360_s0 = inlined_call_operand.vmem [shape: f32[2,64,20], index: 0, kind: input, shape index: {}]   ;;  %s9361_s1 = inlined_call_operand.hbm [shape: f32[20,512], index: 1, kind: input, shape index: {}]   ;;  %s9362_s2 = inlined_call_operand.hbm [shape: bf16[9,512,128], index: 2, kind: input, shape index: {}]   ;;  %s9363_s3 = inlined_call_operand.hbm [shape: bf16[288,576], index: 3, kind: input, shape index: {}]   ;;  %s9364_s4 = inlined_call_operand.vmem [shape: bf16[2,288,37], index: 4, kind: input, shape index: {}]   ;;  %s9365_s5 = inlined_call_operand.hbm [shape: bf16[37,128], index: 5, kind: input, shape index: {}]   ;;  %s9366_s6 = inlined_call_operand.hbm [shape: f32[2,288,128], index: 6, kind: output, shape index: {}]  }
   0x1   :  { %9370 = sst [smem:[#allocation21_spill]] %s9361_s1 }
   0x2   :  { %9371 = sst [smem:[#allocation22_spill]] %s9362_s2 }
   0x3   :  { %11 = vsyncpa [#allocation4], 0 }
   0x4   :  { %12 = vsyncpa [#allocation7], 0 }
   0x5   :  { %13 = vsyncpa [#allocation10], 0 }
   0x6   :  { %14 = vsyncpa [#allocation5], 0 }
   0x7   :  { %16 = vsyncpa [#allocation5 + $0x1], 0  ;;  %s8769_s21 = smov 0   ;;  %s8771_s22 = smov 0  }
   0x8   :  { %s8773_s23 = smov 0   ;;  %s8775_s24 = smov 0  }
   0x9 LB: > { %9372 = sst [smem:[#allocation16_spill]] %s8715_s23  ;;  %s8790_s25 = sadd.s32 4294967295, %s8719_s24   ;;  %s8719_s24 = sphi %s8775_s24, %s9385_s24   ;;  %s8715_s23 = sphi %s8773_s23, %s9387_s23   ;;  %s8711_s22 = sphi %s8771_s22, %s9389_s22   ;;  %s8707_s21 = sphi %s8769_s21, %s9388_s21  }
   0xa   : > { %s5946_s26 = sadd.s32 4294967294, %s8719_s24   ;;  %s8794_s27 = sadd.s32 1, %s8719_s24  }
   0xb   : > { %9373 = sst [smem:[#allocation17_spill]] %s8794_s27  ;;  %s165_s28 = sadd.s32 1, %s8715_s23 }
   0xc   : > { %s162_s29 = ssub.s32 %s8719_s24, %s8794_s27  ;;  %p175_p0 = scmp.ne.s32.totalorder %s8715_s23, %s8711_s22 }
   0xd   : > { %p163_p1 = scmp.eq.s32.totalorder %s162_s29, 0  ;;  %p176_p2 = scmp.eq.s32.totalorder %s8790_s25, 1 }
   0xe   : > { %p181_p3 = scmp.ne.s32.totalorder %s8711_s22, %s8707_s21  ;;  %p182_p4 = scmp.eq.s32.totalorder %s5946_s26, 1 }
   0xf   : > { %s8805_s30 = scalar_select %p163_p1, %s8715_s23, %s165_s28  }
  0x10   : > { %p8807_p5 = por %p176_p2, %p175_p0  ;;  %p8811_p6 = por %p182_p4, %p181_p3 }
  0x11   : > { %9374 = sst [smem:[#allocation18_spill]] %s8805_s30  ;;  %p5947_p7 = scmp.ge.s32.totalorder %s8719_s24, 1 }
  0x12   : > { %p189_p8 = scmp.lt.s32.totalorder %s8719_s24, 3  ;;  %p8471_p9 = scmp.eq.s32.totalorder %s8790_s25, 0 }
  0x13   : > { %s9378_s2 = sld [smem:[#allocation22_spill]]  ;;  %s8721_s13 = smov [#allocation6]  }
  0x14   : > { %p8818_p10 = pnand %p5947_p7, %p189_p8  ;;  %s216_s14 = sshll.u32 %s8721_s13, 4  ;;  %s217_s14 = int_to_ptr.vmem [resolvable:$true] %s216_s14 }
  0x15   : > { %s9380_s1 = sld [smem:[#allocation21_spill]]  ;;  %s8722_s19 = smov 64  }
  0x16   : > { %p8454_p11 = pneg %p8818_p10  ;;  %s8723_s20 = smov 4  }
  0x17   : > { %s8724_s26 = smov [#allocation3]   ;;  %s8725_s29 = smov 512  }
  0x18   : > { %p8829_p12 = pnand %p8471_p9, %p8454_p11  ;;  %s202_s28 = sshll.u32 %s8724_s26, 4  ;;  %s203_s28 = int_to_ptr.vmem [resolvable:$true] %s202_s28 }
  0x19   : > { %s214_s12 = sshll.u32 %s9378_s2, 4  ;;  %s8726_s10 = smov 32   ;;  %s215_s12 = int_to_ptr.hbm [resolvable:$true] %s214_s12 }
  0x1a   : > { %8460 = dma.hbm_to_vmem [thread:$0]  (!%p8829_p12), %s215_s12, 36864, %s217_s14, [#allocation7], %s8722_s19, %s8722_s19, %s8723_s20  }
  0x1b   : > { %s200_s18 = sshll.u32 %s9380_s1, 4  ;;  %s228_s16 = sshll.u32 %s9363_s3, 4  ;;  %s201_s18 = int_to_ptr.hbm [resolvable:$true] %s200_s18  ;;  %s229_s16 = int_to_ptr.hbm [resolvable:$true] %s228_s16 }
  0x1c   : > { %8457 = dma.hbm_to_vmem [thread:$0]  (!%p8829_p12), %s201_s18, 1536, %s203_s28, [#allocation4], %s8725_s29, %s8725_s29, %s8726_s10  }
  0x1d   : > { %s8727_s17 = smov [#allocation8]   ;;  %s242_s12 = sshll.u32 %s9365_s5, 4  ;;  %s243_s12 = int_to_ptr.hbm [resolvable:$true] %s242_s12 }
  0x1e   : > { %s230_s1 = sshll.u32 %s8727_s17, 4  ;;  %s8728_s14 = smov 320   ;;  %s231_s1 = int_to_ptr.vmem [resolvable:$true] %s230_s1 }
  0x1f   : > { %s8729_s26 = smov 20   ;;  %s8730_s23 = smov [#allocation9]  }
  0x20   : > { %8463 = dma.hbm_to_vmem [thread:$0]  (!%p8829_p12), %s229_s16, 11520, %s231_s1, [#allocation7], %s8728_s14, %s8728_s14, %s8729_s26  }
  0x21   : > { %s244_s27 = sshll.u32 %s8730_s23, 4  ;;  %276 = sbr.rel (%p8818_p10) target bundleno = 1337 (0x539), region = 44  ;;  %s245_s27 = int_to_ptr.vmem [resolvable:$true] %s244_s27 }
  0x22   : > { %8466 = dma.hbm_to_vmem [thread:$0]  (!%p8829_p12), %s243_s12, 320, %s245_s27, [#allocation10], %s8722_s19, %s8722_s19, %s8723_s20  }
  0x26   : > { %8690 = dma.done.wait (%p8471_p9), [#allocation4], 1536  }
  0x27   : > { %8692 = vsyncadd (%p8471_p9), [#allocation4], 4294965760 }
  0x28   : > { %8694 = dma.done.wait (%p8471_p9), [#allocation7], 48384  }
  0x29   : > { %8696 = vsyncadd (%p8471_p9), [#allocation7], 4294918912 }
  0x2a   : > { %8698 = dma.done.wait (%p8471_p9), [#allocation10], 320  }
  0x2b   : > { %8700 = vsyncadd (%p8471_p9), [#allocation10], 4294966976  ;;  %p327_p13 = scmp.lt.s32.totalorder %s8790_s25, 1  ;;  %vm383_vm0 = vcmask 1043456   ;;  %v354_v0 = vld [vmem:[#allocation3 + $0x40] sm:$0xf] }
  0x2c   : > { %v355_v1 = vld [vmem:[#allocation3 + $0x48] sm:$0xf]  ;;  %v356_v2 = vld [vmem:[#allocation3 + $0x50] sm:$0xf]  ;;  %5961 = vmatpush.msk.msra.mxu0 %vm383_vm0, %v354_v0  ;;  %v357_v3 = vld [vmem:[#allocation3 + $0x58] sm:$0xf] }
  0x2d   : > { %s8866_s1 = scalar_select %p327_p13, %s8790_s25, 1  ;;  %5970 = vmatpush.msk.msra.mxu1 %vm383_vm0, %v355_v1  ;;  %v350_v4 = vld [vmem:[#allocation3 + $0x20] sm:$0xff]  ;;  %v351_v5 = vld [vmem:[#allocation3 + $0x28] sm:$0xff]  ;;  %5979 = vmatpush.msk.msra.mxu2 %vm383_vm0, %v356_v2  ;;  %v352_v6 = vld [vmem:[#allocation3 + $0x30] sm:$0xff]  ;;  %vm358_vm1 = vcmask 162816   ;;  %vm4457_vm2 = vcmask 1041408  }
  0x2e   : > { %5988 = vmatpush.msk.msra.mxu3 %vm383_vm0, %v357_v3  ;;  %v353_v7 = vld [vmem:[#allocation3 + $0x38] sm:$0xff]  ;;  %v346_v8 = vld [vmem:[#allocation3] sm:$0xff]  ;;  %410 = vmatpush.msra.mxu0 %v350_v4  ;;  %v347_v9 = vld [vmem:[#allocation3 + $0x8] sm:$0xff]  ;;  %vm4458_vm3 = vcmask 1042432   ;;  %vm4402_vm4 = vcmask 302080   ;;  %vm5229_vm5 = vcmask 523264  }
  0x2f   : > { %s7772_s2 = sshll.u32 %s8866_s1, 6  ;;  %451 = vmatpush.msra.mxu1 %v351_v5  ;;  %v348_v10 = vld [vmem:[#allocation3 + $0x10] sm:$0xff]  ;;  %v349_v11 = vld [vmem:[#allocation3 + $0x18] sm:$0xff]  ;;  %492 = vmatpush.msra.mxu2 %v352_v6  ;;  %v7778_v25 = vld [vmem:[#allocation6 + $0x28] sm:$0xff]  ;;  %s8434_s9 = smul.u32 144, %s8866_s1 }
  0x30   : > { %s8872_s30 = scalar_lea.vmem %s9360_s0, %s7772_s2  ;;  %533 = vmatpush.msra.mxu3 %v353_v7  ;;  %411 = vmatpush.msra.mxu0 %v346_v8  ;;  %v7780_v16 = vld [vmem:[#allocation6 + $0x38] sm:$0xff]  ;;  %v7779_v20 = vld [vmem:[#allocation6 + $0x30] sm:$0xff]  ;;  %v7786_v26 = vld [vmem:[#allocation6 + $0x68] sm:$0xff]  ;;  %s324_s20 = sand.u32 1, %s8711_s22  }
  0x31   : > { %v338_v12 = vld [vmem:[%s8872_s30] sm:$0xff]  ;;  %452 = vmatpush.msra.mxu1 %v347_v9  ;;  %493 = vmatpush.msra.mxu2 %v348_v10  ;;  %v339_v13 = vld [vmem:[%s8872_s30 + $0x8] sm:$0xff]  ;;  %v340_v14 = vld [vmem:[%s8872_s30 + $0x10] sm:$0xff]  ;;  %s9094_s19 = scalar_lea.vmem %s9364_s4, %s8434_s9  ;;  %s8433_s28 = smul.u32 288, %s324_s20 }
  0x32   : > { %534 = vmatpush.msra.mxu3 %v349_v11  ;;  %5962 = vmatmul.msk.f32.vlgmr.msra.gmra.mxu0 %vm358_vm1, %v338_v12  ;;  %v341_v15 = vld [vmem:[%s8872_s30 + $0x18] sm:$0xff]  ;;  %v7787_v21 = vld [vmem:[#allocation6 + $0x70] sm:$0xff]  ;;  %v342_v22 = vld [vmem:[%s8872_s30 + $0x20] sm:$0xff]  ;;  %s8435_s10 = smul.u32 288, %s8790_s25  ;;  %s5816_s25 = scalar_lea.sflag [#allocation5], %s324_s20 }
  0x33   : > { %5971 = vmatmul.msk.f32.vlgmr.msra.gmra.mxu1 %vm358_vm1, %v338_v12  ;;  %5980 = vmatmul.msk.f32.vlgmr.msra.gmra.mxu2 %vm358_vm1, %v338_v12  ;;  %v7788_v17 = vld [vmem:[#allocation6 + $0x78] sm:$0xff]  ;;  %v7795_v23 = vld [vmem:[#allocation6 + $0xb0] sm:$0xff]  ;;  %v7794_v27 = vld [vmem:[#allocation6 + $0xa8] sm:$0xff]  ;;  %s9237_s29 = scalar_lea.vmem [#allocation11], %s8433_s28  ;;  %s8665_s23 = scalar_lea.hbm %s9366_s6, 576 }
  0x34   : > { %5989 = vmatmul.msk.f32.vlgmr.msra.gmra.mxu3 %vm358_vm1, %v338_v12  ;;  %v7796_v18 = vld [vmem:[#allocation6 + $0xb8] sm:$0xff]  ;;  %832 = vmatpush.bf16.msrb.mxu0 %v7780_v16  ;;  %v7803_v24 = vld [vmem:[#allocation6 + $0xf0] sm:$0xff]  ;;  %v7802_v28 = vld [vmem:[#allocation6 + $0xe8] sm:$0xff]  ;;  %s5827_s16 = scalar_lea.hbm %s9366_s6, %s8435_s10  ;;  %s5828_s17 = sshll.u32 %s9237_s29, 4  ;;  %s5829_s17 = int_to_ptr.vmem [resolvable:$true] %s5828_s17 }
  0x35   : > { %v7804_v19 = vld [vmem:[#allocation6 + $0xf8] sm:$0xff]  ;;  %861 = vmatpush.bf16.msrb.mxu1 %v7788_v17  ;;  %890 = vmatpush.bf16.msrb.mxu2 %v7796_v18  ;;  %v7777_v29 = vld [vmem:[#allocation6 + $0x20] sm:$0xff]  ;;  %v343_v31 = vld [vmem:[%s8872_s30 + $0x28] sm:$0xff]  ;;  %s5830_s12 = sshll.u32 %s5827_s16, 4  ;;  %s5831_s12 = int_to_ptr.hbm [resolvable:$true] %s5830_s12 }
  0x36   : > { %919 = vmatpush.bf16.msrb.mxu3 %v7804_v19  ;;  %v7785_v30 = vld [vmem:[#allocation6 + $0x60] sm:$0xff]  ;;  %v7776_v34 = vld [vmem:[#allocation6 + $0x18] sm:$0xff]  ;;  %v344_v36 = vld [vmem:[%s8872_s30 + $0x30] sm:$0xff]  ;;  %s8659_s14 = sshra.s32 %s5831_s12, 4  ;;  %s8660_s14 = int_to_ptr.hbm [resolvable:$true] %s8659_s14 }
  0x37   : > { %v7793_v32 = vld [vmem:[#allocation6 + $0xa0] sm:$0xff]  ;;  %v7784_v35 = vld [vmem:[#allocation6 + $0x58] sm:$0xff]  ;;  %v7775_v38 = vld [vmem:[#allocation6 + $0x10] sm:$0xff]  ;;  %s8661_s26 = scalar_lea.hbm %s8660_s14, 288  ;;  %p8666_p3 = scmp.lt.s32.totalorder %s8660_s14, %s9366_s6 }
  0x38   : > { %833 = vmatpush.bf16.msrb.mxu0 %v7779_v20  ;;  %v7801_v33 = vld [vmem:[#allocation6 + $0xe0] sm:$0xff]  ;;  %v345_v37 = vld [vmem:[%s8872_s30 + $0x38] sm:$0xff]  ;;  %v7783_v39 = vld [vmem:[#allocation6 + $0x50] sm:$0xff]  ;;  %p8662_p0 = scmp.ne.s32.totalorder %s8660_s14, %s8661_s26  ;;  %p8667_p4 = scmp.lt.s32.totalorder %s8665_s23, %s8661_s26 }
  0x39   : > { %862 = vmatpush.bf16.msrb.mxu1 %v7787_v21  ;;  %891 = vmatpush.bf16.msrb.mxu2 %v7795_v23  ;;  %v7792_v40 = vld [vmem:[#allocation6 + $0x98] sm:$0xff]  ;;  %v7774_v42 = vld [vmem:[#allocation6 + $0x8] sm:$0xff]  ;;  %v7791_v44 = vld [vmem:[#allocation6 + $0x90] sm:$0xff] }
  0x3a   : > { %5963 = vmatmul.msk.f32.gmra.mxu0 %vm358_vm1, %v339_v13  ;;  %920 = vmatpush.bf16.msrb.mxu3 %v7803_v24  ;;  %v7800_v41 = vld [vmem:[#allocation6 + $0xd8] sm:$0xff]  ;;  %v7782_v43 = vld [vmem:[#allocation6 + $0x48] sm:$0xff]  ;;  %v7799_v45 = vld [vmem:[#allocation6 + $0xd0] sm:$0xff]  ;;  %p8663_p1 = pnand %p8662_p0, %p8807_p5  ;;  %p8668_p7 = por %p8667_p4, %p8666_p3 }
  0x3b   : > { %5972 = vmatmul.msk.f32.gmra.mxu1 %vm358_vm1, %v339_v13  ;;  %5981 = vmatmul.msk.f32.gmra.mxu2 %vm358_vm1, %v339_v13  ;;  %v7773_v46 = vld [vmem:[#allocation6] sm:$0xff]  ;;  %v7790_v48 = vld [vmem:[#allocation6 + $0x88] sm:$0xff]  ;;  %v7812_v60 = vld [vmem:[#allocation6 + $0x138] sm:$0xff] }
  0x3c   : > { %5990 = vmatmul.msk.f32.gmra.mxu3 %vm358_vm1, %v339_v13  ;;  %834 = vmatpush.bf16.msrb.mxu0 %v7778_v25  ;;  %v7781_v47 = vld [vmem:[#allocation6 + $0x40] sm:$0xff]  ;;  %v7798_v49 = vld [vmem:[#allocation6 + $0xc8] sm:$0xff]  ;;  %v7820_v61 = vld [vmem:[#allocation6 + $0x178] sm:$0xff]  ;;  %p8664_p2 = pneg %p8663_p1 }
  0x3d   : > { %863 = vmatpush.bf16.msrb.mxu1 %v7786_v26  ;;  %892 = vmatpush.bf16.msrb.mxu2 %v7794_v27  ;;  %v7789_v50 = vld [vmem:[#allocation6 + $0x80] sm:$0xff]  ;;  %v7811_v0 = vld [vmem:[#allocation6 + $0x130] sm:$0xff]  ;;  %v7828_v6 = vld [vmem:[#allocation6 + $0x1b8] sm:$0xff] }
  0x3e   : > { %921 = vmatpush.bf16.msrb.mxu3 %v7802_v28  ;;  %v7797_v51 = vld [vmem:[#allocation6 + $0xc0] sm:$0xff]  ;;  %v7819_v1 = vld [vmem:[#allocation6 + $0x170] sm:$0xff]  ;;  %v7836_v7 = vld [vmem:[#allocation6 + $0x1f8] sm:$0xff]  ;;  %p8669_p8 = pnand %p8668_p7, %p8664_p2 }
  0x3f   : > { %v7810_v8 = vld [vmem:[#allocation6 + $0x128] sm:$0xff]  ;;  %v7827_v10 = vld [vmem:[#allocation6 + $0x1b0] sm:$0xff]  ;;  %v7816_v23 = vld [vmem:[#allocation6 + $0x158] sm:$0xff] }
  0x40   : > { %835 = vmatpush.bf16.msrb.mxu0 %v7777_v29  ;;  %v7818_v9 = vld [vmem:[#allocation6 + $0x168] sm:$0xff]  ;;  %v7835_v11 = vld [vmem:[#allocation6 + $0x1f0] sm:$0xff]  ;;  %v7825_v24 = vld [vmem:[#allocation6 + $0x1a0] sm:$0xff] }
  0x41   : > { %864 = vmatpush.bf16.msrb.mxu1 %v7785_v30  ;;  %893 = vmatpush.bf16.msrb.mxu2 %v7793_v32  ;;  %v7826_v20 = vld [vmem:[#allocation6 + $0x1a8] sm:$0xff]  ;;  %v7833_v25 = vld [vmem:[#allocation6 + $0x1e0] sm:$0xff]  ;;  %v7807_v28 = vld [vmem:[#allocation6 + $0x110] sm:$0xff] }
  0x42   : > { %5964 = vmatmul.msk.f32.gmra.mxu0 %vm358_vm1, %v340_v14  ;;  %922 = vmatpush.bf16.msrb.mxu3 %v7801_v33  ;;  %v7834_v21 = vld [vmem:[#allocation6 + $0x1e8] sm:$0xff]  ;;  %v7815_v29 = vld [vmem:[#allocation6 + $0x150] sm:$0xff] }
  0x43   : > { %5973 = vmatmul.msk.f32.gmra.mxu1 %vm358_vm1, %v340_v14  ;;  %5982 = vmatmul.msk.f32.gmra.mxu2 %vm358_vm1, %v340_v14 }
  0x44   : > { %5991 = vmatmul.msk.f32.gmra.mxu3 %vm358_vm1, %v340_v14  ;;  %836 = vmatpush.bf16.msrb.mxu0 %v7776_v34  ;;  %v7809_v14 = vld [vmem:[#allocation6 + $0x120] sm:$0xff]  ;;  %v7824_v34 = vld [vmem:[#allocation6 + $0x198] sm:$0xff] }
  0x45   : > { %865 = vmatpush.bf16.msrb.mxu1 %v7784_v35  ;;  %894 = vmatpush.bf16.msrb.mxu2 %v7792_v40  ;;  %v7832_v35 = vld [vmem:[#allocation6 + $0x1d8] sm:$0xff]  ;;  %v7805_v40 = vld [vmem:[#allocation6 + $0x100] sm:$0xff] }
  0x46   : > { %923 = vmatpush.bf16.msrb.mxu3 %v7800_v41  ;;  %v7813_v41 = vld [vmem:[#allocation6 + $0x140] sm:$0xff] }
  0x48   : > { %837 = vmatpush.bf16.msrb.mxu0 %v7775_v38  ;;  %v7823_v38 = vld [vmem:[#allocation6 + $0x190] sm:$0xff] }
  0x49   : > { %866 = vmatpush.bf16.msrb.mxu1 %v7783_v39  ;;  %895 = vmatpush.bf16.msrb.mxu2 %v7791_v44  ;;  %v7831_v39 = vld [vmem:[#allocation6 + $0x1d0] sm:$0xff] }
  0x4a   : > { %5965 = vmatmul.msk.f32.gmra.mxu0 %vm358_vm1, %v341_v15  ;;  %924 = vmatpush.bf16.msrb.mxu3 %v7799_v45 }
  0x4b   : > { %5974 = vmatmul.msk.f32.gmra.mxu1 %vm358_vm1, %v341_v15  ;;  %5983 = vmatmul.msk.f32.gmra.mxu2 %vm358_vm1, %v341_v15 }
  0x4c   : > { %5992 = vmatmul.msk.f32.gmra.mxu3 %vm358_vm1, %v341_v15  ;;  %838 = vmatpush.bf16.msrb.mxu0 %v7774_v42  ;;  %v7817_v15 = vld [vmem:[#allocation6 + $0x160] sm:$0xff] }
  0x4d   : > { %867 = vmatpush.bf16.msrb.mxu1 %v7782_v43  ;;  %896 = vmatpush.bf16.msrb.mxu2 %v7790_v48 }
  0x4e   : > { %925 = vmatpush.bf16.msrb.mxu3 %v7798_v49 }
  0x50   : > { %839 = vmatpush.bf16.msrb.mxu0 %v7773_v46  ;;  %v7822_v46 = vld [vmem:[#allocation6 + $0x188] sm:$0xff] }
  0x51   : > { %868 = vmatpush.bf16.msrb.mxu1 %v7781_v47  ;;  %897 = vmatpush.bf16.msrb.mxu2 %v7789_v50  ;;  %v7830_v47 = vld [vmem:[#allocation6 + $0x1c8] sm:$0xff]  ;;  %v7821_v50 = vld [vmem:[#allocation6 + $0x180] sm:$0xff] }
  0x52   : > { %5966 = vmatmul.msk.f32.gmra.mxu0 %vm358_vm1, %v342_v22  ;;  %926 = vmatpush.bf16.msrb.mxu3 %v7797_v51  ;;  %v7829_v51 = vld [vmem:[#allocation6 + $0x1c0] sm:$0xff] }
  0x53   : > { %5975 = vmatmul.msk.f32.gmra.mxu1 %vm358_vm1, %v342_v22  ;;  %5984 = vmatmul.msk.f32.gmra.mxu2 %vm358_vm1, %v342_v22 }
  0x54   : > { %5993 = vmatmul.msk.f32.gmra.mxu3 %vm358_vm1, %v342_v22  ;;  %1221 = vmatpush.bf16.msra.mxu0 %v7812_v60  ;;  %v7808_v22 = vld [vmem:[#allocation6 + $0x118] sm:$0xff] }
  0x55   : > { %1250 = vmatpush.bf16.msra.mxu1 %v7820_v61  ;;  %1279 = vmatpush.bf16.msra.mxu2 %v7828_v6 }
  0x56   : > { %1308 = vmatpush.bf16.msra.mxu3 %v7836_v7 }
  0x58   : > { %1222 = vmatpush.bf16.msra.mxu0 %v7811_v0 }
  0x59   : > { %1251 = vmatpush.bf16.msra.mxu1 %v7819_v1  ;;  %1280 = vmatpush.bf16.msra.mxu2 %v7827_v10  ;;  %v7843_v10 = vld [vmem:[#allocation6 + $0x230] sm:$0xff] }
  0x5a   : > { %5967 = vmatmul.msk.f32.gmra.mxu0 %vm358_vm1, %v343_v31  ;;  %1309 = vmatpush.bf16.msra.mxu3 %v7835_v11  ;;  %v7851_v11 = vld [vmem:[#allocation6 + $0x270] sm:$0xff] }
  0x5b   : > { %5976 = vmatmul.msk.f32.gmra.mxu1 %vm358_vm1, %v343_v31  ;;  %5985 = vmatmul.msk.f32.gmra.mxu2 %vm358_vm1, %v343_v31 }
  0x5c   : > { %5994 = vmatmul.msk.f32.gmra.mxu3 %vm358_vm1, %v343_v31  ;;  %1223 = vmatpush.bf16.msra.mxu0 %v7810_v8  ;;  %v7844_v8 = vld [vmem:[#allocation6 + $0x238] sm:$0xff] }
  0x5d   : > { %1252 = vmatpush.bf16.msra.mxu1 %v7818_v9  ;;  %1281 = vmatpush.bf16.msra.mxu2 %v7826_v20  ;;  %v7852_v9 = vld [vmem:[#allocation6 + $0x278] sm:$0xff]  ;;  %v7841_v20 = vld [vmem:[#allocation6 + $0x220] sm:$0xff] }
  0x5e   : > { %1310 = vmatpush.bf16.msra.mxu3 %v7834_v21  ;;  %v7849_v21 = vld [vmem:[#allocation6 + $0x260] sm:$0xff] }
  0x60   : > { %1224 = vmatpush.bf16.msra.mxu0 %v7809_v14  ;;  %v7842_v14 = vld [vmem:[#allocation6 + $0x228] sm:$0xff] }
  0x61   : > { %1253 = vmatpush.bf16.msra.mxu1 %v7817_v15  ;;  %1282 = vmatpush.bf16.msra.mxu2 %v7825_v24  ;;  %v7850_v15 = vld [vmem:[#allocation6 + $0x268] sm:$0xff]  ;;  %v7840_v24 = vld [vmem:[#allocation6 + $0x218] sm:$0xff] }
  0x62   : > { %5968 = vmatmul.msk.f32.gmra.mxu0 %vm358_vm1, %v344_v36  ;;  %1311 = vmatpush.bf16.msra.mxu3 %v7833_v25  ;;  %v7848_v25 = vld [vmem:[#allocation6 + $0x258] sm:$0xff] }
  0x63   : > { %5977 = vmatmul.msk.f32.gmra.mxu1 %vm358_vm1, %v344_v36  ;;  %5986 = vmatmul.msk.f32.gmra.mxu2 %vm358_vm1, %v344_v36 }
  0x64   : > { %5995 = vmatmul.msk.f32.gmra.mxu3 %vm358_vm1, %v344_v36  ;;  %1225 = vmatpush.bf16.msra.mxu0 %v7808_v22  ;;  %v7806_v36 = vld [vmem:[#allocation6 + $0x108] sm:$0xff] }
  0x65   : > { %1254 = vmatpush.bf16.msra.mxu1 %v7816_v23  ;;  %1283 = vmatpush.bf16.msra.mxu2 %v7824_v34  ;;  %v7858_v22 = vld [vmem:[#allocation6 + $0x2a8] sm:$0xff] }
  0x66   : > { %1312 = vmatpush.bf16.msra.mxu3 %v7832_v35  ;;  %v7866_v23 = vld [vmem:[#allocation6 + $0x2e8] sm:$0xff] }
  0x67   : > { %v7838_v34 = vld [vmem:[#allocation6 + $0x208] sm:$0xff] }
  0x68   : > { %1226 = vmatpush.bf16.msra.mxu0 %v7807_v28  ;;  %v7839_v28 = vld [vmem:[#allocation6 + $0x210] sm:$0xff]  ;;  %v7846_v35 = vld [vmem:[#allocation6 + $0x248] sm:$0xff] }
  0x69   : > { %1255 = vmatpush.bf16.msra.mxu1 %v7815_v29  ;;  %1284 = vmatpush.bf16.msra.mxu2 %v7823_v38  ;;  %v7847_v29 = vld [vmem:[#allocation6 + $0x250] sm:$0xff]  ;;  %v7837_v38 = vld [vmem:[#allocation6 + $0x200] sm:$0xff] }
  0x6a   : > { %5969 = vmatmul.msk.f32.gmra.mxu0 %vm358_vm1, %v345_v37  ;;  %1313 = vmatpush.bf16.msra.mxu3 %v7831_v39  ;;  %v7845_v39 = vld [vmem:[#allocation6 + $0x240] sm:$0xff] }
  0x6b   : > { %5978 = vmatmul.msk.f32.gmra.mxu1 %vm358_vm1, %v345_v37  ;;  %5987 = vmatmul.msk.f32.gmra.mxu2 %vm358_vm1, %v345_v37 }
  0x6c   : > { %5996 = vmatmul.msk.f32.gmra.mxu3 %vm358_vm1, %v345_v37  ;;  %v7814_v37 = vld [vmem:[#allocation6 + $0x148] sm:$0xff]  ;;  %1227 = vmatpush.bf16.msra.mxu0 %v7806_v36  ;;  %v7855_v36 = vld [vmem:[#allocation6 + $0x290] sm:$0xff] }
  0x6d   : > { %1256 = vmatpush.bf16.msra.mxu1 %v7814_v37  ;;  %1285 = vmatpush.bf16.msra.mxu2 %v7822_v46  ;;  %v7863_v37 = vld [vmem:[#allocation6 + $0x2d0] sm:$0xff]  ;;  %v7876_v46 = vld [vmem:[#allocation6 + $0x338] sm:$0xff] }
  0x6e   : > { %1314 = vmatpush.bf16.msra.mxu3 %v7830_v47  ;;  %v7884_v47 = vld [vmem:[#allocation6 + $0x378] sm:$0xff] }
  0x70   : > { %1228 = vmatpush.bf16.msra.mxu0 %v7805_v40  ;;  %v7854_v40 = vld [vmem:[#allocation6 + $0x288] sm:$0xff] }
  0x71   : > { %1257 = vmatpush.bf16.msra.mxu1 %v7813_v41  ;;  %1286 = vmatpush.bf16.msra.mxu2 %v7821_v50  ;;  %v7862_v41 = vld [vmem:[#allocation6 + $0x2c8] sm:$0xff]  ;;  %v7875_v50 = vld [vmem:[#allocation6 + $0x330] sm:$0xff] }
  0x72   : > { %1315 = vmatpush.bf16.msra.mxu3 %v7829_v51  ;;  %v7883_v51 = vld [vmem:[#allocation6 + $0x370] sm:$0xff] }
  0xaf   : > { %v413_v52 = vpop.f32.mrf.mxu0 }
  0xb0   : > { %v454_v53 = vpop.f32.mrf.mxu1 }
  0xb6   : > { %v495_v54 = vpop.f32.mrf.mxu2 }
  0xb7   : > { %v536_v55 = vpop.f32.mrf.mxu3  ;;  %v416_v56 = vpop.f32.mrf.mxu0 }
  0xb8   : > { %v457_v57 = vpop.f32.mrf.mxu1  ;;  %v8914_v58 = vpack.c.bf16 %v416_v56, %v413_v52 }
  0xb9   : > { %v8916_v59 = vpack.c.bf16 %v457_v57, %v454_v53 }
  0xba   : > { %840 = vmatmul.bf16.vlgmr.msrb.gmra.mxu0 %v8914_v58 }
  0xbb   : > { %869 = vmatmul.bf16.vlgmr.msrb.gmra.mxu1 %v8916_v59  ;;  %1610 = vmatpush.bf16.msrb.mxu0 %v7844_v8  ;;  %v7873_v8 = vld [vmem:[#allocation6 + $0x320] sm:$0xff] }
  0xbc   : > { %1639 = vmatpush.bf16.msrb.mxu1 %v7852_v9  ;;  %v7881_v9 = vld [vmem:[#allocation6 + $0x360] sm:$0xff] }
  0xbe   : > { %v498_v62 = vpop.f32.mrf.mxu2 }
  0xbf   : > { %v539_v63 = vpop.f32.mrf.mxu3  ;;  %v8920_v2 = vpack.c.bf16 %v498_v62, %v495_v54  ;;  %v419_v4 = vpop.f32.mrf.mxu0  ;;  %1611 = vmatpush.bf16.msrb.mxu0 %v7843_v10 }
  0xc0   : > { %v8922_v3 = vpack.c.bf16 %v539_v63, %v536_v55  ;;  %v460_v5 = vpop.f32.mrf.mxu1  ;;  %1640 = vmatpush.bf16.msrb.mxu1 %v7851_v11 }
  0xc1   : > { %898 = vmatmul.bf16.vlgmr.msrb.gmra.mxu2 %v8920_v2 }
  0xc2   : > { %927 = vmatmul.bf16.vlgmr.msrb.gmra.mxu3 %v8922_v3 }
  0xc3   : > { %1612 = vmatpush.bf16.msrb.mxu0 %v7842_v14 }
  0xc4   : > { %1641 = vmatpush.bf16.msrb.mxu1 %v7850_v15  ;;  %v7872_v15 = vld [vmem:[#allocation6 + $0x318] sm:$0xff] }
  0xc6   : > { %v501_v12 = vpop.f32.mrf.mxu2 }
  0xc7   : > { %v542_v13 = vpop.f32.mrf.mxu3  ;;  %v422_v16 = vpop.f32.mrf.mxu0  ;;  %1613 = vmatpush.bf16.msrb.mxu0 %v7841_v20 }
  0xc8   : > { %v463_v17 = vpop.f32.mrf.mxu1  ;;  %v8926_v18 = vpack.c.bf16 %v422_v16, %v419_v4  ;;  %v7859_v16 = vld [vmem:[#allocation6 + $0x2b0] sm:$0xff]  ;;  %1642 = vmatpush.bf16.msrb.mxu1 %v7849_v21 }
  0xc9   : > { %v8928_v19 = vpack.c.bf16 %v463_v17, %v460_v5  ;;  %v7867_v17 = vld [vmem:[#allocation6 + $0x2f0] sm:$0xff] }
  0xca   : > { %845 = vmatmul.bf16.gmra.mxu0 %v8926_v18 }
  0xcb   : > { %874 = vmatmul.bf16.gmra.mxu1 %v8928_v19  ;;  %1614 = vmatpush.bf16.msrb.mxu0 %v7840_v24  ;;  %v7897_v24 = vld [vmem:[#allocation6 + $0x3e0] sm:$0xff] }
  0xcc   : > { %1643 = vmatpush.bf16.msrb.mxu1 %v7848_v25 }
  0xce   : > { %v504_v26 = vpop.f32.mrf.mxu2 }
  0xcf   : > { %v545_v27 = vpop.f32.mrf.mxu3  ;;  %v8932_v30 = vpack.c.bf16 %v504_v26, %v501_v12  ;;  %v425_v32 = vpop.f32.mrf.mxu0  ;;  %v7860_v12 = vld [vmem:[#allocation6 + $0x2b8] sm:$0xff]  ;;  %v7857_v26 = vld [vmem:[#allocation6 + $0x2a0] sm:$0xff]  ;;  %1615 = vmatpush.bf16.msrb.mxu0 %v7839_v28 }
  0xd0   : > { %v8934_v31 = vpack.c.bf16 %v545_v27, %v542_v13  ;;  %v466_v33 = vpop.f32.mrf.mxu1  ;;  %v7868_v13 = vld [vmem:[#allocation6 + $0x2f8] sm:$0xff]  ;;  %1668 = vmatpush.bf16.msrb.mxu2 %v7860_v12  ;;  %v7865_v27 = vld [vmem:[#allocation6 + $0x2e0] sm:$0xff]  ;;  %1644 = vmatpush.bf16.msrb.mxu1 %v7847_v29  ;;  %v7890_v12 = vld [vmem:[#allocation6 + $0x3a8] sm:$0xff] }
  0xd1   : > { %903 = vmatmul.bf16.gmra.mxu2 %v8932_v30  ;;  %1697 = vmatpush.bf16.msrb.mxu3 %v7868_v13  ;;  %v7898_v13 = vld [vmem:[#allocation6 + $0x3e8] sm:$0xff] }
  0xd2   : > { %932 = vmatmul.bf16.gmra.mxu3 %v8934_v31 }
  0xd3   : > { %1616 = vmatpush.bf16.msrb.mxu0 %v7838_v34  ;;  %v7888_v34 = vld [vmem:[#allocation6 + $0x398] sm:$0xff] }
  0xd4   : > { %1669 = vmatpush.bf16.msrb.mxu2 %v7859_v16  ;;  %1645 = vmatpush.bf16.msrb.mxu1 %v7846_v35  ;;  %v7880_v16 = vld [vmem:[#allocation6 + $0x358] sm:$0xff] }
  0xd5   : > { %1698 = vmatpush.bf16.msrb.mxu3 %v7867_v17  ;;  %v7896_v35 = vld [vmem:[#allocation6 + $0x3d8] sm:$0xff] }
  0xd6   : > { %v507_v42 = vpop.f32.mrf.mxu2 }
  0xd7   : > { %v548_v43 = vpop.f32.mrf.mxu3  ;;  %v428_v44 = vpop.f32.mrf.mxu0  ;;  %1617 = vmatpush.bf16.msrb.mxu0 %v7837_v38  ;;  %v7878_v38 = vld [vmem:[#allocation6 + $0x348] sm:$0xff] }
  0xd8   : > { %v469_v45 = vpop.f32.mrf.mxu1  ;;  %v8938_v48 = vpack.c.bf16 %v428_v44, %v425_v32  ;;  %1670 = vmatpush.bf16.msrb.mxu2 %v7858_v22  ;;  %v7856_v32 = vld [vmem:[#allocation6 + $0x298] sm:$0xff]  ;;  %1646 = vmatpush.bf16.msrb.mxu1 %v7845_v39 }
  0xd9   : > { %v8940_v49 = vpack.c.bf16 %v469_v45, %v466_v33  ;;  %1699 = vmatpush.bf16.msrb.mxu3 %v7866_v23  ;;  %v7864_v33 = vld [vmem:[#allocation6 + $0x2d8] sm:$0xff]  ;;  %v7889_v23 = vld [vmem:[#allocation6 + $0x3a0] sm:$0xff] }
  0xda   : > { %850 = vmatmul.bf16.gmra.mxu0 %v8938_v48 }
  0xdb   : > { %879 = vmatmul.bf16.gmra.mxu1 %v8940_v49 }
  0xdc   : > { %1671 = vmatpush.bf16.msrb.mxu2 %v7857_v26  ;;  %v7871_v26 = vld [vmem:[#allocation6 + $0x310] sm:$0xff] }
  0xdd   : > { %1700 = vmatpush.bf16.msrb.mxu3 %v7865_v27  ;;  %v7879_v27 = vld [vmem:[#allocation6 + $0x350] sm:$0xff] }
  0xde   : > { %v510_v52 = vpop.f32.mrf.mxu2 }
  0xdf   : > { %v551_v53 = vpop.f32.mrf.mxu3  ;;  %v8944_v54 = vpack.c.bf16 %v510_v52, %v507_v42  ;;  %v431_v56 = vpop.f32.mrf.mxu0  ;;  %v7853_v42 = vld [vmem:[#allocation6 + $0x280] sm:$0xff] }
  0xe0   : > { %v8946_v55 = vpack.c.bf16 %v551_v53, %v548_v43  ;;  %v472_v57 = vpop.f32.mrf.mxu1  ;;  %1672 = vmatpush.bf16.msrb.mxu2 %v7856_v32  ;;  %v7861_v43 = vld [vmem:[#allocation6 + $0x2c0] sm:$0xff] }
  0xe1   : > { %908 = vmatmul.bf16.gmra.mxu2 %v8944_v54  ;;  %1701 = vmatpush.bf16.msrb.mxu3 %v7864_v33 }
  0xe2   : > { %937 = vmatmul.bf16.gmra.mxu3 %v8946_v55 }
  0xe4   : > { %1673 = vmatpush.bf16.msrb.mxu2 %v7855_v36 }
  0xe5   : > { %1702 = vmatpush.bf16.msrb.mxu3 %v7863_v37  ;;  %v7870_v37 = vld [vmem:[#allocation6 + $0x308] sm:$0xff] }
  0xe6   : > { %v513_v60 = vpop.f32.mrf.mxu2 }
  0xe7   : > { %v554_v61 = vpop.f32.mrf.mxu3  ;;  %v434_v62 = vpop.f32.mrf.mxu0 }
  0xe8   : > { %v475_v63 = vpop.f32.mrf.mxu1  ;;  %v8950_v0 = vpack.c.bf16 %v434_v62, %v431_v56  ;;  %1674 = vmatpush.bf16.msrb.mxu2 %v7854_v40  ;;  %v7892_v56 = vld [vmem:[#allocation6 + $0x3b8] sm:$0xff] }
  0xe9   : > { %v8952_v1 = vpack.c.bf16 %v475_v63, %v472_v57  ;;  %1703 = vmatpush.bf16.msrb.mxu3 %v7862_v41  ;;  %v7900_v57 = vld [vmem:[#allocation6 + $0x3f8] sm:$0xff]  ;;  %v7887_v41 = vld [vmem:[#allocation6 + $0x390] sm:$0xff] }
  0xea   : > { %855 = vmatmul.bf16.gmra.mxu0 %v8950_v0 }
  0xeb   : > { %884 = vmatmul.bf16.gmra.mxu1 %v8952_v1 }
  0xec   : > { %1675 = vmatpush.bf16.msrb.mxu2 %v7853_v42  ;;  %v7895_v42 = vld [vmem:[#allocation6 + $0x3d0] sm:$0xff] }
  0xed   : > { %1704 = vmatpush.bf16.msrb.mxu3 %v7861_v43  ;;  %v7869_v43 = vld [vmem:[#allocation6 + $0x300] sm:$0xff] }
  0xee   : > { %v516_v4 = vpop.f32.mrf.mxu2 }
  0xef   : > { %v557_v5 = vpop.f32.mrf.mxu3  ;;  %v8956_v6 = vpack.c.bf16 %v516_v4, %v513_v60  ;;  %v7874_v60 = vld [vmem:[#allocation6 + $0x328] sm:$0xff]  ;;  %v7891_v4 = vld [vmem:[#allocation6 + $0x3b0] sm:$0xff] }
  0xf0   : > { %v8958_v7 = vpack.c.bf16 %v557_v5, %v554_v61  ;;  %v7882_v61 = vld [vmem:[#allocation6 + $0x368] sm:$0xff]  ;;  %v7899_v5 = vld [vmem:[#allocation6 + $0x3f0] sm:$0xff] }
  0xf1   : > { %913 = vmatmul.bf16.gmra.mxu2 %v8956_v6 }
  0xf2   : > { %942 = vmatmul.bf16.gmra.mxu3 %v8958_v7 }
  0xfa   : > { %1229 = vmatmul.bf16.vlgmr.msra.gmra.mxu0 %v8914_v58 }
  0xfb   : > { %1258 = vmatmul.bf16.vlgmr.msra.gmra.mxu1 %v8916_v59  ;;  %1999 = vmatpush.bf16.msra.mxu0 %v7876_v46 }
  0xfc   : > { %2028 = vmatpush.bf16.msra.mxu1 %v7884_v47  ;;  %v7886_v47 = vld [vmem:[#allocation6 + $0x388] sm:$0xff] }
  0xff   : > { %2000 = vmatpush.bf16.msra.mxu0 %v7875_v50  ;;  %v7894_v50 = vld [vmem:[#allocation6 + $0x3c8] sm:$0xff] }
 0x100   : > { %2029 = vmatpush.bf16.msra.mxu1 %v7883_v51 }
 0x101   : > { %1287 = vmatmul.bf16.vlgmr.msra.gmra.mxu2 %v8920_v2 }
 0x102   : > { %1316 = vmatmul.bf16.vlgmr.msra.gmra.mxu3 %v8922_v3  ;;  %2057 = vmatpush.bf16.msra.mxu2 %v7892_v56 }
 0x103   : > { %2086 = vmatpush.bf16.msra.mxu3 %v7900_v57  ;;  %2001 = vmatpush.bf16.msra.mxu0 %v7874_v60  ;;  %v7885_v60 = vld [vmem:[#allocation6 + $0x380] sm:$0xff] }
 0x104   : > { %2030 = vmatpush.bf16.msra.mxu1 %v7882_v61  ;;  %v7893_v61 = vld [vmem:[#allocation6 + $0x3c0] sm:$0xff] }
 0x106   : > { %2058 = vmatpush.bf16.msra.mxu2 %v7891_v4 }
 0x107   : > { %2087 = vmatpush.bf16.msra.mxu3 %v7899_v5  ;;  %2002 = vmatpush.bf16.msra.mxu0 %v7873_v8 }
 0x108   : > { %2031 = vmatpush.bf16.msra.mxu1 %v7881_v9 }
 0x10a   : > { %1234 = vmatmul.bf16.gmra.mxu0 %v8926_v18  ;;  %2059 = vmatpush.bf16.msra.mxu2 %v7890_v12 }
 0x10b   : > { %1263 = vmatmul.bf16.gmra.mxu1 %v8928_v19  ;;  %2088 = vmatpush.bf16.msra.mxu3 %v7898_v13 }
 0x10c   : > { %2003 = vmatpush.bf16.msra.mxu0 %v7872_v15  ;;  %2032 = vmatpush.bf16.msra.mxu1 %v7880_v16 }
 0x10e   : > { %2060 = vmatpush.bf16.msra.mxu2 %v7889_v23 }
 0x10f   : > { %2089 = vmatpush.bf16.msra.mxu3 %v7897_v24 }
 0x110   : > { %2004 = vmatpush.bf16.msra.mxu0 %v7871_v26  ;;  %2033 = vmatpush.bf16.msra.mxu1 %v7879_v27 }
 0x111   : > { %1292 = vmatmul.bf16.gmra.mxu2 %v8932_v30 }
 0x112   : > { %1321 = vmatmul.bf16.gmra.mxu3 %v8934_v31  ;;  %2061 = vmatpush.bf16.msra.mxu2 %v7888_v34  ;;  %v7908_v34 = vld [vmem:[#allocation6 + $0x438] sm:$0xff] }
 0x113   : > { %2090 = vmatpush.bf16.msra.mxu3 %v7896_v35  ;;  %v7916_v35 = vld [vmem:[#allocation6 + $0x478] sm:$0xff] }
 0x114   : > { %2005 = vmatpush.bf16.msra.mxu0 %v7870_v37  ;;  %2034 = vmatpush.bf16.msra.mxu1 %v7878_v38 }
 0x116   : > { %2062 = vmatpush.bf16.msra.mxu2 %v7887_v41  ;;  %v7907_v41 = vld [vmem:[#allocation6 + $0x430] sm:$0xff] }
 0x117   : > { %2091 = vmatpush.bf16.msra.mxu3 %v7895_v42  ;;  %v7915_v42 = vld [vmem:[#allocation6 + $0x470] sm:$0xff] }
 0x118   : > { %2006 = vmatpush.bf16.msra.mxu0 %v7869_v43 }
 0x11a   : > { %1239 = vmatmul.bf16.gmra.mxu0 %v8938_v48  ;;  %2063 = vmatpush.bf16.msra.mxu2 %v7886_v47  ;;  %v7924_v47 = vld [vmem:[#allocation6 + $0x4b8] sm:$0xff] }
 0x11b   : > { %1268 = vmatmul.bf16.gmra.mxu1 %v8940_v49  ;;  %2092 = vmatpush.bf16.msra.mxu3 %v7894_v50  ;;  %v7932_v50 = vld [vmem:[#allocation6 + $0x4f8] sm:$0xff] }
 0x11e   : > { %2064 = vmatpush.bf16.msra.mxu2 %v7885_v60  ;;  %v7923_v60 = vld [vmem:[#allocation6 + $0x4b0] sm:$0xff] }
 0x11f   : > { %2093 = vmatpush.bf16.msra.mxu3 %v7893_v61  ;;  %v7931_v61 = vld [vmem:[#allocation6 + $0x4f0] sm:$0xff] }
 0x121   : > { %1297 = vmatmul.bf16.gmra.mxu2 %v8944_v54 }
 0x122   : > { %1326 = vmatmul.bf16.gmra.mxu3 %v8946_v55 }
 0x12a   : > { %1244 = vmatmul.bf16.gmra.mxu0 %v8950_v0 }
 0x12b   : > { %1273 = vmatmul.bf16.gmra.mxu1 %v8952_v1 }
 0x131   : > { %1302 = vmatmul.bf16.gmra.mxu2 %v8956_v6 }
 0x132   : > { %1331 = vmatmul.bf16.gmra.mxu3 %v8958_v7 }
 0x137   : > { %v841_v44 = vpop.f32.mrf.mxu0 }
 0x138   : > { %v870_v45 = vpop.f32.mrf.mxu1 }
 0x139   : > { %v871_v14 = vadd.f32 %v870_v45, %v841_v44  ;;  %v7877_v44 = vld [vmem:[#allocation6 + $0x340] sm:$0xff] }
 0x13a   : > { %1618 = vmatmul.bf16.vlgmr.msrb.gmra.mxu0 %v8914_v58  ;;  %2035 = vmatpush.bf16.msra.mxu1 %v7877_v44 }
 0x13b   : > { %1647 = vmatmul.bf16.vlgmr.msrb.gmra.mxu1 %v8916_v59  ;;  %2388 = vmatpush.bf16.msrb.mxu0 %v7908_v34  ;;  %v7910_v34 = vld [vmem:[#allocation6 + $0x448] sm:$0xff] }
 0x13e   : > { %2417 = vmatpush.bf16.msrb.mxu1 %v7916_v35 }
 0x13f   : > { %v843_v52 = vpop.f32.mrf.mxu0  ;;  %2389 = vmatpush.bf16.msrb.mxu0 %v7907_v41 }
 0x140   : > { %v872_v53 = vpop.f32.mrf.mxu1 }
 0x141   : > { %1676 = vmatmul.bf16.vlgmr.msrb.gmra.mxu2 %v8920_v2  ;;  %v873_v17 = vadd.f32 %v872_v53, %v843_v52 }
 0x142   : > { %1705 = vmatmul.bf16.vlgmr.msrb.gmra.mxu3 %v8922_v3  ;;  %2418 = vmatpush.bf16.msrb.mxu1 %v7915_v42 }
 0x143   : > { %2446 = vmatpush.bf16.msrb.mxu2 %v7924_v47  ;;  %2475 = vmatpush.bf16.msrb.mxu3 %v7932_v50 }
 0x144   : > { %v899_v62 = vpop.f32.mrf.mxu2 }
 0x145   : > { %v928_v63 = vpop.f32.mrf.mxu3  ;;  %v900_v20 = vadd.f32 %v899_v62, %v871_v14 }
 0x147   : > { %v846_v10 = vpop.f32.mrf.mxu0  ;;  %v929_v28 = vadd.f32 %v928_v63, %v900_v20  ;;  %2447 = vmatpush.bf16.msrb.mxu2 %v7923_v60  ;;  %2476 = vmatpush.bf16.msrb.mxu3 %v7931_v61 }
 0x148   : > { %v875_v11 = vpop.f32.mrf.mxu1 }
 0x149   : > { %v876_v51 = vadd.f32 %v875_v11, %v846_v10 }
 0x14a   : > { %1623 = vmatmul.bf16.gmra.mxu0 %v8926_v18 }
 0x14b   : > { %1652 = vmatmul.bf16.gmra.mxu1 %v8928_v19 }
 0x14c   : > { %v901_v21 = vpop.f32.mrf.mxu2 }
 0x14d   : > { %v930_v22 = vpop.f32.mrf.mxu3  ;;  %v902_v25 = vadd.f32 %v901_v21, %v873_v17 }
 0x14f   : > { %v931_v29 = vadd.f32 %v930_v22, %v902_v25  ;;  %v848_v32 = vpop.f32.mrf.mxu0 }
 0x150   : > { %v877_v33 = vpop.f32.mrf.mxu1 }
 0x151   : > { %v8210_v36 = vpack.c.bf16 %v931_v29, %v929_v28  ;;  %1681 = vmatmul.bf16.gmra.mxu2 %v8932_v30  ;;  %v878_v52 = vadd.f32 %v877_v33, %v848_v32 }
 0x152   : > { %1710 = vmatmul.bf16.gmra.mxu3 %v8934_v31 }
 0x153   : > { %8211 = vst [vmem:[#allocation2 + $0xb0] sm:$0xff] %v8210_v36  }
 0x154   : > { %v904_v39 = vpop.f32.mrf.mxu2 }
 0x155   : > { %v933_v40 = vpop.f32.mrf.mxu3  ;;  %v905_v53 = vadd.f32 %v904_v39, %v876_v51 }
 0x157   : > { %v851_v45 = vpop.f32.mrf.mxu0  ;;  %v934_v63 = vadd.f32 %v933_v40, %v905_v53  ;;  %v7914_v53 = vld [vmem:[#allocation6 + $0x468] sm:$0xff] }
 0x158   : > { %v880_v46 = vpop.f32.mrf.mxu1  ;;  %2419 = vmatpush.bf16.msrb.mxu1 %v7914_v53  ;;  %v7925_v53 = vld [vmem:[#allocation6 + $0x4c0] sm:$0xff] }
 0x159   : > { %v881_v14 = vadd.f32 %v880_v46, %v851_v45 }
 0x15a   : > { %1628 = vmatmul.bf16.gmra.mxu0 %v8938_v48 }
 0x15b   : > { %1657 = vmatmul.bf16.gmra.mxu1 %v8940_v49 }
 0x15c   : > { %v906_v56 = vpop.f32.mrf.mxu2 }
 0x15d   : > { %v935_v57 = vpop.f32.mrf.mxu3  ;;  %v907_v62 = vadd.f32 %v906_v56, %v878_v52  ;;  %v7906_v52 = vld [vmem:[#allocation6 + $0x428] sm:$0xff] }
 0x15e   : > { %2390 = vmatpush.bf16.msrb.mxu0 %v7906_v52  ;;  %v7917_v52 = vld [vmem:[#allocation6 + $0x480] sm:$0xff] }
 0x15f   : > { %v936_v4 = vadd.f32 %v935_v57, %v907_v62  ;;  %v853_v5 = vpop.f32.mrf.mxu0  ;;  %v7905_v62 = vld [vmem:[#allocation6 + $0x420] sm:$0xff] }
 0x160   : > { %v882_v8 = vpop.f32.mrf.mxu1 }
 0x161   : > { %v8215_v9 = vpack.c.bf16 %v936_v4, %v934_v63  ;;  %1686 = vmatmul.bf16.gmra.mxu2 %v8944_v54  ;;  %v883_v15 = vadd.f32 %v882_v8, %v853_v5  ;;  %v7913_v63 = vld [vmem:[#allocation6 + $0x460] sm:$0xff]  ;;  %v7922_v8 = vld [vmem:[#allocation6 + $0x4a8] sm:$0xff] }
 0x162   : > { %1715 = vmatmul.bf16.gmra.mxu3 %v8946_v55  ;;  %2391 = vmatpush.bf16.msrb.mxu0 %v7905_v62 }
 0x163   : > { %8387 = vst [vmem:[#allocation2 + $0xd0] sm:$0xff] %v8215_v9   ;;  %2420 = vmatpush.bf16.msrb.mxu1 %v7913_v63  ;;  %v7930_v9 = vld [vmem:[#allocation6 + $0x4e8] sm:$0xff]  ;;  %2448 = vmatpush.bf16.msrb.mxu2 %v7922_v8 }
 0x164   : > { %v909_v10 = vpop.f32.mrf.mxu2  ;;  %2477 = vmatpush.bf16.msrb.mxu3 %v7930_v9 }
 0x165   : > { %v938_v11 = vpop.f32.mrf.mxu3  ;;  %v910_v16 = vadd.f32 %v909_v10, %v881_v14 }
 0x167   : > { %v856_v12 = vpop.f32.mrf.mxu0  ;;  %v939_v22 = vadd.f32 %v938_v11, %v910_v16  ;;  %v7904_v11 = vld [vmem:[#allocation6 + $0x418] sm:$0xff] }
 0x168   : > { %v885_v13 = vpop.f32.mrf.mxu1  ;;  %2392 = vmatpush.bf16.msrb.mxu0 %v7904_v11 }
 0x169   : > { %v886_v33 = vadd.f32 %v885_v13, %v856_v12  ;;  %v7912_v12 = vld [vmem:[#allocation6 + $0x458] sm:$0xff] }
 0x16a   : > { %1633 = vmatmul.bf16.gmra.mxu0 %v8950_v0  ;;  %2421 = vmatpush.bf16.msrb.mxu1 %v7912_v12 }
 0x16b   : > { %1662 = vmatmul.bf16.gmra.mxu1 %v8952_v1 }
 0x16c   : > { %v911_v17 = vpop.f32.mrf.mxu2 }
 0x16d   : > { %v940_v20 = vpop.f32.mrf.mxu3  ;;  %v912_v21 = vadd.f32 %v911_v17, %v883_v15  ;;  %v7921_v17 = vld [vmem:[#allocation6 + $0x4a0] sm:$0xff] }
 0x16e   : > { %2449 = vmatpush.bf16.msrb.mxu2 %v7921_v17 }
 0x16f   : > { %v941_v23 = vadd.f32 %v940_v20, %v912_v21  ;;  %v858_v24 = vpop.f32.mrf.mxu0  ;;  %v7929_v20 = vld [vmem:[#allocation6 + $0x4e0] sm:$0xff] }
 0x170   : > { %v887_v25 = vpop.f32.mrf.mxu1  ;;  %2478 = vmatpush.bf16.msrb.mxu3 %v7929_v20 }
 0x171   : > { %v8220_v26 = vpack.c.bf16 %v941_v23, %v939_v22  ;;  %1691 = vmatmul.bf16.gmra.mxu2 %v8956_v6  ;;  %v888_v36 = vadd.f32 %v887_v25, %v858_v24  ;;  %v7903_v22 = vld [vmem:[#allocation6 + $0x410] sm:$0xff] }
 0x172   : > { %1720 = vmatmul.bf16.gmra.mxu3 %v8958_v7  ;;  %v7911_v23 = vld [vmem:[#allocation6 + $0x450] sm:$0xff]  ;;  %2393 = vmatpush.bf16.msrb.mxu0 %v7903_v22 }
 0x173   : > { %8388 = vst [vmem:[#allocation2 + $0x10] sm:$0xff] %v8220_v26   ;;  %2422 = vmatpush.bf16.msrb.mxu1 %v7911_v23 }
 0x174   : > { %v914_v27 = vpop.f32.mrf.mxu2 }
 0x175   : > { %v943_v28 = vpop.f32.mrf.mxu3  ;;  %v915_v37 = vadd.f32 %v914_v27, %v886_v33  ;;  %v7902_v33 = vld [vmem:[#allocation6 + $0x408] sm:$0xff] }
 0x176   : > { %2394 = vmatpush.bf16.msrb.mxu0 %v7902_v33 }
 0x177   : > { %v1230_v29 = vpop.f32.mrf.mxu0  ;;  %v944_v43 = vadd.f32 %v943_v28, %v915_v37  ;;  %v7920_v28 = vld [vmem:[#allocation6 + $0x498] sm:$0xff]  ;;  %2423 = vmatpush.bf16.msrb.mxu1 %v7910_v34  ;;  %v7919_v37 = vld [vmem:[#allocation6 + $0x490] sm:$0xff] }
 0x178   : > { %v1259_v32 = vpop.f32.mrf.mxu1  ;;  %2450 = vmatpush.bf16.msrb.mxu2 %v7920_v28  ;;  %v7940_v28 = vld [vmem:[#allocation6 + $0x538] sm:$0xff] }
 0x179   : > { %v1260_v10 = vadd.f32 %v1259_v32, %v1230_v29  ;;  %v7928_v29 = vld [vmem:[#allocation6 + $0x4d8] sm:$0xff] }
 0x17a   : > { %2007 = vmatmul.bf16.vlgmr.msra.gmra.mxu0 %v8914_v58  ;;  %2479 = vmatpush.bf16.msrb.mxu3 %v7928_v29  ;;  %v7948_v29 = vld [vmem:[#allocation6 + $0x578] sm:$0xff] }
 0x17b   : > { %2036 = vmatmul.bf16.vlgmr.msra.gmra.mxu1 %v8916_v59 }
 0x17c   : > { %v916_v38 = vpop.f32.mrf.mxu2  ;;  %2451 = vmatpush.bf16.msrb.mxu2 %v7919_v37  ;;  %v7939_v37 = vld [vmem:[#allocation6 + $0x530] sm:$0xff] }
 0x17d   : > { %v945_v39 = vpop.f32.mrf.mxu3  ;;  %v917_v40 = vadd.f32 %v916_v38, %v888_v36  ;;  %v7927_v38 = vld [vmem:[#allocation6 + $0x4d0] sm:$0xff] }
 0x17e   : > { %2480 = vmatpush.bf16.msrb.mxu3 %v7927_v38  ;;  %v7947_v38 = vld [vmem:[#allocation6 + $0x570] sm:$0xff] }
 0x17f   : > { %v946_v44 = vadd.f32 %v945_v39, %v917_v40  ;;  %v1232_v45 = vpop.f32.mrf.mxu0  ;;  %v7901_v39 = vld [vmem:[#allocation6 + $0x400] sm:$0xff] }
 0x180   : > { %v1261_v46 = vpop.f32.mrf.mxu1  ;;  %v7909_v40 = vld [vmem:[#allocation6 + $0x440] sm:$0xff]  ;;  %2395 = vmatpush.bf16.msrb.mxu0 %v7901_v39 }
 0x181   : > { %v8225_v51 = vpack.c.bf16 %v946_v44, %v944_v43  ;;  %2065 = vmatmul.bf16.vlgmr.msra.gmra.mxu2 %v8920_v2  ;;  %v1262_v13 = vadd.f32 %v1261_v46, %v1232_v45  ;;  %2424 = vmatpush.bf16.msrb.mxu1 %v7909_v40  ;;  %v7918_v43 = vld [vmem:[#allocation6 + $0x488] sm:$0xff] }
 0x182   : > { %2094 = vmatmul.bf16.vlgmr.msra.gmra.mxu3 %v8922_v3  ;;  %v7926_v44 = vld [vmem:[#allocation6 + $0x4c8] sm:$0xff]  ;;  %2452 = vmatpush.bf16.msrb.mxu2 %v7918_v43  ;;  %v7956_v43 = vld [vmem:[#allocation6 + $0x5b8] sm:$0xff] }
 0x183   : > { %8389 = vst [vmem:[#allocation2 + $0x48] sm:$0xff] %v8225_v51   ;;  %2481 = vmatpush.bf16.msrb.mxu3 %v7926_v44  ;;  %v7964_v44 = vld [vmem:[#allocation6 + $0x5f8] sm:$0xff] }
 0x184   : > { %v1288_v56 = vpop.f32.mrf.mxu2  ;;  %2777 = vmatpush.bf16.msra.mxu0 %v7940_v28  ;;  %v7942_v28 = vld [vmem:[#allocation6 + $0x548] sm:$0xff] }
 0x185   : > { %v1317_v57 = vpop.f32.mrf.mxu3  ;;  %v1289_v14 = vadd.f32 %v1288_v56, %v1260_v10  ;;  %2806 = vmatpush.bf16.msra.mxu1 %v7948_v29 }
 0x186   : > { %2453 = vmatpush.bf16.msrb.mxu2 %v7917_v52  ;;  %v7955_v52 = vld [vmem:[#allocation6 + $0x5b0] sm:$0xff] }
 0x187   : > { %v1235_v4 = vpop.f32.mrf.mxu0  ;;  %v1318_v24 = vadd.f32 %v1317_v57, %v1289_v14  ;;  %2482 = vmatpush.bf16.msrb.mxu3 %v7925_v53  ;;  %v7963_v53 = vld [vmem:[#allocation6 + $0x5f0] sm:$0xff] }
 0x188   : > { %v1264_v5 = vpop.f32.mrf.mxu1  ;;  %2778 = vmatpush.bf16.msra.mxu0 %v7939_v37 }
 0x189   : > { %v1265_v45 = vadd.f32 %v1264_v5, %v1235_v4  ;;  %2807 = vmatpush.bf16.msra.mxu1 %v7947_v38 }
 0x18a   : > { %2012 = vmatmul.bf16.gmra.mxu0 %v8926_v18  ;;  %2835 = vmatpush.bf16.msra.mxu2 %v7956_v43 }
 0x18b   : > { %2041 = vmatmul.bf16.gmra.mxu1 %v8928_v19  ;;  %2864 = vmatpush.bf16.msra.mxu3 %v7964_v44 }
 0x18c   : > { %v1290_v15 = vpop.f32.mrf.mxu2 }
 0x18d   : > { %v1319_v16 = vpop.f32.mrf.mxu3  ;;  %v1291_v21 = vadd.f32 %v1290_v15, %v1262_v13 }
 0x18e   : > { %2836 = vmatpush.bf16.msra.mxu2 %v7955_v52 }
 0x18f   : > { %v1320_v25 = vadd.f32 %v1319_v16, %v1291_v21  ;;  %v1237_v26 = vpop.f32.mrf.mxu0  ;;  %2865 = vmatpush.bf16.msra.mxu3 %v7963_v53 }
 0x190   : > { %v1266_v27 = vpop.f32.mrf.mxu1 }
 0x191   : > { %v8230_v32 = vpack.c.bf16 %v1320_v25, %v1318_v24  ;;  %2070 = vmatmul.bf16.gmra.mxu2 %v8932_v30  ;;  %v1267_v46 = vadd.f32 %v1266_v27, %v1237_v26 }
 0x192   : > { %2099 = vmatmul.bf16.gmra.mxu3 %v8934_v31 }
 0x193   : > { %8390 = vst [vmem:[#allocation2 + $0x108] sm:$0xff] %v8230_v32  }
 0x194   : > { %v1293_v35 = vpop.f32.mrf.mxu2 }
 0x195   : > { %v1322_v36 = vpop.f32.mrf.mxu3  ;;  %v1294_v47 = vadd.f32 %v1293_v35, %v1265_v45 }
 0x197   : > { %v1240_v41 = vpop.f32.mrf.mxu0  ;;  %v1323_v57 = vadd.f32 %v1322_v36, %v1294_v47  ;;  %v7946_v47 = vld [vmem:[#allocation6 + $0x568] sm:$0xff] }
 0x198   : > { %v1269_v42 = vpop.f32.mrf.mxu1  ;;  %2808 = vmatpush.bf16.msra.mxu1 %v7946_v47  ;;  %v7957_v47 = vld [vmem:[#allocation6 + $0x5c0] sm:$0xff] }
 0x199   : > { %v1270_v10 = vadd.f32 %v1269_v42, %v1240_v41 }
 0x19a   : > { %2017 = vmatmul.bf16.gmra.mxu0 %v8938_v48 }
 0x19b   : > { %2046 = vmatmul.bf16.gmra.mxu1 %v8940_v49 }
 0x19c   : > { %v1295_v50 = vpop.f32.mrf.mxu2 }
 0x19d   : > { %v1324_v51 = vpop.f32.mrf.mxu3  ;;  %v1296_v56 = vadd.f32 %v1295_v50, %v1267_v46  ;;  %v7938_v46 = vld [vmem:[#allocation6 + $0x528] sm:$0xff] }
 0x19e   : > { %2779 = vmatpush.bf16.msra.mxu0 %v7938_v46  ;;  %v7949_v46 = vld [vmem:[#allocation6 + $0x580] sm:$0xff] }
 0x19f   : > { %v1325_v60 = vadd.f32 %v1324_v51, %v1296_v56  ;;  %v1242_v61 = vpop.f32.mrf.mxu0  ;;  %v7937_v56 = vld [vmem:[#allocation6 + $0x520] sm:$0xff] }
 0x1a0   : > { %v1271_v62 = vpop.f32.mrf.mxu1 }
 0x1a1   : > { %v8235_v63 = vpack.c.bf16 %v1325_v60, %v1323_v57  ;;  %2075 = vmatmul.bf16.gmra.mxu2 %v8944_v54  ;;  %v1272_v11 = vadd.f32 %v1271_v62, %v1242_v61  ;;  %v7945_v57 = vld [vmem:[#allocation6 + $0x560] sm:$0xff]  ;;  %v7954_v62 = vld [vmem:[#allocation6 + $0x5a8] sm:$0xff] }
 0x1a2   : > { %2104 = vmatmul.bf16.gmra.mxu3 %v8946_v55  ;;  %2780 = vmatpush.bf16.msra.mxu0 %v7937_v56 }
 0x1a3   : > { %8391 = vst [vmem:[#allocation2 + $0x68] sm:$0xff] %v8235_v63   ;;  %2809 = vmatpush.bf16.msra.mxu1 %v7945_v57  ;;  %v7962_v63 = vld [vmem:[#allocation6 + $0x5e8] sm:$0xff]  ;;  %2837 = vmatpush.bf16.msra.mxu2 %v7954_v62 }
 0x1a4   : > { %v1298_v4 = vpop.f32.mrf.mxu2  ;;  %2866 = vmatpush.bf16.msra.mxu3 %v7962_v63 }
 0x1a5   : > { %v1327_v5 = vpop.f32.mrf.mxu3  ;;  %v1299_v12 = vadd.f32 %v1298_v4, %v1270_v10 }
 0x1a7   : > { %v1245_v8 = vpop.f32.mrf.mxu0  ;;  %v1328_v16 = vadd.f32 %v1327_v5, %v1299_v12  ;;  %v7936_v5 = vld [vmem:[#allocation6 + $0x518] sm:$0xff] }
 0x1a8   : > { %v1274_v9 = vpop.f32.mrf.mxu1  ;;  %2781 = vmatpush.bf16.msra.mxu0 %v7936_v5 }
 0x1a9   : > { %v1275_v27 = vadd.f32 %v1274_v9, %v1245_v8  ;;  %v7944_v8 = vld [vmem:[#allocation6 + $0x558] sm:$0xff] }
 0x1aa   : > { %2022 = vmatmul.bf16.gmra.mxu0 %v8950_v0  ;;  %2810 = vmatpush.bf16.msra.mxu1 %v7944_v8 }
 0x1ab   : > { %2051 = vmatmul.bf16.gmra.mxu1 %v8952_v1 }
 0x1ac   : > { %v1300_v13 = vpop.f32.mrf.mxu2 }
 0x1ad   : > { %v1329_v14 = vpop.f32.mrf.mxu3  ;;  %v1301_v15 = vadd.f32 %v1300_v13, %v1272_v11  ;;  %v7953_v13 = vld [vmem:[#allocation6 + $0x5a0] sm:$0xff] }
 0x1ae   : > { %2838 = vmatpush.bf16.msra.mxu2 %v7953_v13 }
 0x1af   : > { %v1330_v17 = vadd.f32 %v1329_v14, %v1301_v15  ;;  %v1247_v20 = vpop.f32.mrf.mxu0  ;;  %v7961_v14 = vld [vmem:[#allocation6 + $0x5e0] sm:$0xff] }
 0x1b0   : > { %v1276_v21 = vpop.f32.mrf.mxu1  ;;  %2867 = vmatpush.bf16.msra.mxu3 %v7961_v14 }
 0x1b1   : > { %v8240_v22 = vpack.c.bf16 %v1330_v17, %v1328_v16  ;;  %2080 = vmatmul.bf16.gmra.mxu2 %v8956_v6  ;;  %v1277_v32 = vadd.f32 %v1276_v21, %v1247_v20  ;;  %v7935_v16 = vld [vmem:[#allocation6 + $0x510] sm:$0xff] }
 0x1b2   : > { %2109 = vmatmul.bf16.gmra.mxu3 %v8958_v7  ;;  %v7943_v17 = vld [vmem:[#allocation6 + $0x550] sm:$0xff]  ;;  %2782 = vmatpush.bf16.msra.mxu0 %v7935_v16 }
 0x1b3   : > { %8392 = vst [vmem:[#allocation2 + $0x30] sm:$0xff] %v8240_v22   ;;  %2811 = vmatpush.bf16.msra.mxu1 %v7943_v17 }
 0x1b4   : > { %v1303_v23 = vpop.f32.mrf.mxu2 }
 0x1b5   : > { %v1332_v24 = vpop.f32.mrf.mxu3  ;;  %v1304_v33 = vadd.f32 %v1303_v23, %v1275_v27  ;;  %v7934_v27 = vld [vmem:[#allocation6 + $0x508] sm:$0xff] }
 0x1b6   : > { %2783 = vmatpush.bf16.msra.mxu0 %v7934_v27 }
 0x1b7   : > { %v1619_v25 = vpop.f32.mrf.mxu0  ;;  %v1333_v39 = vadd.f32 %v1332_v24, %v1304_v33  ;;  %v7952_v24 = vld [vmem:[#allocation6 + $0x598] sm:$0xff]  ;;  %2812 = vmatpush.bf16.msra.mxu1 %v7942_v28  ;;  %v7951_v33 = vld [vmem:[#allocation6 + $0x590] sm:$0xff] }
 0x1b8   : > { %v1648_v26 = vpop.f32.mrf.mxu1  ;;  %2839 = vmatpush.bf16.msra.mxu2 %v7952_v24  ;;  %v7972_v24 = vld [vmem:[#allocation6 + $0x638] sm:$0xff] }
 0x1b9   : > { %v1649_v4 = vadd.f32 %v1648_v26, %v1619_v25  ;;  %v7960_v25 = vld [vmem:[#allocation6 + $0x5d8] sm:$0xff] }
 0x1ba   : > { %2396 = vmatmul.bf16.vlgmr.msrb.gmra.mxu0 %v8914_v58  ;;  %2868 = vmatpush.bf16.msra.mxu3 %v7960_v25  ;;  %v7980_v25 = vld [vmem:[#allocation6 + $0x678] sm:$0xff] }
 0x1bb   : > { %2425 = vmatmul.bf16.vlgmr.msrb.gmra.mxu1 %v8916_v59 }
 0x1bc   : > { %v1305_v34 = vpop.f32.mrf.mxu2  ;;  %2840 = vmatpush.bf16.msra.mxu2 %v7951_v33  ;;  %v7971_v33 = vld [vmem:[#allocation6 + $0x630] sm:$0xff] }
 0x1bd   : > { %v1334_v35 = vpop.f32.mrf.mxu3  ;;  %v1306_v36 = vadd.f32 %v1305_v34, %v1277_v32  ;;  %v7959_v34 = vld [vmem:[#allocation6 + $0x5d0] sm:$0xff] }
 0x1be   : > { %2869 = vmatpush.bf16.msra.mxu3 %v7959_v34  ;;  %v7979_v34 = vld [vmem:[#allocation6 + $0x670] sm:$0xff] }
 0x1bf   : > { %v1335_v40 = vadd.f32 %v1334_v35, %v1306_v36  ;;  %v1621_v41 = vpop.f32.mrf.mxu0  ;;  %v7933_v35 = vld [vmem:[#allocation6 + $0x500] sm:$0xff] }
 0x1c0   : > { %v1650_v42 = vpop.f32.mrf.mxu1  ;;  %v7941_v36 = vld [vmem:[#allocation6 + $0x540] sm:$0xff]  ;;  %2784 = vmatpush.bf16.msra.mxu0 %v7933_v35 }
 0x1c1   : > { %v8245_v45 = vpack.c.bf16 %v1335_v40, %v1333_v39  ;;  %2454 = vmatmul.bf16.vlgmr.msrb.gmra.mxu2 %v8920_v2  ;;  %v1651_v9 = vadd.f32 %v1650_v42, %v1621_v41  ;;  %2813 = vmatpush.bf16.msra.mxu1 %v7941_v36  ;;  %v7950_v39 = vld [vmem:[#allocation6 + $0x588] sm:$0xff] }
 0x1c2   : > { %2483 = vmatmul.bf16.vlgmr.msrb.gmra.mxu3 %v8922_v3  ;;  %v7958_v40 = vld [vmem:[#allocation6 + $0x5c8] sm:$0xff]  ;;  %2841 = vmatpush.bf16.msra.mxu2 %v7950_v39  ;;  %v7988_v39 = vld [vmem:[#allocation6 + $0x6b8] sm:$0xff] }
 0x1c3   : > { %8393 = vst [vmem:[#allocation2 + $0x18] sm:$0xff] %v8245_v45   ;;  %2870 = vmatpush.bf16.msra.mxu3 %v7958_v40  ;;  %v7996_v40 = vld [vmem:[#allocation6 + $0x6f8] sm:$0xff] }
 0x1c4   : > { %v1677_v50 = vpop.f32.mrf.mxu2  ;;  %3166 = vmatpush.bf16.msrb.mxu0 %v7972_v24  ;;  %v7974_v24 = vld [vmem:[#allocation6 + $0x648] sm:$0xff] }
 0x1c5   : > { %v1706_v51 = vpop.f32.mrf.mxu3  ;;  %v1678_v10 = vadd.f32 %v1677_v50, %v1649_v4  ;;  %3195 = vmatpush.bf16.msrb.mxu1 %v7980_v25 }
 0x1c6   : > { %2842 = vmatpush.bf16.msra.mxu2 %v7949_v46  ;;  %v7987_v46 = vld [vmem:[#allocation6 + $0x6b0] sm:$0xff] }
 0x1c7   : > { %v1624_v60 = vpop.f32.mrf.mxu0  ;;  %v1707_v20 = vadd.f32 %v1706_v51, %v1678_v10  ;;  %2871 = vmatpush.bf16.msra.mxu3 %v7957_v47  ;;  %v7995_v47 = vld [vmem:[#allocation6 + $0x6f0] sm:$0xff] }
 0x1c8   : > { %v1653_v61 = vpop.f32.mrf.mxu1  ;;  %3167 = vmatpush.bf16.msrb.mxu0 %v7971_v33 }
 0x1c9   : > { %v1654_v41 = vadd.f32 %v1653_v61, %v1624_v60  ;;  %3196 = vmatpush.bf16.msrb.mxu1 %v7979_v34 }
 0x1ca   : > { %2401 = vmatmul.bf16.gmra.mxu0 %v8926_v18  ;;  %3224 = vmatpush.bf16.msrb.mxu2 %v7988_v39 }
 0x1cb   : > { %2430 = vmatmul.bf16.gmra.mxu1 %v8928_v19  ;;  %3253 = vmatpush.bf16.msrb.mxu3 %v7996_v40 }
 0x1cc   : > { %v1679_v11 = vpop.f32.mrf.mxu2 }
 0x1cd   : > { %v1708_v12 = vpop.f32.mrf.mxu3  ;;  %v1680_v15 = vadd.f32 %v1679_v11, %v1651_v9 }
 0x1ce   : > { %3225 = vmatpush.bf16.msrb.mxu2 %v7987_v46 }
 0x1cf   : > { %v1709_v21 = vadd.f32 %v1708_v12, %v1680_v15  ;;  %v1626_v22 = vpop.f32.mrf.mxu0  ;;  %3254 = vmatpush.bf16.msrb.mxu3 %v7995_v47 }
 0x1d0   : > { %v1655_v23 = vpop.f32.mrf.mxu1 }
 0x1d1   : > { %v8250_v26 = vpack.c.bf16 %v1709_v21, %v1707_v20  ;;  %2459 = vmatmul.bf16.gmra.mxu2 %v8932_v30  ;;  %v1656_v42 = vadd.f32 %v1655_v23, %v1626_v22 }
 0x1d2   : > { %2488 = vmatmul.bf16.gmra.mxu3 %v8934_v31 }
 0x1d3   : > { %8394 = vst [vmem:[#allocation2 + $0x80] sm:$0xff] %v8250_v26  }
 0x1d4   : > { %v1682_v29 = vpop.f32.mrf.mxu2 }
 0x1d5   : > { %v1711_v32 = vpop.f32.mrf.mxu3  ;;  %v1683_v43 = vadd.f32 %v1682_v29, %v1654_v41 }
 0x1d7   : > { %v1629_v37 = vpop.f32.mrf.mxu0  ;;  %v1712_v51 = vadd.f32 %v1711_v32, %v1683_v43  ;;  %v7978_v43 = vld [vmem:[#allocation6 + $0x668] sm:$0xff] }
 0x1d8   : > { %v1658_v38 = vpop.f32.mrf.mxu1  ;;  %3197 = vmatpush.bf16.msrb.mxu1 %v7978_v43  ;;  %v7989_v43 = vld [vmem:[#allocation6 + $0x6c0] sm:$0xff] }
 0x1d9   : > { %v1659_v4 = vadd.f32 %v1658_v38, %v1629_v37 }
 0x1da   : > { %2406 = vmatmul.bf16.gmra.mxu0 %v8938_v48 }
 0x1db   : > { %2435 = vmatmul.bf16.gmra.mxu1 %v8940_v49 }
 0x1dc   : > { %v1684_v44 = vpop.f32.mrf.mxu2 }
 0x1dd   : > { %v1713_v45 = vpop.f32.mrf.mxu3  ;;  %v1685_v50 = vadd.f32 %v1684_v44, %v1656_v42  ;;  %v7970_v42 = vld [vmem:[#allocation6 + $0x628] sm:$0xff] }
 0x1de   : > { %3168 = vmatpush.bf16.msrb.mxu0 %v7970_v42  ;;  %v7981_v42 = vld [vmem:[#allocation6 + $0x680] sm:$0xff] }
 0x1df   : > { %v1714_v52 = vadd.f32 %v1713_v45, %v1685_v50  ;;  %v1631_v53 = vpop.f32.mrf.mxu0  ;;  %v7969_v50 = vld [vmem:[#allocation6 + $0x620] sm:$0xff] }
 0x1e0   : > { %v1660_v56 = vpop.f32.mrf.mxu1 }
 0x1e1   : > { %v8255_v57 = vpack.c.bf16 %v1714_v52, %v1712_v51  ;;  %2464 = vmatmul.bf16.gmra.mxu2 %v8944_v54  ;;  %v1661_v5 = vadd.f32 %v1660_v56, %v1631_v53  ;;  %v7977_v51 = vld [vmem:[#allocation6 + $0x660] sm:$0xff]  ;;  %v7986_v56 = vld [vmem:[#allocation6 + $0x6a8] sm:$0xff] }
 0x1e2   : > { %2493 = vmatmul.bf16.gmra.mxu3 %v8946_v55  ;;  %3169 = vmatpush.bf16.msrb.mxu0 %v7969_v50 }
 0x1e3   : > { %8395 = vst [vmem:[#allocation2 + $0x110] sm:$0xff] %v8255_v57   ;;  %3198 = vmatpush.bf16.msrb.mxu1 %v7977_v51  ;;  %v7994_v57 = vld [vmem:[#allocation6 + $0x6e8] sm:$0xff]  ;;  %3226 = vmatpush.bf16.msrb.mxu2 %v7986_v56  ;;  %v8012_v51 = vld [vmem:[#allocation6 + $0x778] sm:$0xff] }
 0x1e4   : > { %v1687_v60 = vpop.f32.mrf.mxu2  ;;  %3255 = vmatpush.bf16.msrb.mxu3 %v7994_v57 }
 0x1e5   : > { %v1716_v61 = vpop.f32.mrf.mxu3  ;;  %v1688_v8 = vadd.f32 %v1687_v60, %v1659_v4 }
 0x1e7   : > { %v1634_v62 = vpop.f32.mrf.mxu0  ;;  %v1717_v12 = vadd.f32 %v1716_v61, %v1688_v8  ;;  %v7968_v61 = vld [vmem:[#allocation6 + $0x618] sm:$0xff] }
 0x1e8   : > { %v1663_v63 = vpop.f32.mrf.mxu1  ;;  %3170 = vmatpush.bf16.msrb.mxu0 %v7968_v61 }
 0x1e9   : > { %v1664_v23 = vadd.f32 %v1663_v63, %v1634_v62  ;;  %v7976_v62 = vld [vmem:[#allocation6 + $0x658] sm:$0xff] }
 0x1ea   : > { %2411 = vmatmul.bf16.gmra.mxu0 %v8950_v0  ;;  %3199 = vmatpush.bf16.msrb.mxu1 %v7976_v62 }
 0x1eb   : > { %2440 = vmatmul.bf16.gmra.mxu1 %v8952_v1 }
 0x1ec   : > { %v1689_v9 = vpop.f32.mrf.mxu2 }
 0x1ed   : > { %v1718_v10 = vpop.f32.mrf.mxu3  ;;  %v1690_v11 = vadd.f32 %v1689_v9, %v1661_v5  ;;  %v7985_v9 = vld [vmem:[#allocation6 + $0x6a0] sm:$0xff] }
 0x1ee   : > { %3227 = vmatpush.bf16.msrb.mxu2 %v7985_v9 }
 0x1ef   : > { %v1719_v13 = vadd.f32 %v1718_v10, %v1690_v11  ;;  %v1636_v14 = vpop.f32.mrf.mxu0  ;;  %v7993_v10 = vld [vmem:[#allocation6 + $0x6e0] sm:$0xff] }
 0x1f0   : > { %v1665_v15 = vpop.f32.mrf.mxu1  ;;  %3256 = vmatpush.bf16.msrb.mxu3 %v7993_v10  ;;  %v8009_v10 = vld [vmem:[#allocation6 + $0x760] sm:$0xff] }
 0x1f1   : > { %v8260_v16 = vpack.c.bf16 %v1719_v13, %v1717_v12  ;;  %2469 = vmatmul.bf16.gmra.mxu2 %v8956_v6  ;;  %v1666_v26 = vadd.f32 %v1665_v15, %v1636_v14  ;;  %v7967_v12 = vld [vmem:[#allocation6 + $0x610] sm:$0xff] }
 0x1f2   : > { %2498 = vmatmul.bf16.gmra.mxu3 %v8958_v7  ;;  %v7975_v13 = vld [vmem:[#allocation6 + $0x650] sm:$0xff]  ;;  %3171 = vmatpush.bf16.msrb.mxu0 %v7967_v12 }
 0x1f3   : > { %8396 = vst [vmem:[#allocation2 + $0x118] sm:$0xff] %v8260_v16   ;;  %3200 = vmatpush.bf16.msrb.mxu1 %v7975_v13 }
 0x1f4   : > { %v1692_v17 = vpop.f32.mrf.mxu2 }
 0x1f5   : > { %v1721_v20 = vpop.f32.mrf.mxu3  ;;  %v1693_v27 = vadd.f32 %v1692_v17, %v1664_v23  ;;  %v7966_v23 = vld [vmem:[#allocation6 + $0x608] sm:$0xff] }
 0x1f6   : > { %3172 = vmatpush.bf16.msrb.mxu0 %v7966_v23  ;;  %v8025_v23 = vld [vmem:[#allocation6 + $0x7e0] sm:$0xff] }
 0x1f7   : > { %v2008_v21 = vpop.f32.mrf.mxu0  ;;  %v1722_v35 = vadd.f32 %v1721_v20, %v1693_v27  ;;  %v7984_v20 = vld [vmem:[#allocation6 + $0x698] sm:$0xff]  ;;  %3201 = vmatpush.bf16.msrb.mxu1 %v7974_v24  ;;  %v7983_v27 = vld [vmem:[#allocation6 + $0x690] sm:$0xff] }
 0x1f8   : > { %v2037_v22 = vpop.f32.mrf.mxu1  ;;  %3228 = vmatpush.bf16.msrb.mxu2 %v7984_v20  ;;  %v8007_v24 = vld [vmem:[#allocation6 + $0x750] sm:$0xff] }
 0x1f9   : > { %v2038_v60 = vadd.f32 %v2037_v22, %v2008_v21  ;;  %v7992_v21 = vld [vmem:[#allocation6 + $0x6d8] sm:$0xff] }
 0x1fa   : > { %2785 = vmatmul.bf16.vlgmr.msra.gmra.mxu0 %v8914_v58  ;;  %3257 = vmatpush.bf16.msrb.mxu3 %v7992_v21  ;;  %v8008_v21 = vld [vmem:[#allocation6 + $0x758] sm:$0xff] }
 0x1fb   : > { %2814 = vmatmul.bf16.vlgmr.msra.gmra.mxu1 %v8916_v59 }
 0x1fc   : > { %v1694_v28 = vpop.f32.mrf.mxu2  ;;  %3229 = vmatpush.bf16.msrb.mxu2 %v7983_v27  ;;  %v8024_v27 = vld [vmem:[#allocation6 + $0x7d8] sm:$0xff] }
 0x1fd   : > { %v1723_v29 = vpop.f32.mrf.mxu3  ;;  %v1695_v32 = vadd.f32 %v1694_v28, %v1666_v26  ;;  %v7991_v28 = vld [vmem:[#allocation6 + $0x6d0] sm:$0xff] }
 0x1fe   : > { %3258 = vmatpush.bf16.msrb.mxu3 %v7991_v28 }
 0x1ff   : > { %v1724_v36 = vadd.f32 %v1723_v29, %v1695_v32  ;;  %v2010_v37 = vpop.f32.mrf.mxu0  ;;  %v7965_v29 = vld [vmem:[#allocation6 + $0x600] sm:$0xff] }
 0x200   : > { %v2039_v38 = vpop.f32.mrf.mxu1  ;;  %v7973_v32 = vld [vmem:[#allocation6 + $0x640] sm:$0xff]  ;;  %3173 = vmatpush.bf16.msrb.mxu0 %v7965_v29 }
 0x201   : > { %v8265_v41 = vpack.c.bf16 %v1724_v36, %v1722_v35  ;;  %2843 = vmatmul.bf16.vlgmr.msra.gmra.mxu2 %v8920_v2  ;;  %v2040_v63 = vadd.f32 %v2039_v38, %v2010_v37  ;;  %3202 = vmatpush.bf16.msrb.mxu1 %v7973_v32  ;;  %v7982_v35 = vld [vmem:[#allocation6 + $0x688] sm:$0xff] }
 0x202   : > { %2872 = vmatmul.bf16.vlgmr.msra.gmra.mxu3 %v8922_v3  ;;  %v7990_v36 = vld [vmem:[#allocation6 + $0x6c8] sm:$0xff]  ;;  %3230 = vmatpush.bf16.msrb.mxu2 %v7982_v35  ;;  %v8004_v35 = vld [vmem:[#allocation6 + $0x738] sm:$0xff] }
 0x203   : > { %8397 = vst [vmem:[#allocation2 + $0x98] sm:$0xff] %v8265_v41   ;;  %3259 = vmatpush.bf16.msrb.mxu3 %v7990_v36  ;;  %v8006_v32 = vld [vmem:[#allocation6 + $0x748] sm:$0xff] }
 0x204   : > { %v2066_v44 = vpop.f32.mrf.mxu2  ;;  %3555 = vmatpush.bf16.msra.mxu0 %v8004_v35 }
 0x205   : > { %v2095_v45 = vpop.f32.mrf.mxu3  ;;  %v2067_v4 = vadd.f32 %v2066_v44, %v2038_v60  ;;  %3584 = vmatpush.bf16.msra.mxu1 %v8012_v51  ;;  %v8028_v60 = vld [vmem:[#allocation6 + $0x7f8] sm:$0xff] }
 0x206   : > { %3231 = vmatpush.bf16.msrb.mxu2 %v7981_v42  ;;  %v8020_v51 = vld [vmem:[#allocation6 + $0x7b8] sm:$0xff] }
 0x207   : > { %v2013_v52 = vpop.f32.mrf.mxu0  ;;  %v2096_v14 = vadd.f32 %v2095_v45, %v2067_v4  ;;  %3260 = vmatpush.bf16.msrb.mxu3 %v7989_v43  ;;  %v8022_v43 = vld [vmem:[#allocation6 + $0x7c8] sm:$0xff] }
 0x208   : > { %v2042_v53 = vpop.f32.mrf.mxu1 }
 0x209   : > { %v2043_v37 = vadd.f32 %v2042_v53, %v2013_v52  ;;  %v8011_v53 = vld [vmem:[#allocation6 + $0x770] sm:$0xff] }
 0x20a   : > { %2790 = vmatmul.bf16.gmra.mxu0 %v8926_v18  ;;  %3585 = vmatpush.bf16.msra.mxu1 %v8011_v53 }
 0x20b   : > { %2819 = vmatmul.bf16.gmra.mxu1 %v8928_v19  ;;  %3642 = vmatpush.bf16.msra.mxu3 %v8028_v60  ;;  %v8060_v60 = vld [vmem:[#allocation6 + $0x8f8] sm:$0xff] }
 0x20c   : > { %v2068_v5 = vpop.f32.mrf.mxu2  ;;  %3613 = vmatpush.bf16.msra.mxu2 %v8020_v51 }
 0x20d   : > { %v2097_v8 = vpop.f32.mrf.mxu3  ;;  %v2069_v11 = vadd.f32 %v2068_v5, %v2040_v63  ;;  %v8010_v63 = vld [vmem:[#allocation6 + $0x768] sm:$0xff]  ;;  %v8027_v5 = vld [vmem:[#allocation6 + $0x7f0] sm:$0xff] }
 0x20e   : > { %3586 = vmatpush.bf16.msra.mxu1 %v8010_v63  ;;  %v8019_v63 = vld [vmem:[#allocation6 + $0x7b0] sm:$0xff] }
 0x20f   : > { %v2098_v15 = vadd.f32 %v2097_v8, %v2069_v11  ;;  %v2015_v16 = vpop.f32.mrf.mxu0  ;;  %3643 = vmatpush.bf16.msra.mxu3 %v8027_v5  ;;  %v8001_v5 = vld [vmem:[#allocation6 + $0x720] sm:$0xff] }
 0x210   : > { %v2044_v17 = vpop.f32.mrf.mxu1  ;;  %3614 = vmatpush.bf16.msra.mxu2 %v8019_v63 }
 0x211   : > { %v8270_v22 = vpack.c.bf16 %v2098_v15, %v2096_v14  ;;  %2848 = vmatmul.bf16.gmra.mxu2 %v8932_v30  ;;  %v2045_v38 = vadd.f32 %v2044_v17, %v2015_v16  ;;  %v8026_v14 = vld [vmem:[#allocation6 + $0x7e8] sm:$0xff] }
 0x212   : > { %2877 = vmatmul.bf16.gmra.mxu3 %v8934_v31  ;;  %3587 = vmatpush.bf16.msra.mxu1 %v8009_v10 }
 0x213   : > { %8398 = vst [vmem:[#allocation2 + $0xf8] sm:$0xff] %v8270_v22   ;;  %3644 = vmatpush.bf16.msra.mxu3 %v8026_v14  ;;  %v8000_v14 = vld [vmem:[#allocation6 + $0x718] sm:$0xff] }
 0x214   : > { %v2071_v25 = vpop.f32.mrf.mxu2 }
 0x215   : > { %v2100_v26 = vpop.f32.mrf.mxu3  ;;  %v2072_v39 = vadd.f32 %v2071_v25, %v2043_v37 }
 0x216   : > { %3588 = vmatpush.bf16.msra.mxu1 %v8008_v21 }
 0x217   : > { %v2018_v33 = vpop.f32.mrf.mxu0  ;;  %v2101_v45 = vadd.f32 %v2100_v26, %v2072_v39  ;;  %3645 = vmatpush.bf16.msra.mxu3 %v8025_v23  ;;  %v8040_v23 = vld [vmem:[#allocation6 + $0x858] sm:$0xff] }
 0x218   : > { %v2047_v34 = vpop.f32.mrf.mxu1 }
 0x219   : > { %v2048_v4 = vadd.f32 %v2047_v34, %v2018_v33  ;;  %v8023_v34 = vld [vmem:[#allocation6 + $0x7d0] sm:$0xff] }
 0x21a   : > { %2795 = vmatmul.bf16.gmra.mxu0 %v8938_v48  ;;  %3589 = vmatpush.bf16.msra.mxu1 %v8007_v24 }
 0x21b   : > { %2824 = vmatmul.bf16.gmra.mxu1 %v8940_v49  ;;  %3646 = vmatpush.bf16.msra.mxu3 %v8024_v27 }
 0x21c   : > { %v2073_v40 = vpop.f32.mrf.mxu2 }
 0x21d   : > { %v2102_v41 = vpop.f32.mrf.mxu3  ;;  %v2074_v44 = vadd.f32 %v2073_v40, %v2045_v38  ;;  %v8005_v38 = vld [vmem:[#allocation6 + $0x740] sm:$0xff] }
 0x21e   : > { %3590 = vmatpush.bf16.msra.mxu1 %v8006_v32 }
 0x21f   : > { %v2103_v46 = vadd.f32 %v2102_v41, %v2074_v44  ;;  %v2020_v47 = vpop.f32.mrf.mxu0  ;;  %3647 = vmatpush.bf16.msra.mxu3 %v8023_v34  ;;  %v8044_v41 = vld [vmem:[#allocation6 + $0x878] sm:$0xff]  ;;  %v8003_v44 = vld [vmem:[#allocation6 + $0x730] sm:$0xff] }
 0x220   : > { %v2049_v50 = vpop.f32.mrf.mxu1  ;;  %3556 = vmatpush.bf16.msra.mxu0 %v8003_v44  ;;  %v8039_v34 = vld [vmem:[#allocation6 + $0x850] sm:$0xff] }
 0x221   : > { %v8275_v52 = vpack.c.bf16 %v2103_v46, %v2101_v45  ;;  %2853 = vmatmul.bf16.gmra.mxu2 %v8944_v54  ;;  %v2050_v8 = vadd.f32 %v2049_v50, %v2020_v47 }
 0x222   : > { %2882 = vmatmul.bf16.gmra.mxu3 %v8946_v55  ;;  %3591 = vmatpush.bf16.msra.mxu1 %v8005_v38 }
 0x223   : > { %8399 = vst [vmem:[#allocation2 + $0x38] sm:$0xff] %v8275_v52   ;;  %3648 = vmatpush.bf16.msra.mxu3 %v8022_v43  ;;  %v8043_v52 = vld [vmem:[#allocation6 + $0x870] sm:$0xff] }
 0x224   : > { %v2076_v56 = vpop.f32.mrf.mxu2 }
 0x225   : > { %v2105_v57 = vpop.f32.mrf.mxu3  ;;  %v2077_v9 = vadd.f32 %v2076_v56, %v2048_v4  ;;  %v8021_v56 = vld [vmem:[#allocation6 + $0x7c0] sm:$0xff]  ;;  %v8042_v4 = vld [vmem:[#allocation6 + $0x868] sm:$0xff] }
 0x227   : > { %v2023_v61 = vpop.f32.mrf.mxu0  ;;  %v2106_v15 = vadd.f32 %v2105_v57, %v2077_v9  ;;  %v8002_v57 = vld [vmem:[#allocation6 + $0x728] sm:$0xff]  ;;  %3649 = vmatpush.bf16.msra.mxu3 %v8021_v56 }
 0x228   : > { %v2052_v62 = vpop.f32.mrf.mxu1  ;;  %3557 = vmatpush.bf16.msra.mxu0 %v8002_v57 }
 0x229   : > { %v2053_v33 = vadd.f32 %v2052_v62, %v2023_v61 }
 0x22a   : > { %2800 = vmatmul.bf16.gmra.mxu0 %v8950_v0 }
 0x22b   : > { %2829 = vmatmul.bf16.gmra.mxu1 %v8952_v1 }
 0x22c   : > { %v2078_v11 = vpop.f32.mrf.mxu2  ;;  %3558 = vmatpush.bf16.msra.mxu0 %v8001_v5 }
 0x22d   : > { %v2107_v12 = vpop.f32.mrf.mxu3  ;;  %v2079_v13 = vadd.f32 %v2078_v11, %v2050_v8  ;;  %v8059_v8 = vld [vmem:[#allocation6 + $0x8f0] sm:$0xff]  ;;  %v8018_v11 = vld [vmem:[#allocation6 + $0x7a8] sm:$0xff] }
 0x22e   : > { %3615 = vmatpush.bf16.msra.mxu2 %v8018_v11 }
 0x22f   : > { %v2108_v16 = vadd.f32 %v2107_v12, %v2079_v13  ;;  %v2025_v17 = vpop.f32.mrf.mxu0  ;;  %v8041_v12 = vld [vmem:[#allocation6 + $0x860] sm:$0xff] }
 0x230   : > { %v2054_v20 = vpop.f32.mrf.mxu1  ;;  %3559 = vmatpush.bf16.msra.mxu0 %v8000_v14 }
 0x231   : > { %v8280_v22 = vpack.c.bf16 %v2108_v16, %v2106_v15  ;;  %2858 = vmatmul.bf16.gmra.mxu2 %v8956_v6  ;;  %v2055_v36 = vadd.f32 %v2054_v20, %v2025_v17  ;;  %v8058_v15 = vld [vmem:[#allocation6 + $0x8e8] sm:$0xff] }
 0x232   : > { %2887 = vmatmul.bf16.gmra.mxu3 %v8958_v7 }
 0x233   : > { %8400 = vst [vmem:[#allocation2 + $0x8] sm:$0xff] %v8280_v22   ;;  %v8017_v22 = vld [vmem:[#allocation6 + $0x7a0] sm:$0xff] }
 0x234   : > { %v2081_v25 = vpop.f32.mrf.mxu2  ;;  %3616 = vmatpush.bf16.msra.mxu2 %v8017_v22 }
 0x235   : > { %v2110_v26 = vpop.f32.mrf.mxu3  ;;  %v2082_v37 = vadd.f32 %v2081_v25, %v2053_v33  ;;  %v7999_v25 = vld [vmem:[#allocation6 + $0x710] sm:$0xff]  ;;  %v8016_v33 = vld [vmem:[#allocation6 + $0x798] sm:$0xff] }
 0x236   : > { %3560 = vmatpush.bf16.msra.mxu0 %v7999_v25 }
 0x237   : > { %v2397_v28 = vpop.f32.mrf.mxu0  ;;  %v2111_v45 = vadd.f32 %v2110_v26, %v2082_v37  ;;  %v8057_v26 = vld [vmem:[#allocation6 + $0x8e0] sm:$0xff]  ;;  %v8056_v37 = vld [vmem:[#allocation6 + $0x8d8] sm:$0xff] }
 0x238   : > { %v2426_v29 = vpop.f32.mrf.mxu1  ;;  %3617 = vmatpush.bf16.msra.mxu2 %v8016_v33 }
 0x239   : > { %v2427_v13 = vadd.f32 %v2426_v29, %v2397_v28 }
 0x23a   : > { %3174 = vmatmul.bf16.vlgmr.msrb.gmra.mxu0 %v8914_v58 }
 0x23b   : > { %3203 = vmatmul.bf16.vlgmr.msrb.gmra.mxu1 %v8916_v59 }
 0x23c   : > { %v2083_v39 = vpop.f32.mrf.mxu2  ;;  %3973 = vmatpush.bf16.msrb.mxu1 %v8044_v41  ;;  %v8038_v41 = vld [vmem:[#allocation6 + $0x848] sm:$0xff] }
 0x23d   : > { %v2112_v40 = vpop.f32.mrf.mxu3  ;;  %v2084_v42 = vadd.f32 %v2083_v39, %v2055_v36  ;;  %v7998_v36 = vld [vmem:[#allocation6 + $0x708] sm:$0xff] }
 0x23e   : > { %3561 = vmatpush.bf16.msra.mxu0 %v7998_v36 }
 0x23f   : > { %v2113_v46 = vadd.f32 %v2112_v40, %v2084_v42  ;;  %v2399_v47 = vpop.f32.mrf.mxu0  ;;  %v8015_v40 = vld [vmem:[#allocation6 + $0x790] sm:$0xff]  ;;  %v7997_v42 = vld [vmem:[#allocation6 + $0x700] sm:$0xff] }
 0x240   : > { %v2428_v50 = vpop.f32.mrf.mxu1  ;;  %3974 = vmatpush.bf16.msrb.mxu1 %v8043_v52  ;;  %3618 = vmatpush.bf16.msra.mxu2 %v8015_v40 }
 0x241   : > { %v8285_v53 = vpack.c.bf16 %v2113_v46, %v2111_v45  ;;  %3232 = vmatmul.bf16.vlgmr.msrb.gmra.mxu2 %v8920_v2  ;;  %v2429_v16 = vadd.f32 %v2428_v50, %v2399_v47  ;;  %v8055_v45 = vld [vmem:[#allocation6 + $0x8d0] sm:$0xff]  ;;  %v8014_v46 = vld [vmem:[#allocation6 + $0x788] sm:$0xff]  ;;  %v8037_v47 = vld [vmem:[#allocation6 + $0x840] sm:$0xff] }
 0x242   : > { %3261 = vmatmul.bf16.vlgmr.msrb.gmra.mxu3 %v8922_v3  ;;  %3562 = vmatpush.bf16.msra.mxu0 %v7997_v42  ;;  %v8157_v42 = vld [vmem:[#allocation2 + $0x30] sm:$0xff] }
 0x243   : > { %8401 = vst [vmem:[#allocation2 + $0x78] sm:$0xff] %v8285_v53   ;;  %4031 = vmatpush.bf16.msrb.mxu3 %v8060_v60  ;;  %v8054_v53 = vld [vmem:[#allocation6 + $0x8c8] sm:$0xff]  ;;  %v8013_v60 = vld [vmem:[#allocation6 + $0x780] sm:$0xff] }
 0x244   : > { %v2455_v61 = vpop.f32.mrf.mxu2  ;;  %3975 = vmatpush.bf16.msrb.mxu1 %v8042_v4  ;;  %3619 = vmatpush.bf16.msra.mxu2 %v8014_v46 }
 0x245   : > { %v2484_v62 = vpop.f32.mrf.mxu3  ;;  %v2456_v17 = vadd.f32 %v2455_v61, %v2427_v13 }
 0x247   : > { %v2402_v9 = vpop.f32.mrf.mxu0  ;;  %4032 = vmatpush.bf16.msrb.mxu3 %v8059_v8  ;;  %v2485_v27 = vadd.f32 %v2484_v62, %v2456_v17  ;;  %v8053_v8 = vld [vmem:[#allocation6 + $0x8c0] sm:$0xff] }
 0x248   : > { %v2431_v10 = vpop.f32.mrf.mxu1  ;;  %3976 = vmatpush.bf16.msrb.mxu1 %v8041_v12  ;;  %3620 = vmatpush.bf16.msra.mxu2 %v8013_v60 }
 0x249   : > { %v2432_v50 = vadd.f32 %v2431_v10, %v2402_v9 }
 0x24a   : > { %3179 = vmatmul.bf16.gmra.mxu0 %v8926_v18 }
 0x24b   : > { %3208 = vmatmul.bf16.gmra.mxu1 %v8928_v19  ;;  %4033 = vmatpush.bf16.msrb.mxu3 %v8058_v15 }
 0x24c   : > { %v2457_v20 = vpop.f32.mrf.mxu2  ;;  %3977 = vmatpush.bf16.msrb.mxu1 %v8040_v23 }
 0x24d   : > { %v2486_v21 = vpop.f32.mrf.mxu3  ;;  %v2458_v24 = vadd.f32 %v2457_v20, %v2429_v16 }
 0x24f   : > { %v2487_v28 = vadd.f32 %v2486_v21, %v2458_v24  ;;  %v2404_v29 = vpop.f32.mrf.mxu0  ;;  %4034 = vmatpush.bf16.msrb.mxu3 %v8057_v26 }
 0x250   : > { %v2433_v32 = vpop.f32.mrf.mxu1  ;;  %3978 = vmatpush.bf16.msrb.mxu1 %v8039_v34  ;;  %v8158_v34 = vld [vmem:[#allocation2 + $0x18] sm:$0xff] }
 0x251   : > { %v8290_v35 = vpack.c.bf16 %v2487_v28, %v2485_v27  ;;  %3237 = vmatmul.bf16.gmra.mxu2 %v8932_v30  ;;  %v2434_v51 = vadd.f32 %v2433_v32, %v2404_v29 }
 0x252   : > { %3266 = vmatmul.bf16.gmra.mxu3 %v8934_v31 }
 0x253   : > { %8402 = vst [vmem:[#allocation2 + $0x20] sm:$0xff] %v8290_v35   ;;  %4035 = vmatpush.bf16.msrb.mxu3 %v8056_v37  ;;  %v8052_v35 = vld [vmem:[#allocation6 + $0x8b8] sm:$0xff] }
 0x254   : > { %v2460_v38 = vpop.f32.mrf.mxu2  ;;  %3979 = vmatpush.bf16.msrb.mxu1 %v8038_v41  ;;  %4002 = vmatpush.bf16.msrb.mxu2 %v8052_v35 }
 0x255   : > { %v2489_v39 = vpop.f32.mrf.mxu3  ;;  %v2461_v52 = vadd.f32 %v2460_v38, %v2432_v50  ;;  %v8036_v38 = vld [vmem:[#allocation6 + $0x838] sm:$0xff]  ;;  %v8035_v50 = vld [vmem:[#allocation6 + $0x830] sm:$0xff] }
 0x256   : > { %3944 = vmatpush.bf16.msrb.mxu0 %v8036_v38 }
 0x257   : > { %v2407_v43 = vpop.f32.mrf.mxu0  ;;  %4036 = vmatpush.bf16.msrb.mxu3 %v8055_v45  ;;  %v2490_v62 = vadd.f32 %v2489_v39, %v2461_v52  ;;  %v8156_v52 = vld [vmem:[#allocation2 + $0x68] sm:$0xff] }
 0x258   : > { %v2436_v44 = vpop.f32.mrf.mxu1  ;;  %3980 = vmatpush.bf16.msrb.mxu1 %v8037_v47 }
 0x259   : > { %v2437_v14 = vadd.f32 %v2436_v44, %v2407_v43  ;;  %v8051_v43 = vld [vmem:[#allocation6 + $0x8b0] sm:$0xff] }
 0x25a   : > { %3184 = vmatmul.bf16.gmra.mxu0 %v8938_v48  ;;  %4003 = vmatpush.bf16.msrb.mxu2 %v8051_v43 }
 0x25b   : > { %3213 = vmatmul.bf16.gmra.mxu1 %v8940_v49  ;;  %4037 = vmatpush.bf16.msrb.mxu3 %v8054_v53  ;;  %v8050_v53 = vld [vmem:[#allocation6 + $0x8a8] sm:$0xff] }
 0x25c   : > { %v2462_v56 = vpop.f32.mrf.mxu2  ;;  %3945 = vmatpush.bf16.msrb.mxu0 %v8035_v50 }
 0x25d   : > { %v2491_v57 = vpop.f32.mrf.mxu3  ;;  %v2463_v61 = vadd.f32 %v2462_v56, %v2434_v51  ;;  %v8034_v56 = vld [vmem:[#allocation6 + $0x828] sm:$0xff] }
 0x25e   : > { %4004 = vmatpush.bf16.msrb.mxu2 %v8050_v53 }
 0x25f   : > { %v2492_v63 = vadd.f32 %v2491_v57, %v2463_v61  ;;  %v2409_v4 = vpop.f32.mrf.mxu0  ;;  %4038 = vmatpush.bf16.msrb.mxu3 %v8053_v8  ;;  %v8155_v61 = vld [vmem:[#allocation2 + $0x108] sm:$0xff] }
 0x260   : > { %v2438_v5 = vpop.f32.mrf.mxu1  ;;  %3946 = vmatpush.bf16.msrb.mxu0 %v8034_v56 }
 0x261   : > { %v8295_v9 = vpack.c.bf16 %v2492_v63, %v2490_v62  ;;  %3242 = vmatmul.bf16.gmra.mxu2 %v8944_v54  ;;  %v2439_v15 = vadd.f32 %v2438_v5, %v2409_v4  ;;  %v8049_v62 = vld [vmem:[#allocation6 + $0x8a0] sm:$0xff] }
 0x262   : > { %3271 = vmatmul.bf16.gmra.mxu3 %v8946_v55  ;;  %v8033_v5 = vld [vmem:[#allocation6 + $0x820] sm:$0xff]  ;;  %4005 = vmatpush.bf16.msrb.mxu2 %v8049_v62 }
 0x263   : > { %8403 = vst [vmem:[#allocation2 + $0xc8] sm:$0xff] %v8295_v9   ;;  %v8154_v9 = vld [vmem:[#allocation2 + $0x48] sm:$0xff] }
 0x264   : > { %v2465_v10 = vpop.f32.mrf.mxu2  ;;  %3947 = vmatpush.bf16.msrb.mxu0 %v8033_v5 }
 0x265   : > { %v2494_v11 = vpop.f32.mrf.mxu3  ;;  %v2466_v16 = vadd.f32 %v2465_v10, %v2437_v14  ;;  %v8048_v10 = vld [vmem:[#allocation6 + $0x898] sm:$0xff] }
 0x266   : > { %4006 = vmatpush.bf16.msrb.mxu2 %v8048_v10 }
 0x267   : > { %v2412_v12 = vpop.f32.mrf.mxu0  ;;  %v2495_v22 = vadd.f32 %v2494_v11, %v2466_v16 }
 0x268   : > { %v2441_v13 = vpop.f32.mrf.mxu1 }
 0x269   : > { %v2442_v33 = vadd.f32 %v2441_v13, %v2412_v12  ;;  %v8032_v13 = vld [vmem:[#allocation6 + $0x818] sm:$0xff] }
 0x26a   : > { %3189 = vmatmul.bf16.gmra.mxu0 %v8950_v0 }
 0x26b   : > { %3218 = vmatmul.bf16.gmra.mxu1 %v8952_v1  ;;  %3948 = vmatpush.bf16.msrb.mxu0 %v8032_v13 }
 0x26c   : > { %v2467_v17 = vpop.f32.mrf.mxu2 }
 0x26d   : > { %v2496_v20 = vpop.f32.mrf.mxu3  ;;  %v2468_v21 = vadd.f32 %v2467_v17, %v2439_v15  ;;  %v8153_v17 = vld [vmem:[#allocation2 + $0x10] sm:$0xff] }
 0x26f   : > { %v2497_v23 = vadd.f32 %v2496_v20, %v2468_v21  ;;  %v2414_v24 = vpop.f32.mrf.mxu0  ;;  %v8047_v20 = vld [vmem:[#allocation6 + $0x890] sm:$0xff] }
 0x270   : > { %v2443_v25 = vpop.f32.mrf.mxu1  ;;  %4007 = vmatpush.bf16.msrb.mxu2 %v8047_v20 }
 0x271   : > { %v8300_v26 = vpack.c.bf16 %v2497_v23, %v2495_v22  ;;  %3247 = vmatmul.bf16.gmra.mxu2 %v8956_v6  ;;  %v2444_v36 = vadd.f32 %v2443_v25, %v2414_v24  ;;  %v8031_v25 = vld [vmem:[#allocation6 + $0x810] sm:$0xff] }
 0x272   : > { %3276 = vmatmul.bf16.gmra.mxu3 %v8958_v7  ;;  %3949 = vmatpush.bf16.msrb.mxu0 %v8031_v25 }
 0x273   : > { %8404 = vst [vmem:[#allocation2 + $0x90] sm:$0xff] %v8300_v26  }
 0x274   : > { %v2470_v27 = vpop.f32.mrf.mxu2 }
 0x275   : > { %v2499_v28 = vpop.f32.mrf.mxu3  ;;  %v2471_v37 = vadd.f32 %v2470_v27, %v2442_v33  ;;  %v8152_v27 = vld [vmem:[#allocation2 + $0xd0] sm:$0xff] }
 0x277   : > { %v2786_v29 = vpop.f32.mrf.mxu0  ;;  %v2500_v44 = vadd.f32 %v2499_v28, %v2471_v37  ;;  %v8046_v28 = vld [vmem:[#allocation6 + $0x888] sm:$0xff]  ;;  %v8731_v37 = vmov 65535  }
 0x278   : > { %v2815_v32 = vpop.f32.mrf.mxu1  ;;  %4008 = vmatpush.bf16.msrb.mxu2 %v8046_v28  ;;  %v4459_v38 = vsel %vm4457_vm2, 4294967295, %v8731_v37 }
 0x279   : > { %v2816_v8 = vadd.f32 %v2815_v32, %v2786_v29  ;;  %v4296_v29 = vld [vmem:[#allocation9 + $0x10] sm:$0x7]  ;;  %v8030_v32 = vld [vmem:[#allocation6 + $0x808] sm:$0xff] }
 0x27a   : > { %3563 = vmatmul.bf16.vlgmr.msra.gmra.mxu0 %v8914_v58  ;;  %v4396_v33 = vunpack.c.l.b16 %v4296_v29 }
 0x27b   : > { %3592 = vmatmul.bf16.vlgmr.msra.gmra.mxu1 %v8916_v59  ;;  %3950 = vmatpush.bf16.msrb.mxu0 %v8030_v32 }
 0x27c   : > { %5284 = vmatpush.bf16.msra.mxu1 %v8158_v34  ;;  %v2472_v39 = vpop.f32.mrf.mxu2 }
 0x27d   : > { %v2501_v40 = vpop.f32.mrf.mxu3  ;;  %v2473_v41 = vadd.f32 %v2472_v39, %v2444_v36  ;;  %v4399_v36 = vpack.c.b16 %v4396_v33, %v4396_v33  ;;  %v8151_v39 = vld [vmem:[#allocation2 + $0xb0] sm:$0xff] }
 0x27f   : > { %v2502_v45 = vadd.f32 %v2501_v40, %v2473_v41  ;;  %v2788_v46 = vpop.f32.mrf.mxu0  ;;  %v8045_v40 = vld [vmem:[#allocation6 + $0x880] sm:$0xff]  ;;  %v4460_v41 = vsel %vm4458_vm3, %v4459_v38, 0 }
 0x280   : > { %5285 = vmatpush.bf16.msra.mxu1 %v8157_v42  ;;  %v2817_v47 = vpop.f32.mrf.mxu1  ;;  %4009 = vmatpush.bf16.msrb.mxu2 %v8045_v40  ;;  %v8166_v40 = vld [vmem:[#allocation2 + $0x78] sm:$0xff] }
 0x281   : > { %v8305_v51 = vpack.c.bf16 %v2502_v45, %v2500_v44  ;;  %3621 = vmatmul.bf16.vlgmr.msra.gmra.mxu2 %v8920_v2  ;;  %v2818_v11 = vadd.f32 %v2817_v47, %v2788_v46  ;;  %v8029_v44 = vld [vmem:[#allocation6 + $0x800] sm:$0xff]  ;;  %v4462_v45 = vand.u32 %v4460_v41, %v4399_v36 }
 0x282   : > { %3650 = vmatmul.bf16.vlgmr.msra.gmra.mxu3 %v8922_v3  ;;  %3951 = vmatpush.bf16.msrb.mxu0 %v8029_v44 }
 0x283   : > { %8425 = vmatpush.bf16.msra.mxu3 %v8158_v34  ;;  %8405 = vst [vmem:[#allocation2 + $0xa0] sm:$0xff] %v8305_v51   ;;  %v8206_v51 = vld [vmem:[#allocation9 + $0x8] sm:$0xff] }
 0x284   : > { %5286 = vmatpush.bf16.msra.mxu1 %v8156_v52  ;;  %v2844_v57 = vpop.f32.mrf.mxu2  ;;  %8422 = vmatpush.bf16.msra.mxu2 %v4462_v45 }
 0x285   : > { %v2873_v60 = vpop.f32.mrf.mxu3  ;;  %v2845_v12 = vadd.f32 %v2844_v57, %v2816_v8 }
 0x286   : > { %4469 = vmatpush.bf16.msra.mxu0 %v4462_v45  ;;  %v8164_v45 = vld [vmem:[#allocation2 + $0x38] sm:$0xff] }
 0x287   : > { %8426 = vmatpush.bf16.msra.mxu3 %v8157_v42  ;;  %v2791_v63 = vpop.f32.mrf.mxu0  ;;  %v2874_v21 = vadd.f32 %v2873_v60, %v2845_v12 }
 0x288   : > { %5287 = vmatpush.bf16.msra.mxu1 %v8155_v61  ;;  %v2820_v4 = vpop.f32.mrf.mxu1  ;;  %8423 = vmatpush.bf16.msra.mxu2 %v8206_v51 }
 0x289   : > { %v2821_v46 = vadd.f32 %v2820_v4, %v2791_v63  ;;  %v8205_v63 = vld [vmem:[#allocation9] sm:$0xff] }
 0x28a   : > { %3568 = vmatmul.bf16.gmra.mxu0 %v8926_v18 }
 0x28b   : > { %8427 = vmatpush.bf16.msra.mxu3 %v8156_v52  ;;  %3597 = vmatmul.bf16.gmra.mxu1 %v8928_v19 }
 0x28c   : > { %5288 = vmatpush.bf16.msra.mxu1 %v8154_v9  ;;  %v2846_v14 = vpop.f32.mrf.mxu2  ;;  %4470 = vmatpush.bf16.msra.mxu0 %v8206_v51 }
 0x28d   : > { %v2875_v15 = vpop.f32.mrf.mxu3  ;;  %v2847_v16 = vadd.f32 %v2846_v14, %v2818_v11  ;;  %8424 = vmatpush.bf16.msra.mxu2 %v8205_v63 }
 0x28f   : > { %8428 = vmatpush.bf16.msra.mxu3 %v8155_v61  ;;  %v2876_v22 = vadd.f32 %v2875_v15, %v2847_v16  ;;  %v2793_v23 = vpop.f32.mrf.mxu0 }
 0x290   : > { %v2822_v24 = vpop.f32.mrf.mxu1  ;;  %5289 = vmatpush.bf16.msra.mxu1 %v8153_v17  ;;  %4471 = vmatpush.bf16.msra.mxu0 %v8205_v63  ;;  %v8162_v63 = vld [vmem:[#allocation2 + $0x98] sm:$0xff] }
 0x291   : > { %v8310_v26 = vpack.c.bf16 %v2876_v22, %v2874_v21  ;;  %3626 = vmatmul.bf16.gmra.mxu2 %v8932_v30  ;;  %v2823_v47 = vadd.f32 %v2822_v24, %v2793_v23 }
 0x292   : > { %3655 = vmatmul.bf16.gmra.mxu3 %v8934_v31 }
 0x293   : > { %8429 = vmatpush.bf16.msra.mxu3 %v8154_v9  ;;  %8406 = vst [vmem:[#allocation2 + $0x70] sm:$0xff] %v8310_v26  }
 0x294   : > { %5290 = vmatpush.bf16.msra.mxu1 %v8152_v27  ;;  %v2849_v34 = vpop.f32.mrf.mxu2 }
 0x295   : > { %v2878_v35 = vpop.f32.mrf.mxu3  ;;  %v2850_v50 = vadd.f32 %v2849_v34, %v2821_v46 }
 0x297   : > { %8430 = vmatpush.bf16.msra.mxu3 %v8153_v17  ;;  %v2796_v42 = vpop.f32.mrf.mxu0  ;;  %v2879_v57 = vadd.f32 %v2878_v35, %v2850_v50 }
 0x298   : > { %v2825_v43 = vpop.f32.mrf.mxu1  ;;  %5291 = vmatpush.bf16.msra.mxu1 %v8151_v39 }
 0x299   : > { %v2826_v11 = vadd.f32 %v2825_v43, %v2796_v42  ;;  %v8165_v43 = vld [vmem:[#allocation2 + $0x8] sm:$0xff] }
 0x29a   : > { %3573 = vmatmul.bf16.gmra.mxu0 %v8938_v48 }
 0x29b   : > { %8431 = vmatpush.bf16.msra.mxu3 %v8152_v27  ;;  %3602 = vmatmul.bf16.gmra.mxu1 %v8940_v49 }
 0x29c   : > { %v2851_v52 = vpop.f32.mrf.mxu2 }
 0x29d   : > { %v2880_v53 = vpop.f32.mrf.mxu3  ;;  %v2852_v56 = vadd.f32 %v2851_v52, %v2823_v47  ;;  %v8163_v52 = vld [vmem:[#allocation2 + $0xf8] sm:$0xff] }
 0x29f   : > { %8432 = vmatpush.bf16.msra.mxu3 %v8151_v39  ;;  %v2881_v60 = vadd.f32 %v2880_v53, %v2852_v56  ;;  %v2798_v61 = vpop.f32.mrf.mxu0 }
 0x2a0   : > { %v2827_v62 = vpop.f32.mrf.mxu1 }
 0x2a1   : > { %v8315_v4 = vpack.c.bf16 %v2881_v60, %v2879_v57  ;;  %3631 = vmatmul.bf16.gmra.mxu2 %v8944_v54  ;;  %v2828_v12 = vadd.f32 %v2827_v62, %v2798_v61 }
 0x2a2   : > { %3660 = vmatmul.bf16.gmra.mxu3 %v8946_v55 }
 0x2a3   : > { %8407 = vst [vmem:[#allocation2 + $0x58] sm:$0xff] %v8315_v4  }
 0x2a4   : > { %v2854_v5 = vpop.f32.mrf.mxu2 }
 0x2a5   : > { %v2883_v8 = vpop.f32.mrf.mxu3  ;;  %v2855_v13 = vadd.f32 %v2854_v5, %v2826_v11 }
 0x2a7   : > { %v2801_v9 = vpop.f32.mrf.mxu0  ;;  %v2884_v17 = vadd.f32 %v2883_v8, %v2855_v13  ;;  %v8161_v8 = vld [vmem:[#allocation2 + $0x118] sm:$0xff] }
 0x2a8   : > { %v2830_v10 = vpop.f32.mrf.mxu1 }
 0x2a9   : > { %v2831_v28 = vadd.f32 %v2830_v10, %v2801_v9  ;;  %v8171_v9 = vld [vmem:[#allocation2 + $0x70] sm:$0xff] }
 0x2aa   : > { %3578 = vmatmul.bf16.gmra.mxu0 %v8950_v0 }
 0x2ab   : > { %3607 = vmatmul.bf16.gmra.mxu1 %v8952_v1 }
 0x2ac   : > { %v2856_v14 = vpop.f32.mrf.mxu2 }
 0x2ad   : > { %v2885_v15 = vpop.f32.mrf.mxu3  ;;  %v2857_v16 = vadd.f32 %v2856_v14, %v2828_v12  ;;  %v8160_v12 = vld [vmem:[#allocation2 + $0x110] sm:$0xff] }
 0x2af   : > { %v2886_v20 = vadd.f32 %v2885_v15, %v2857_v16  ;;  %v2803_v21 = vpop.f32.mrf.mxu0 }
 0x2b0   : > { %v2832_v22 = vpop.f32.mrf.mxu1 }
 0x2b1   : > { %v8320_v23 = vpack.c.bf16 %v2886_v20, %v2884_v17  ;;  %3636 = vmatmul.bf16.gmra.mxu2 %v8956_v6  ;;  %v2833_v29 = vadd.f32 %v2832_v22, %v2803_v21  ;;  %v8159_v17 = vld [vmem:[#allocation2 + $0x80] sm:$0xff]  ;;  %v8169_v21 = vld [vmem:[#allocation2 + $0x90] sm:$0xff] }
 0x2b2   : > { %3665 = vmatmul.bf16.gmra.mxu3 %v8958_v7 }
 0x2b3   : > { %8408 = vst [vmem:[#allocation2 + $0xe0] sm:$0xff] %v8320_v23  }
 0x2b4   : > { %v2859_v24 = vpop.f32.mrf.mxu2 }
 0x2b5   : > { %v2888_v25 = vpop.f32.mrf.mxu3  ;;  %v2860_v32 = vadd.f32 %v2859_v24, %v2831_v28  ;;  %v8167_v28 = vld [vmem:[#allocation2 + $0x20] sm:$0xff] }
 0x2b7   : > { %v3175_v26 = vpop.f32.mrf.mxu0  ;;  %v2889_v36 = vadd.f32 %v2888_v25, %v2860_v32 }
 0x2b8   : > { %v3204_v27 = vpop.f32.mrf.mxu1 }
 0x2b9   : > { %v3205_v46 = vadd.f32 %v3204_v27, %v3175_v26 }
 0x2ba   : > { %3952 = vmatmul.bf16.vlgmr.msrb.gmra.mxu0 %v8914_v58  ;;  %v8173_v56 = vld [vmem:[#allocation2 + $0xe0] sm:$0xff] }
 0x2bb   : > { %3981 = vmatmul.bf16.vlgmr.msrb.gmra.mxu1 %v8916_v59 }
 0x2bc   : > { %v2861_v33 = vpop.f32.mrf.mxu2 }
 0x2bd   : > { %v2890_v34 = vpop.f32.mrf.mxu3  ;;  %v2862_v35 = vadd.f32 %v2861_v33, %v2833_v29 }
 0x2bf   : > { %v2891_v37 = vadd.f32 %v2890_v34, %v2862_v35  ;;  %v3177_v38 = vpop.f32.mrf.mxu0 }
 0x2c0   : > { %v3206_v39 = vpop.f32.mrf.mxu1 }
 0x2c1   : > { %v8325_v41 = vpack.c.bf16 %v2891_v37, %v2889_v36  ;;  %4010 = vmatmul.bf16.vlgmr.msrb.gmra.mxu2 %v8920_v2  ;;  %v3207_v50 = vadd.f32 %v3206_v39, %v3177_v38 }
 0x2c2   : > { %4039 = vmatmul.bf16.vlgmr.msrb.gmra.mxu3 %v8922_v3  ;;  %5383 = vmatpush.bf16.msrb.mxu2 %v8166_v40 }
 0x2c3   : > { %8409 = vst [vmem:[#allocation2 + $0x60] sm:$0xff] %v8325_v41  }
 0x2c4   : > { %v3233_v58 = vpop.f32.mrf.mxu2 }
 0x2c5   : > { %v3262_v42 = vpop.f32.mrf.mxu3  ;;  %v3234_v51 = vadd.f32 %v3233_v58, %v3205_v46 }
 0x2c6   : > { %5384 = vmatpush.bf16.msrb.mxu2 %v8165_v43  ;;  %v8063_v43 = vld [vmem:[#allocation8 + $0x10] sm:$0xf0] }
 0x2c7   : > { %v3180_v59 = vpop.f32.mrf.mxu0  ;;  %v3263_v57 = vadd.f32 %v3262_v42, %v3234_v51  ;;  %v7249_v42 = vld [vmem:[#allocation8] sm:$0xf] }
 0x2c8   : > { %v3209_v44 = vpop.f32.mrf.mxu1 }
 0x2c9   : > { %v3210_v13 = vadd.f32 %v3209_v44, %v3180_v59 }
 0x2ca   : > { %5385 = vmatpush.bf16.msrb.mxu2 %v8164_v45  ;;  %3957 = vmatmul.bf16.gmra.mxu0 %v8926_v18  ;;  %v8174_v47 = vld [vmem:[#allocation2 + $0x60] sm:$0xff]  ;;  %v8172_v18 = vld [vmem:[#allocation2 + $0x58] sm:$0xff]  ;;  %v7250_v45 = vor.u32 %v8063_v43, %v7249_v42 }
 0x2cb   : > { %3986 = vmatmul.bf16.gmra.mxu1 %v8928_v19  ;;  %5482 = vmatpush.bf16.msrb.mxu3 %v8174_v47 }
 0x2cc   : > { %v3235_v2 = vpop.f32.mrf.mxu2 }
 0x2cd   : > { %v3264_v3 = vpop.f32.mrf.mxu3  ;;  %v3236_v53 = vadd.f32 %v3235_v2, %v3207_v50 }
 0x2ce   : > { %5386 = vmatpush.bf16.msrb.mxu2 %v8163_v52  ;;  %v8196_v52 = vld [vmem:[%s9094_s19 + $0x48] sm:$0xff] }
 0x2cf   : > { %v3265_v60 = vadd.f32 %v3264_v3, %v3236_v53  ;;  %v3182_v61 = vpop.f32.mrf.mxu0  ;;  %5483 = vmatpush.bf16.msrb.mxu3 %v8173_v56 }
 0x2d0   : > { %v3211_v62 = vpop.f32.mrf.mxu1 }
 0x2d1   : > { %v8330_v4 = vpack.c.bf16 %v3265_v60, %v3263_v57  ;;  %4015 = vmatmul.bf16.gmra.mxu2 %v8932_v30  ;;  %v8170_v30 = vld [vmem:[#allocation2 + $0xa0] sm:$0xff]  ;;  %v3212_v14 = vadd.f32 %v3211_v62, %v3182_v61 }
 0x2d2   : > { %4044 = vmatmul.bf16.gmra.mxu3 %v8934_v31  ;;  %5387 = vmatpush.bf16.msrb.mxu2 %v8162_v63 }
 0x2d3   : > { %8410 = vst [vmem:[#allocation2 + $0xa8] sm:$0xff] %v8330_v4   ;;  %5484 = vmatpush.bf16.msrb.mxu3 %v8172_v18  ;;  %v7269_v18 = vld [vmem:[#allocation8 + $0x28] sm:$0xf] }
 0x2d4   : > { %v3238_v19 = vpop.f32.mrf.mxu2 }
 0x2d5   : > { %v3267_v5 = vpop.f32.mrf.mxu3  ;;  %v3239_v31 = vadd.f32 %v3238_v19, %v3210_v13  ;;  %v8068_v19 = vld [vmem:[#allocation8 + $0x38] sm:$0xf0]  ;;  %v8113_v13 = vld [vmem:[#allocation8 + $0x1a0] sm:$0xf0] }
 0x2d6   : > { %5388 = vmatpush.bf16.msrb.mxu2 %v8161_v8 }
 0x2d7   : > { %v3185_v10 = vpop.f32.mrf.mxu0  ;;  %5485 = vmatpush.bf16.msrb.mxu3 %v8171_v9  ;;  %v3268_v22 = vadd.f32 %v3267_v5, %v3239_v31  ;;  %v8188_v5 = vld [vmem:[%s9094_s19 + $0x8] sm:$0xff]  ;;  %v7270_v9 = vor.u32 %v8068_v19, %v7269_v18 }
 0x2d8   : > { %v3214_v11 = vpop.f32.mrf.mxu1 }
 0x2d9   : > { %v3215_v33 = vadd.f32 %v3214_v11, %v3185_v10 }
 0x2da   : > { %5389 = vmatpush.bf16.msrb.mxu2 %v8160_v12  ;;  %3962 = vmatmul.bf16.gmra.mxu0 %v8938_v48  ;;  %v8168_v48 = vld [vmem:[#allocation2 + $0xc8] sm:$0xff]  ;;  %v7449_v12 = vld [vmem:[#allocation8 + $0x190] sm:$0xf] }
 0x2db   : > { %3991 = vmatmul.bf16.gmra.mxu1 %v8940_v49  ;;  %5486 = vmatpush.bf16.msrb.mxu3 %v8170_v30 }
 0x2dc   : > { %v3240_v15 = vpop.f32.mrf.mxu2 }
 0x2dd   : > { %v3269_v16 = vpop.f32.mrf.mxu3  ;;  %v3241_v20 = vadd.f32 %v3240_v15, %v3212_v14 }
 0x2de   : > { %5390 = vmatpush.bf16.msrb.mxu2 %v8159_v17  ;;  %v8197_v17 = vld [vmem:[%s9094_s19 + $0x50] sm:$0xff] }
 0x2df   : > { %v3270_v23 = vadd.f32 %v3269_v16, %v3241_v20  ;;  %v3187_v24 = vpop.f32.mrf.mxu0  ;;  %5487 = vmatpush.bf16.msrb.mxu3 %v8169_v21  ;;  %v7450_v20 = vor.u32 %v8113_v13, %v7449_v12  ;;  %v8191_v12 = vld [vmem:[%s9094_s19 + $0x20] sm:$0xff] }
 0x2e0   : > { %v3216_v25 = vpop.f32.mrf.mxu1 }
 0x2e1   : > { %v8335_v26 = vpack.c.bf16 %v3270_v23, %v3268_v22  ;;  %4020 = vmatmul.bf16.gmra.mxu2 %v8944_v54  ;;  %v3217_v34 = vadd.f32 %v3216_v25, %v3187_v24 }
 0x2e2   : > { %4049 = vmatmul.bf16.gmra.mxu3 %v8946_v55 }
 0x2e3   : > { %8411 = vst [vmem:[#allocation2 + $0x88] sm:$0xff] %v8335_v26   ;;  %5488 = vmatpush.bf16.msrb.mxu3 %v8168_v48 }
 0x2e4   : > { %v3243_v49 = vpop.f32.mrf.mxu2 }
 0x2e5   : > { %v3272_v27 = vpop.f32.mrf.mxu3  ;;  %v3244_v35 = vadd.f32 %v3243_v49, %v3215_v33  ;;  %v7289_v49 = vld [vmem:[#allocation8 + $0x50] sm:$0xf] }
 0x2e7   : > { %v3190_v29 = vpop.f32.mrf.mxu0  ;;  %5489 = vmatpush.bf16.msrb.mxu3 %v8167_v28  ;;  %v3273_v37 = vadd.f32 %v3272_v27, %v3244_v35  ;;  %v8073_v27 = vld [vmem:[#allocation8 + $0x60] sm:$0xf0]  ;;  %v8189_v28 = vld [vmem:[%s9094_s19 + $0x10] sm:$0xff]  ;;  %v7469_v35 = vld [vmem:[#allocation8 + $0x1b8] sm:$0xf] }
 0x2e8   : > { %v3219_v32 = vpop.f32.mrf.mxu1 }
 0x2e9   : > { %v3220_v46 = vadd.f32 %v3219_v32, %v3190_v29  ;;  %v7290_v32 = vor.u32 %v8073_v27, %v7289_v49 }
 0x2ea   : > { %3967 = vmatmul.bf16.gmra.mxu0 %v8950_v0 }
 0x2eb   : > { %3996 = vmatmul.bf16.gmra.mxu1 %v8952_v1  ;;  %v8187_v1 = vld [vmem:[%s9094_s19] sm:$0xff] }
 0x2ec   : > { %v3245_v54 = vpop.f32.mrf.mxu2 }
 0x2ed   : > { %v3274_v36 = vpop.f32.mrf.mxu3  ;;  %v3246_v55 = vadd.f32 %v3245_v54, %v3217_v34  ;;  %v8118_v54 = vld [vmem:[#allocation8 + $0x1c8] sm:$0xf0] }
 0x2ef   : > { %v3275_v38 = vadd.f32 %v3274_v36, %v3246_v55  ;;  %v3192_v39 = vpop.f32.mrf.mxu0 }
 0x2f0   : > { %v3221_v40 = vpop.f32.mrf.mxu1 }
 0x2f1   : > { %v8340_v41 = vpack.c.bf16 %v3275_v38, %v3273_v37  ;;  %4025 = vmatmul.bf16.gmra.mxu2 %v8956_v6  ;;  %v7429_v6 = vld [vmem:[#allocation8 + $0x168] sm:$0xf]  ;;  %v3222_v47 = vadd.f32 %v3221_v40, %v3192_v39  ;;  %v8198_v40 = vld [vmem:[%s9094_s19 + $0x58] sm:$0xff] }
 0x2f2   : > { %4054 = vmatmul.bf16.gmra.mxu3 %v8958_v7  ;;  %v8108_v7 = vld [vmem:[#allocation8 + $0x178] sm:$0xf0] }
 0x2f3   : > { %8412 = vst [vmem:[#allocation2 + $0xd8] sm:$0xff] %v8340_v41   ;;  %v7430_v53 = vor.u32 %v8108_v7, %v7429_v6  ;;  %v7470_v41 = vor.u32 %v8118_v54, %v7469_v35  ;;  %v8190_v6 = vld [vmem:[%s9094_s19 + $0x18] sm:$0xff]  ;;  %v8192_v35 = vld [vmem:[%s9094_s19 + $0x28] sm:$0xff] }
 0x2f4   : > { %v3248_v58 = vpop.f32.mrf.mxu2 }
 0x2f5   : > { %v3277_v0 = vpop.f32.mrf.mxu3  ;;  %v3249_v50 = vadd.f32 %v3248_v58, %v3220_v46  ;;  %v8078_v46 = vld [vmem:[#allocation8 + $0x88] sm:$0xf0] }
 0x2f7   : > { %v3564_v59 = vpop.f32.mrf.mxu0  ;;  %v3278_v56 = vadd.f32 %v3277_v0, %v3249_v50 }
 0x2f8   : > { %v3593_v44 = vpop.f32.mrf.mxu1 }
 0x2f9   : > { %v3594_v11 = vadd.f32 %v3593_v44, %v3564_v59 }
 0x2fa   : > { %7229 = vmatmul.msk.bf16.vlgmr.msra.gmra.mxu0 %vm4402_vm4, %v8187_v1 }
 0x2fb   : > { %5292 = vmatmul.bf16.vlgmr.msra.gmra.mxu1 %v7250_v45  ;;  %v7309_v45 = vld [vmem:[#allocation8 + $0x78] sm:$0xf] }
 0x2fc   : > { %v3250_v51 = vpop.f32.mrf.mxu2 }
 0x2fd   : > { %v3279_v2 = vpop.f32.mrf.mxu3  ;;  %v3251_v3 = vadd.f32 %v3250_v51, %v3222_v47  ;;  %v7310_v47 = vor.u32 %v8078_v46, %v7309_v45 }
 0x2ff   : > { %v3280_v57 = vadd.f32 %v3279_v2, %v3251_v3  ;;  %v3566_v60 = vpop.f32.mrf.mxu0  ;;  %v7489_v2 = vld [vmem:[#allocation8 + $0x1e0] sm:$0xf]  ;;  %v8123_v3 = vld [vmem:[#allocation8 + $0x1f0] sm:$0xf0] }
 0x300   : > { %v3595_v61 = vpop.f32.mrf.mxu1 }
 0x301   : > { %v8345_v62 = vpack.c.bf16 %v3280_v57, %v3278_v56  ;;  %7238 = vmatmul.msk.bf16.vlgmr.msra.gmra.mxu2 %vm4402_vm4, %v8196_v52  ;;  %v3596_v30 = vadd.f32 %v3595_v61, %v3566_v60  ;;  %v8199_v61 = vld [vmem:[%s9094_s19 + $0x60] sm:$0xff] }
 0x302   : > { %5337 = vmatmul.bf16.vlgmr.msra.gmra.mxu3 %v7430_v53 }
 0x303   : > { %8413 = vst [vmem:[#allocation2 + $0xc0] sm:$0xff] %v8345_v62   ;;  %v7490_v62 = vor.u32 %v8123_v3, %v7489_v2  ;;  %v7369_v3 = vld [vmem:[#allocation8 + $0xf0] sm:$0xf] }
 0x304   : > { %v3622_v63 = vpop.f32.mrf.mxu2 }
 0x305   : > { %v3651_v4 = vpop.f32.mrf.mxu3  ;;  %v3623_v14 = vadd.f32 %v3622_v63, %v3594_v11  ;;  %v8083_v11 = vld [vmem:[#allocation8 + $0xb0] sm:$0xf0] }
 0x307   : > { %v3569_v8 = vpop.f32.mrf.mxu0  ;;  %v3652_v21 = vadd.f32 %v3651_v4, %v3623_v14 }
 0x308   : > { %v3598_v10 = vpop.f32.mrf.mxu1 }
 0x309   : > { %v3599_v34 = vadd.f32 %v3598_v10, %v3569_v8  ;;  %v7329_v10 = vld [vmem:[#allocation8 + $0xa0] sm:$0xf] }
 0x30a   : > { %7230 = vmatmul.msk.bf16.gmra.mxu0 %vm4402_vm4, %v8188_v5 }
 0x30b   : > { %5297 = vmatmul.bf16.gmra.mxu1 %v7270_v9 }
 0x30c   : > { %v3624_v31 = vpop.f32.mrf.mxu2 }
 0x30d   : > { %v3653_v15 = vpop.f32.mrf.mxu3  ;;  %v3625_v16 = vadd.f32 %v3624_v31, %v3596_v30  ;;  %v7330_v30 = vor.u32 %v8083_v11, %v7329_v10  ;;  %v8202_v11 = vld [vmem:[%s9094_s19 + $0x78] sm:$0xff] }
 0x30f   : > { %v3654_v22 = vadd.f32 %v3653_v15, %v3625_v16  ;;  %v3571_v23 = vpop.f32.mrf.mxu0  ;;  %v7509_v15 = vld [vmem:[#allocation8 + $0x208] sm:$0xf]  ;;  %v8128_v16 = vld [vmem:[#allocation8 + $0x218] sm:$0xf0] }
 0x310   : > { %v3600_v24 = vpop.f32.mrf.mxu1 }
 0x311   : > { %v8350_v25 = vpack.c.bf16 %v3654_v22, %v3652_v21  ;;  %7239 = vmatmul.msk.bf16.gmra.mxu2 %vm4402_vm4, %v8197_v17  ;;  %v3601_v36 = vadd.f32 %v3600_v24, %v3571_v23  ;;  %v8200_v24 = vld [vmem:[%s9094_s19 + $0x68] sm:$0xff] }
 0x312   : > { %5342 = vmatmul.bf16.gmra.mxu3 %v7450_v20 }
 0x313   : > { %8414 = vst [vmem:[#allocation2 + $0x50] sm:$0xff] %v8350_v25   ;;  %v7510_v25 = vor.u32 %v8128_v16, %v7509_v15 }
 0x314   : > { %v3627_v26 = vpop.f32.mrf.mxu2 }
 0x315   : > { %v3656_v48 = vpop.f32.mrf.mxu3  ;;  %v3628_v55 = vadd.f32 %v3627_v26, %v3599_v34  ;;  %v8088_v34 = vld [vmem:[#allocation8 + $0xd8] sm:$0xf0] }
 0x317   : > { %v3574_v29 = vpop.f32.mrf.mxu0  ;;  %v3657_v58 = vadd.f32 %v3656_v48, %v3628_v55 }
 0x318   : > { %v3603_v33 = vpop.f32.mrf.mxu1 }
 0x319   : > { %v3604_v51 = vadd.f32 %v3603_v33, %v3574_v29  ;;  %v7349_v33 = vld [vmem:[#allocation8 + $0xc8] sm:$0xf] }
 0x31a   : > { %7231 = vmatmul.msk.bf16.gmra.mxu0 %vm4402_vm4, %v8189_v28 }
 0x31b   : > { %5302 = vmatmul.bf16.gmra.mxu1 %v7290_v32 }
 0x31c   : > { %v3629_v37 = vpop.f32.mrf.mxu2 }
 0x31d   : > { %v3658_v38 = vpop.f32.mrf.mxu3  ;;  %v3630_v39 = vadd.f32 %v3629_v37, %v3601_v36  ;;  %v7350_v36 = vor.u32 %v8088_v34, %v7349_v33 }
 0x31f   : > { %v3659_v0 = vadd.f32 %v3658_v38, %v3630_v39  ;;  %v3576_v42 = vpop.f32.mrf.mxu0  ;;  %v7529_v39 = vld [vmem:[#allocation8 + $0x230] sm:$0xf] }
 0x320   : > { %v3605_v43 = vpop.f32.mrf.mxu1 }
 0x321   : > { %v8355_v1 = vpack.c.bf16 %v3659_v0, %v3657_v58  ;;  %7240 = vmatmul.msk.bf16.gmra.mxu2 %vm4402_vm4, %v8198_v40  ;;  %v3606_v52 = vadd.f32 %v3605_v43, %v3576_v42  ;;  %v8133_v40 = vld [vmem:[#allocation8 + $0x240] sm:$0xf0] }
 0x322   : > { %5347 = vmatmul.bf16.gmra.mxu3 %v7470_v41 }
 0x323   : > { %8415 = vst [vmem:[#allocation2 + $0xf0] sm:$0xff] %v8355_v1   ;;  %v8201_v1 = vld [vmem:[%s9094_s19 + $0x70] sm:$0xff] }
 0x324   : > { %v3632_v59 = vpop.f32.mrf.mxu2 }
 0x325   : > { %v3661_v44 = vpop.f32.mrf.mxu3  ;;  %v3633_v53 = vadd.f32 %v3632_v59, %v3604_v51  ;;  %v7530_v59 = vor.u32 %v8133_v40, %v7529_v39 }
 0x327   : > { %v3579_v7 = vpop.f32.mrf.mxu0  ;;  %v3662_v63 = vadd.f32 %v3661_v44, %v3633_v53  ;;  %v8179_v53 = vld [vmem:[#allocation2 + $0x50] sm:$0xff] }
 0x328   : > { %v3608_v50 = vpop.f32.mrf.mxu1 }
 0x329   : > { %v3609_v31 = vadd.f32 %v3608_v50, %v3579_v7 }
 0x32a   : > { %7232 = vmatmul.msk.bf16.gmra.mxu0 %vm4402_vm4, %v8190_v6  ;;  %v8180_v50 = vld [vmem:[#allocation2 + $0xf0] sm:$0xff] }
 0x32b   : > { %5307 = vmatmul.bf16.gmra.mxu1 %v7310_v47 }
 0x32c   : > { %v3634_v56 = vpop.f32.mrf.mxu2 }
 0x32d   : > { %v3663_v57 = vpop.f32.mrf.mxu3  ;;  %v3635_v60 = vadd.f32 %v3634_v56, %v3606_v52  ;;  %v8093_v52 = vld [vmem:[#allocation8 + $0x100] sm:$0xf0]  ;;  %v8193_v56 = vld [vmem:[%s9094_s19 + $0x30] sm:$0xff] }
 0x32f   : > { %v3664_v4 = vadd.f32 %v3663_v57, %v3635_v60  ;;  %v3581_v18 = vpop.f32.mrf.mxu0  ;;  %v7370_v60 = vor.u32 %v8093_v52, %v7369_v3 }
 0x330   : > { %v3610_v19 = vpop.f32.mrf.mxu1 }
 0x331   : > { %v8360_v5 = vpack.c.bf16 %v3664_v4, %v3662_v63  ;;  %7241 = vmatmul.msk.bf16.gmra.mxu2 %vm4402_vm4, %v8199_v61  ;;  %v3611_v17 = vadd.f32 %v3610_v19, %v3581_v18  ;;  %v8178_v63 = vld [vmem:[#allocation2 + $0xc0] sm:$0xff]  ;;  %v7549_v4 = vld [vmem:[#allocation8 + $0x258] sm:$0xf]  ;;  %v8138_v18 = vld [vmem:[#allocation8 + $0x268] sm:$0xf0] }
 0x332   : > { %5352 = vmatmul.bf16.gmra.mxu3 %v7490_v62 }
 0x333   : > { %8416 = vst [vmem:[#allocation2 + $0xb8] sm:$0xff] %v8360_v5  }
 0x334   : > { %v3637_v8 = vpop.f32.mrf.mxu2 }
 0x335   : > { %v3666_v9 = vpop.f32.mrf.mxu3  ;;  %v3638_v20 = vadd.f32 %v3637_v8, %v3609_v31 }
 0x337   : > { %v3953_v13 = vpop.f32.mrf.mxu0  ;;  %v3667_v26 = vadd.f32 %v3666_v9, %v3638_v20 }
 0x338   : > { %v3982_v14 = vpop.f32.mrf.mxu1 }
 0x339   : > { %v3983_v37 = vadd.f32 %v3982_v14, %v3953_v13  ;;  %v8177_v13 = vld [vmem:[#allocation2 + $0xd8] sm:$0xff] }
 0x33a   : > { %7233 = vmatmul.msk.bf16.gmra.mxu0 %vm4402_vm4, %v8191_v12  ;;  %v8181_v44 = vld [vmem:[#allocation2 + $0xb8] sm:$0xff]  ;;  %v7550_v12 = vor.u32 %v8138_v18, %v7549_v4  ;;  %v8062_v4 = vld [vmem:[#allocation8 + $0xc] sm:$0xf]  ;;  %v7259_v18 = vld [vmem:[#allocation8 + $0x1c] sm:$0xf0] }
 0x33b   : > { %5312 = vmatmul.bf16.gmra.mxu1 %v7330_v30 }
 0x33c   : > { %v3639_v21 = vpop.f32.mrf.mxu2 }
 0x33d   : > { %v3668_v22 = vpop.f32.mrf.mxu3  ;;  %v3640_v23 = vadd.f32 %v3639_v21, %v3611_v17  ;;  %v8176_v17 = vld [vmem:[#allocation2 + $0x88] sm:$0xff] }
 0x33f   : > { %v3669_v48 = vadd.f32 %v3668_v22, %v3640_v23  ;;  %v3955_v49 = vpop.f32.mrf.mxu0  ;;  %v7389_v22 = vld [vmem:[#allocation8 + $0x118] sm:$0xf]  ;;  %v8098_v23 = vld [vmem:[#allocation8 + $0x128] sm:$0xf0] }
 0x340   : > { %v3984_v27 = vpop.f32.mrf.mxu1 }
 0x341   : > { %v8365_v28 = vpack.c.bf16 %v3669_v48, %v3667_v26  ;;  %7242 = vmatmul.msk.bf16.gmra.mxu2 %vm4402_vm4, %v8200_v24  ;;  %v3985_v41 = vadd.f32 %v3984_v27, %v3955_v49  ;;  %v8175_v24 = vld [vmem:[#allocation2 + $0xa8] sm:$0xff]  ;;  %v7390_v48 = vor.u32 %v8098_v23, %v7389_v22 }
 0x342   : > { %5357 = vmatmul.bf16.gmra.mxu3 %v7510_v25  ;;  %v8194_v25 = vld [vmem:[%s9094_s19 + $0x38] sm:$0xff] }
 0x343   : > { %8417 = vst [vmem:[#allocation2 + $0x28] sm:$0xff] %v8365_v28   ;;  %v7569_v28 = vld [vmem:[#allocation8 + $0x280] sm:$0xf] }
 0x344   : > { %v4011_v29 = vpop.f32.mrf.mxu2 }
 0x345   : > { %v4040_v32 = vpop.f32.mrf.mxu3  ;;  %v4012_v58 = vadd.f32 %v4011_v29, %v3983_v37  ;;  %v8143_v29 = vld [vmem:[#allocation8 + $0x290] sm:$0xf0] }
 0x347   : > { %v3958_v54 = vpop.f32.mrf.mxu0  ;;  %v4041_v45 = vadd.f32 %v4040_v32, %v4012_v58 }
 0x348   : > { %v3987_v55 = vpop.f32.mrf.mxu1 }
 0x349   : > { %v3988_v62 = vadd.f32 %v3987_v55, %v3958_v54  ;;  %v7570_v55 = vor.u32 %v8143_v29, %v7569_v28  ;;  %v7265_v29 = vld [vmem:[#allocation8 + $0x10] sm:$0xf] }
 0x34a   : > { %v8182_v38 = vld [vmem:[#allocation2 + $0x28] sm:$0xff]  ;;  %7234 = vmatmul.msk.bf16.gmra.mxu0 %vm4402_vm4, %v8192_v35 }
 0x34b   : > { %5317 = vmatmul.bf16.gmra.mxu1 %v7350_v36  ;;  %5581 = vmatpush.bf16.msrb.mxu0 %v8182_v38  ;;  %v8203_v36 = vld [vmem:[%s9094_s19 + $0x80] sm:$0xff] }
 0x34c   : > { %v4013_v0 = vpop.f32.mrf.mxu2 }
 0x34d   : > { %v4042_v42 = vpop.f32.mrf.mxu3  ;;  %v4014_v43 = vadd.f32 %v4013_v0, %v3985_v41 }
 0x34f   : > { %v4043_v46 = vadd.f32 %v4042_v42, %v4014_v43  ;;  %v3960_v6 = vpop.f32.mrf.mxu0  ;;  %5582 = vmatpush.bf16.msrb.mxu0 %v8181_v44  ;;  %v7409_v42 = vld [vmem:[#allocation8 + $0x140] sm:$0xf]  ;;  %v8103_v43 = vld [vmem:[#allocation8 + $0x150] sm:$0xf0] }
 0x350   : > { %v3989_v7 = vpop.f32.mrf.mxu1  ;;  %v7410_v44 = vor.u32 %v8103_v43, %v7409_v42 }
 0x351   : > { %v8370_v47 = vpack.c.bf16 %v4043_v46, %v4041_v45  ;;  %7243 = vmatmul.msk.bf16.gmra.mxu2 %vm4402_vm4, %v8201_v1  ;;  %v3990_v19 = vadd.f32 %v3989_v7, %v3960_v6  ;;  %v8195_v1 = vld [vmem:[%s9094_s19 + $0x40] sm:$0xff]  ;;  %v7589_v7 = vld [vmem:[#allocation8 + $0x2a8] sm:$0xf] }
 0x352   : > { %5362 = vmatmul.bf16.gmra.mxu3 %v7530_v59 }
 0x353   : > { %8418 = vst [vmem:[#allocation2 + $0x100] sm:$0xff] %v8370_v47   ;;  %5583 = vmatpush.bf16.msrb.mxu0 %v8180_v50  ;;  %v8148_v47 = vld [vmem:[#allocation8 + $0x2b8] sm:$0xf0] }
 0x354   : > { %v4016_v51 = vpop.f32.mrf.mxu2 }
 0x355   : > { %v4045_v2 = vpop.f32.mrf.mxu3  ;;  %v4017_v5 = vadd.f32 %v4016_v51, %v3988_v62 }
 0x357   : > { %v3963_v57 = vpop.f32.mrf.mxu0  ;;  %5584 = vmatpush.bf16.msrb.mxu0 %v8179_v53  ;;  %v4046_v30 = vadd.f32 %v4045_v2, %v4017_v5  ;;  %v8204_v53 = vld [vmem:[%s9094_s19 + $0x88] sm:$0xff] }
 0x358   : > { %v3992_v61 = vpop.f32.mrf.mxu1 }
 0x359   : > { %v3993_v27 = vadd.f32 %v3992_v61, %v3963_v57 }
 0x35a   : > { %7235 = vmatmul.msk.bf16.gmra.mxu0 %vm4402_vm4, %v8193_v56  ;;  %v7590_v56 = vor.u32 %v8148_v47, %v7589_v7 }
 0x35b   : > { %5322 = vmatmul.bf16.gmra.mxu1 %v7370_v60  ;;  %5585 = vmatpush.bf16.msrb.mxu0 %v8178_v63 }
 0x35c   : > { %v4018_v8 = vpop.f32.mrf.mxu2 }
 0x35d   : > { %v4047_v9 = vpop.f32.mrf.mxu3  ;;  %v4019_v10 = vadd.f32 %v4018_v8, %v3990_v19 }
 0x35f   : > { %v4048_v14 = vadd.f32 %v4047_v9, %v4019_v10  ;;  %v3965_v31 = vpop.f32.mrf.mxu0  ;;  %5586 = vmatpush.bf16.msrb.mxu0 %v8177_v13  ;;  %v7262_v9 = vor.u32 %v8062_v4, %v7259_v18  ;;  %v7251_v13 = vld [vmem:[#allocation8 + $0x14] sm:$0xf0]  ;;  %v8074_v18 = vld [vmem:[#allocation8 + $0x68] sm:$0xf0] }
 0x360   : > { %v3994_v15 = vpop.f32.mrf.mxu1  ;;  %v7297_v4 = vld [vmem:[#allocation8 + $0x58] sm:$0xf] }
 0x361   : > { %v8375_v16 = vpack.c.bf16 %v4048_v14, %v4046_v30  ;;  %7244 = vmatmul.msk.bf16.gmra.mxu2 %vm4402_vm4, %v8202_v11  ;;  %v3995_v32 = vadd.f32 %v3994_v15, %v3965_v31  ;;  %v7257_v31 = vld [vmem:[#allocation8 + $0x8] sm:$0xf]  ;;  %v8064_v15 = vld [vmem:[#allocation8 + $0x18] sm:$0xf0] }
 0x362   : > { %5367 = vmatmul.bf16.gmra.mxu3 %v7550_v12  ;;  %v8061_v12 = vld [vmem:[#allocation8 + $0x4] sm:$0xf]  ;;  %v7258_v22 = vor.u32 %v8064_v15, %v7257_v31  ;;  %v7319_v31 = vld [vmem:[#allocation8 + $0x94] sm:$0xf0] }
 0x363   : > { %8419 = vst [vmem:[#allocation2] sm:$0xff] %v8375_v16   ;;  %5587 = vmatpush.bf16.msrb.mxu0 %v8176_v17 }
 0x364   : > { %v4021_v20 = vpop.f32.mrf.mxu2 }
 0x365   : > { %v4050_v21 = vpop.f32.mrf.mxu3  ;;  %v4022_v33 = vadd.f32 %v4021_v20, %v3993_v27 }
 0x367   : > { %v3968_v26 = vpop.f32.mrf.mxu0  ;;  %5588 = vmatpush.bf16.msrb.mxu0 %v8175_v24  ;;  %v4051_v37 = vadd.f32 %v4050_v21, %v4022_v33  ;;  %v7254_v21 = vor.u32 %v8061_v12, %v7251_v13 }
 0x368   : > { %v3997_v49 = vpop.f32.mrf.mxu1 }
 0x369   : > { %v3998_v46 = vadd.f32 %v3997_v49, %v3968_v26  ;;  %v7279_v49 = vld [vmem:[#allocation8 + $0x44] sm:$0xf0] }
 0x36a   : > { %7236 = vmatmul.msk.bf16.gmra.mxu0 %vm4402_vm4, %v8194_v25  ;;  %v8184_v26 = vld [vmem:[#allocation2] sm:$0xff] }
 0x36b   : > { %5327 = vmatmul.bf16.gmra.mxu1 %v7390_v48  ;;  %v8067_v48 = vld [vmem:[#allocation8 + $0x34] sm:$0xf] }
 0x36c   : > { %v4023_v34 = vpop.f32.mrf.mxu2 }
 0x36d   : > { %v4052_v35 = vpop.f32.mrf.mxu3  ;;  %v4024_v54 = vadd.f32 %v4023_v34, %v3995_v32  ;;  %v8065_v32 = vld [vmem:[#allocation8 + $0x20] sm:$0xf0] }
 0x36e   : > { %v8183_v34 = vld [vmem:[#allocation2 + $0x100] sm:$0xff] }
 0x36f   : > { %v4053_v38 = vadd.f32 %v4052_v35, %v4024_v54  ;;  %v3970_v39 = vpop.f32.mrf.mxu0  ;;  %v7282_v35 = vor.u32 %v8067_v48, %v7279_v49  ;;  %v7266_v54 = vor.u32 %v8065_v32, %v7265_v29  ;;  %v7311_v29 = vld [vmem:[#allocation8 + $0x8c] sm:$0xf0]  ;;  %v7317_v32 = vld [vmem:[#allocation8 + $0x80] sm:$0xf] }
 0x370   : > { %v3999_v40 = vpop.f32.mrf.mxu1 }
 0x371   : > { %v8380_v41 = vpack.c.bf16 %v4053_v38, %v4051_v37  ;;  %7245 = vmatmul.msk.bf16.gmra.mxu2 %vm4402_vm4, %v8203_v36  ;;  %v4000_v50 = vadd.f32 %v3999_v40, %v3970_v39  ;;  %v8066_v37 = vld [vmem:[#allocation8 + $0x2c] sm:$0xf]  ;;  %v7271_v39 = vld [vmem:[#allocation8 + $0x3c] sm:$0xf0]  ;;  %v7277_v40 = vld [vmem:[#allocation8 + $0x30] sm:$0xf] }
 0x372   : > { %5372 = vmatmul.bf16.gmra.mxu3 %v7570_v55  ;;  %v7274_v43 = vor.u32 %v8066_v37, %v7271_v39 }
 0x373   : > { %8420 = vst [vmem:[#allocation2 + $0x40] sm:$0xff] %v8380_v41   ;;  %v8069_v41 = vld [vmem:[#allocation8 + $0x40] sm:$0xf0] }
 0x374   : > { %v4026_v58 = vpop.f32.mrf.mxu2 }
 0x375   : > { %v4055_v0 = vpop.f32.mrf.mxu3  ;;  %v4027_v51 = vadd.f32 %v4026_v58, %v3998_v46  ;;  %v7299_v46 = vld [vmem:[#allocation8 + $0x6c] sm:$0xf0] }
 0x377   : > { %v4473_v59 = vpop.f32.mrf.mxu0  ;;  %v4056_v57 = vadd.f32 %v4055_v0, %v4027_v51  ;;  %v8070_v51 = vld [vmem:[#allocation8 + $0x48] sm:$0xf0] }
 0x378   : > { %v5293_v45 = vpop.f32.mrf.mxu1 }
 0x379   : > { %v9129_v6 = vadd.f32 %v5293_v45, %v4473_v59  ;;  %v8072_v45 = vld [vmem:[#allocation8 + $0x5c] sm:$0xf] }
 0x37a   : > { %7237 = vmatmul.msk.bf16.gmra.mxu0 %vm4402_vm4, %v8195_v1  ;;  %v8185_v23 = vld [vmem:[#allocation2 + $0x40] sm:$0xff]  ;;  %v7278_v1 = vor.u32 %v8069_v41, %v7277_v40  ;;  %v8082_v41 = vld [vmem:[#allocation8 + $0xac] sm:$0xf] }
 0x37b   : > { %5332 = vmatmul.bf16.gmra.mxu1 %v7410_v44 }
 0x37c   : > { %v4028_v2 = vpop.f32.mrf.mxu2 }
 0x37d   : > { %v4057_v3 = vpop.f32.mrf.mxu3  ;;  %v4029_v52 = vadd.f32 %v4028_v2, %v4000_v50  ;;  %v7285_v50 = vld [vmem:[#allocation8 + $0x38] sm:$0xf] }
 0x37f   : > { %v4058_v60 = vadd.f32 %v4057_v3, %v4029_v52  ;;  %v9133_v61 = vpop.f32.mrf.mxu0  ;;  %v7302_v3 = vor.u32 %v8072_v45, %v7299_v46  ;;  %v7286_v52 = vor.u32 %v8070_v51, %v7285_v50  ;;  %v8080_v45 = vld [vmem:[#allocation8 + $0x98] sm:$0xf0] }
 0x380   : > { %v9135_v62 = vpop.f32.mrf.mxu1 }
 0x381   : > { %v8385_v63 = vpack.c.bf16 %v4058_v60, %v4056_v57  ;;  %7246 = vmatmul.msk.bf16.gmra.mxu2 %vm4402_vm4, %v8204_v53  ;;  %v8071_v57 = vld [vmem:[#allocation8 + $0x54] sm:$0xf] }
 0x382   : > { %5377 = vmatmul.bf16.gmra.mxu3 %v7590_v56 }
 0x383   : > { %8421 = vst [vmem:[#allocation2 + $0xe8] sm:$0xff] %v8385_v63   ;;  %v7291_v63 = vld [vmem:[#allocation8 + $0x64] sm:$0xf0] }
 0x384   : > { %v4518_v19 = vpop.f32.mrf.mxu2 }
 0x385   : > { %v5338_v5 = vpop.f32.mrf.mxu3 }
 0x386   : > { %v9138_v8 = vadd.f32 %v5338_v5, %v4518_v19 }
 0x387   : > { %v4478_v10 = vpop.f32.mrf.mxu0 }
 0x388   : > { %v5298_v11 = vpop.f32.mrf.mxu1 }
 0x389   : > { %v9140_v30 = vadd.f32 %v5298_v11, %v4478_v10  ;;  %v7294_v10 = vor.u32 %v8071_v57, %v7291_v63  ;;  %v7298_v11 = vor.u32 %v8074_v18, %v7297_v4  ;;  %v8084_v57 = vld [vmem:[#allocation8 + $0xb8] sm:$0xf0] }
 0x38a   : > { %v8186_v14 = vld [vmem:[#allocation2 + $0xe8] sm:$0xff]  ;;  %5589 = vmatmul.bf16.vlgmr.msrb.gmra.mxu0 %v7262_v9 }
 0x38b   : > { %5684 = vmatpush.bf16.msrb.mxu1 %v8186_v14  ;;  %v8077_v14 = vld [vmem:[#allocation8 + $0x84] sm:$0xf] }
 0x38c   : > { %v4520_v16 = vpop.f32.mrf.mxu2 }
 0x38d   : > { %v5340_v17 = vpop.f32.mrf.mxu3 }
 0x38e   : > { %v9142_v20 = vadd.f32 %v5340_v17, %v4520_v16  ;;  %v7305_v17 = vld [vmem:[#allocation8 + $0x60] sm:$0xf] }
 0x38f   : > { %v9144_v24 = vpop.f32.mrf.mxu0  ;;  %5685 = vmatpush.bf16.msrb.mxu1 %v8185_v23  ;;  %v7322_v23 = vor.u32 %v8077_v14, %v7319_v31  ;;  %v8087_v14 = vld [vmem:[#allocation8 + $0xd4] sm:$0xf]  ;;  %v7359_v31 = vld [vmem:[#allocation8 + $0xe4] sm:$0xf0] }
 0x390   : > { %v9146_v25 = vpop.f32.mrf.mxu1 }
 0x391   : > { %5391 = vmatmul.bf16.vlgmr.msrb.gmra.mxu2 %v7254_v21  ;;  %v8075_v21 = vld [vmem:[#allocation8 + $0x70] sm:$0xf0] }
 0x392   : > { %5490 = vmatmul.bf16.vlgmr.msrb.gmra.mxu3 %v7258_v22 }
 0x393   : > { %5686 = vmatpush.bf16.msrb.mxu1 %v8184_v26  ;;  %v7306_v26 = vor.u32 %v8075_v21, %v7305_v17  ;;  %v7345_v17 = vld [vmem:[#allocation8 + $0xb0] sm:$0xf]  ;;  %v8085_v21 = vld [vmem:[#allocation8 + $0xc0] sm:$0xf0] }
 0x394   : > { %v4523_v27 = vpop.f32.mrf.mxu2 }
 0x395   : > { %v5343_v28 = vpop.f32.mrf.mxu3 }
 0x396   : > { %v9148_v33 = vadd.f32 %v5343_v28, %v4523_v27  ;;  %v8076_v27 = vld [vmem:[#allocation8 + $0x7c] sm:$0xf] }
 0x397   : > { %v4483_v36 = vpop.f32.mrf.mxu0  ;;  %5687 = vmatpush.bf16.msrb.mxu1 %v8183_v34  ;;  %v8079_v34 = vld [vmem:[#allocation8 + $0x90] sm:$0xf0] }
 0x398   : > { %v5303_v55 = vpop.f32.mrf.mxu1  ;;  %v7318_v37 = vor.u32 %v8079_v34, %v7317_v32  ;;  %v7351_v34 = vld [vmem:[#allocation8 + $0xdc] sm:$0xf0] }
 0x399   : > { %v9150_v38 = vadd.f32 %v5303_v55, %v4483_v36  ;;  %v7314_v55 = vor.u32 %v8076_v27, %v7311_v29  ;;  %v8086_v29 = vld [vmem:[#allocation8 + $0xcc] sm:$0xf] }
 0x39a   : > { %5594 = vmatmul.bf16.gmra.mxu0 %v7282_v35  ;;  %7751 = vmatmul.msk.bf16.vlgmr.msrb.gmra.mxu1 %vm5229_vm5, %v7266_v54 }
 0x39c   : > { %v4525_v58 = vpop.f32.mrf.mxu2 }
 0x39d   : > { %v5345_v0 = vpop.f32.mrf.mxu3 }
 0x39e   : > { %v9153_v42 = vadd.f32 %v5345_v0, %v4525_v58  ;;  %v7339_v58 = vld [vmem:[#allocation8 + $0xbc] sm:$0xf0] }
 0x39f   : > { %v9155_v59 = vpop.f32.mrf.mxu0 }
 0x3a0   : > { %v9157_v44 = vpop.f32.mrf.mxu1 }
 0x3a1   : > { %5396 = vmatmul.bf16.gmra.mxu2 %v7274_v43 }
 0x3a2   : > { %5495 = vmatmul.bf16.gmra.mxu3 %v7278_v1  ;;  %v7325_v1 = vld [vmem:[#allocation8 + $0x88] sm:$0xf] }
 0x3a4   : > { %v4528_v7 = vpop.f32.mrf.mxu2 }
 0x3a5   : > { %v5348_v47 = vpop.f32.mrf.mxu3 }
 0x3a6   : > { %v9159_v2 = vadd.f32 %v5348_v47, %v4528_v7  ;;  %v7342_v7 = vor.u32 %v8082_v41, %v7339_v58  ;;  %v7326_v47 = vor.u32 %v8080_v45, %v7325_v1  ;;  %v7354_v58 = vor.u32 %v8086_v29, %v7351_v34  ;;  %v8092_v45 = vld [vmem:[#allocation8 + $0xfc] sm:$0xf]  ;;  %v8097_v29 = vld [vmem:[#allocation8 + $0x124] sm:$0xf]  ;;  %v7399_v34 = vld [vmem:[#allocation8 + $0x134] sm:$0xf0] }
 0x3a7   : > { %v4488_v53 = vpop.f32.mrf.mxu0 }
 0x3a8   : > { %v5308_v56 = vpop.f32.mrf.mxu1 }
 0x3a9   : > { %v9161_v60 = vadd.f32 %v5308_v56, %v4488_v53  ;;  %v7331_v53 = vld [vmem:[#allocation8 + $0xb4] sm:$0xf0]  ;;  %v7337_v56 = vld [vmem:[#allocation8 + $0xa8] sm:$0xf] }
 0x3aa   : > { %5599 = vmatmul.bf16.gmra.mxu0 %v7302_v3  ;;  %7752 = vmatmul.msk.bf16.gmra.mxu1 %vm5229_vm5, %v7286_v52  ;;  %v8081_v3 = vld [vmem:[#allocation8 + $0xa4] sm:$0xf] }
 0x3ac   : > { %v4530_v19 = vpop.f32.mrf.mxu2 }
 0x3ad   : > { %v5350_v5 = vpop.f32.mrf.mxu3 }
 0x3ae   : > { %v9164_v9 = vadd.f32 %v5350_v5, %v4530_v19  ;;  %v7334_v19 = vor.u32 %v8081_v3, %v7331_v53  ;;  %v7338_v5 = vor.u32 %v8084_v57, %v7337_v56  ;;  %v8090_v3 = vld [vmem:[#allocation8 + $0xe8] sm:$0xf0] }
 0x3af   : > { %v9166_v12 = vpop.f32.mrf.mxu0 }
 0x3b0   : > { %v9168_v13 = vpop.f32.mrf.mxu1 }
 0x3b1   : > { %5401 = vmatmul.bf16.gmra.mxu2 %v7294_v10 }
 0x3b2   : > { %5500 = vmatmul.bf16.gmra.mxu3 %v7298_v11 }
 0x3b4   : > { %v4533_v15 = vpop.f32.mrf.mxu2 }
 0x3b5   : > { %v5353_v16 = vpop.f32.mrf.mxu3 }
 0x3b6   : > { %v9170_v22 = vadd.f32 %v5353_v16, %v4533_v15 }
 0x3b7   : > { %v4493_v48 = vpop.f32.mrf.mxu0 }
 0x3b8   : > { %v5313_v49 = vpop.f32.mrf.mxu1 }
 0x3b9   : > { %v9172_v28 = vadd.f32 %v5313_v49, %v4493_v48  ;;  %v7346_v48 = vor.u32 %v8085_v21, %v7345_v17 }
 0x3ba   : > { %5604 = vmatmul.bf16.gmra.mxu0 %v7322_v23  ;;  %7753 = vmatmul.msk.bf16.gmra.mxu1 %vm5229_vm5, %v7306_v26  ;;  %v7362_v26 = vor.u32 %v8087_v14, %v7359_v31  ;;  %v7371_v14 = vld [vmem:[#allocation8 + $0x104] sm:$0xf0]  ;;  %v7377_v31 = vld [vmem:[#allocation8 + $0xf8] sm:$0xf] }
 0x3bc   : > { %v4535_v35 = vpop.f32.mrf.mxu2 }
 0x3bd   : > { %v5355_v54 = vpop.f32.mrf.mxu3 }
 0x3be   : > { %v9175_v36 = vadd.f32 %v5355_v54, %v4535_v35  ;;  %v7357_v35 = vld [vmem:[#allocation8 + $0xd0] sm:$0xf]  ;;  %v8089_v54 = vld [vmem:[#allocation8 + $0xe0] sm:$0xf0] }
 0x3bf   : > { %v9177_v39 = vpop.f32.mrf.mxu0 }
 0x3c0   : > { %v9179_v40 = vpop.f32.mrf.mxu1 }
 0x3c1   : > { %5406 = vmatmul.bf16.gmra.mxu2 %v7314_v55 }
 0x3c2   : > { %5505 = vmatmul.bf16.gmra.mxu3 %v7318_v37 }
 0x3c4   : > { %v4538_v0 = vpop.f32.mrf.mxu2 }
 0x3c5   : > { %v5358_v43 = vpop.f32.mrf.mxu3 }
 0x3c6   : > { %v9181_v46 = vadd.f32 %v5358_v43, %v4538_v0  ;;  %v7358_v0 = vor.u32 %v8089_v54, %v7357_v35 }
 0x3c7   : > { %v4498_v50 = vpop.f32.mrf.mxu0 }
 0x3c8   : > { %v5318_v51 = vpop.f32.mrf.mxu1 }
 0x3c9   : > { %v9183_v52 = vadd.f32 %v5318_v51, %v4498_v50  ;;  %v7365_v51 = vld [vmem:[#allocation8 + $0xd8] sm:$0xf] }
 0x3ca   : > { %5609 = vmatmul.bf16.gmra.mxu0 %v7342_v7  ;;  %7754 = vmatmul.msk.bf16.gmra.mxu1 %vm5229_vm5, %v7326_v47  ;;  %v7379_v7 = vld [vmem:[#allocation8 + $0x10c] sm:$0xf0]  ;;  %v7366_v57 = vor.u32 %v8090_v3, %v7365_v51 }
 0x3cb   : > { %v7382_v56 = vor.u32 %v8092_v45, %v7379_v7  ;;  %v7391_v3 = vld [vmem:[#allocation8 + $0x12c] sm:$0xf0] }
 0x3cc   : > { %v4540_v63 = vpop.f32.mrf.mxu2 }
 0x3cd   : > { %v5360_v4 = vpop.f32.mrf.mxu3 }
 0x3ce   : > { %v9186_v18 = vadd.f32 %v5360_v4, %v4540_v63 }
 0x3cf   : > { %v9188_v10 = vpop.f32.mrf.mxu0 }
 0x3d0   : > { %v9190_v11 = vpop.f32.mrf.mxu1 }
 0x3d1   : > { %5411 = vmatmul.bf16.gmra.mxu2 %v7334_v19  ;;  %v8091_v19 = vld [vmem:[#allocation8 + $0xf4] sm:$0xf] }
 0x3d2   : > { %5510 = vmatmul.bf16.gmra.mxu3 %v7338_v5 }
 0x3d4   : > { %v4543_v15 = vpop.f32.mrf.mxu2 }
 0x3d5   : > { %v5363_v16 = vpop.f32.mrf.mxu3 }
 0x3d6   : > { %v9192_v23 = vadd.f32 %v5363_v16, %v4543_v15  ;;  %v8094_v15 = vld [vmem:[#allocation8 + $0x108] sm:$0xf0] }
 0x3d7   : > { %v4503_v49 = vpop.f32.mrf.mxu0 }
 0x3d8   : > { %v5323_v27 = vpop.f32.mrf.mxu1 }
 0x3d9   : > { %v9194_v32 = vadd.f32 %v5323_v27, %v4503_v49 }
 0x3da   : > { %5614 = vmatmul.bf16.gmra.mxu0 %v7362_v26  ;;  %7755 = vmatmul.msk.bf16.gmra.mxu1 %vm5229_vm5, %v7346_v48  ;;  %v7374_v26 = vor.u32 %v8091_v19, %v7371_v14  ;;  %v7378_v48 = vor.u32 %v8094_v15, %v7377_v31 }
 0x3dc   : > { %v4545_v55 = vpop.f32.mrf.mxu2 }
 0x3dd   : > { %v5365_v37 = vpop.f32.mrf.mxu3 }
 0x3de   : > { %v9197_v41 = vadd.f32 %v5365_v37, %v4545_v55  ;;  %v7385_v55 = vld [vmem:[#allocation8 + $0x100] sm:$0xf]  ;;  %v8095_v37 = vld [vmem:[#allocation8 + $0x110] sm:$0xf0] }
 0x3df   : > { %v9199_v43 = vpop.f32.mrf.mxu0  ;;  %v7386_v45 = vor.u32 %v8095_v37, %v7385_v55 }
 0x3e0   : > { %v9201_v1 = vpop.f32.mrf.mxu1 }
 0x3e1   : > { %5416 = vmatmul.bf16.gmra.mxu2 %v7354_v58 }
 0x3e2   : > { %5515 = vmatmul.bf16.gmra.mxu3 %v7358_v0  ;;  %v7402_v0 = vor.u32 %v8097_v29, %v7399_v34  ;;  %v7405_v29 = vld [vmem:[#allocation8 + $0x128] sm:$0xf]  ;;  %v8100_v34 = vld [vmem:[#allocation8 + $0x138] sm:$0xf0] }
 0x3e3   : > { %v7406_v55 = vor.u32 %v8100_v34, %v7405_v29  ;;  %v8105_v29 = vld [vmem:[#allocation8 + $0x160] sm:$0xf0] }
 0x3e4   : > { %v4548_v47 = vpop.f32.mrf.mxu2 }
 0x3e5   : > { %v5368_v50 = vpop.f32.mrf.mxu3 }
 0x3e6   : > { %v9203_v53 = vadd.f32 %v5368_v50, %v4548_v47  ;;  %v8096_v50 = vld [vmem:[#allocation8 + $0x11c] sm:$0xf] }
 0x3e7   : > { %v4508_v63 = vpop.f32.mrf.mxu0  ;;  %v7394_v14 = vor.u32 %v8096_v50, %v7391_v3 }
 0x3e8   : > { %v5328_v4 = vpop.f32.mrf.mxu1 }
 0x3e9   : > { %v9205_v5 = vadd.f32 %v5328_v4, %v4508_v63 }
 0x3ea   : > { %5619 = vmatmul.bf16.gmra.mxu0 %v7382_v56  ;;  %7756 = vmatmul.msk.bf16.gmra.mxu1 %vm5229_vm5, %v7366_v57  ;;  %v7397_v56 = vld [vmem:[#allocation8 + $0x120] sm:$0xf]  ;;  %v8099_v57 = vld [vmem:[#allocation8 + $0x130] sm:$0xf0] }
 0x3eb   : > { %v7398_v31 = vor.u32 %v8099_v57, %v7397_v56 }
 0x3ec   : > { %v4550_v16 = vpop.f32.mrf.mxu2 }
 0x3ed   : > { %v5370_v17 = vpop.f32.mrf.mxu3 }
 0x3ee   : > { %v9208_v21 = vadd.f32 %v5370_v17, %v4550_v16  ;;  %v8102_v16 = vld [vmem:[#allocation8 + $0x14c] sm:$0xf]  ;;  %v7419_v17 = vld [vmem:[#allocation8 + $0x15c] sm:$0xf0] }
 0x3ef   : > { %v9210_v49 = vpop.f32.mrf.mxu0 }
 0x3f0   : > { %v9212_v27 = vpop.f32.mrf.mxu1 }
 0x3f1   : > { %5421 = vmatmul.bf16.gmra.mxu2 %v7374_v26 }
 0x3f2   : > { %5520 = vmatmul.bf16.gmra.mxu3 %v7378_v48 }
 0x3f4   : > { %v4553_v35 = vpop.f32.mrf.mxu2 }
 0x3f5   : > { %v5373_v54 = vpop.f32.mrf.mxu3 }
 0x3f6   : > { %v9214_v58 = vadd.f32 %v5373_v54, %v4553_v35  ;;  %v7422_v54 = vor.u32 %v8102_v16, %v7419_v17  ;;  %v7439_v16 = vld [vmem:[#allocation8 + $0x184] sm:$0xf0] }
 0x3f7   : > { %v4513_v7 = vpop.f32.mrf.mxu0 }
 0x3f8   : > { %v5333_v47 = vpop.f32.mrf.mxu1 }
 0x3f9   : > { %v9216_v51 = vadd.f32 %v5333_v47, %v4513_v7  ;;  %v7417_v7 = vld [vmem:[#allocation8 + $0x148] sm:$0xf]  ;;  %v8104_v47 = vld [vmem:[#allocation8 + $0x158] sm:$0xf0] }
 0x3fa   : > { %5624 = vmatmul.bf16.gmra.mxu0 %v7402_v0  ;;  %7757 = vmatmul.msk.bf16.gmra.mxu1 %vm5229_vm5, %v7386_v45  ;;  %v8101_v0 = vld [vmem:[#allocation8 + $0x144] sm:$0xf]  ;;  %v7411_v45 = vld [vmem:[#allocation8 + $0x154] sm:$0xf0] }
 0x3fb   : > { %v7414_v57 = vor.u32 %v8101_v0, %v7411_v45 }
 0x3fc   : > { %v4555_v63 = vpop.f32.mrf.mxu2 }
 0x3fd   : > { %v5375_v4 = vpop.f32.mrf.mxu3 }
 0x3fe   : > { %v9219_v19 = vadd.f32 %v5375_v4, %v4555_v63  ;;  %v7418_v63 = vor.u32 %v8104_v47, %v7417_v7 }
 0x3ff   : > { %v9221_v15 = vpop.f32.mrf.mxu0 }
 0x401   : > { %5426 = vmatmul.bf16.gmra.mxu2 %v7394_v14  ;;  %v9228_v14 = vpop.f32.mrf.mxu1 }
 0x402   : > { %5525 = vmatmul.bf16.gmra.mxu3 %v7398_v31  ;;  %v8107_v31 = vld [vmem:[#allocation8 + $0x174] sm:$0xf] }
 0x404   : > { %v4558_v26 = vpop.f32.mrf.mxu2 }
 0x405   : > { %v5378_v48 = vpop.f32.mrf.mxu3 }
 0x406   : > { %v9223_v35 = vadd.f32 %v5378_v48, %v4558_v26  ;;  %v7425_v48 = vld [vmem:[#allocation8 + $0x150] sm:$0xf] }
 0x407   : > { %v5590_v37 = vpop.f32.mrf.mxu0  ;;  %v7426_v0 = vor.u32 %v8105_v29, %v7425_v48 }
 0x408   : > { %9381 = vst [vmem:[#allocation19_spill] sm:$0xff] %v9223_v35 }
 0x40a   : > { %5629 = vmatmul.bf16.gmra.mxu0 %v7422_v54  ;;  %7758 = vmatmul.msk.bf16.gmra.mxu1 %vm5229_vm5, %v7406_v55  ;;  %v7442_v54 = vor.u32 %v8107_v31, %v7439_v16 }
 0x40c   : > { %v4560_v50 = vpop.f32.mrf.mxu2 }
 0x40d   : > { %v5380_v3 = vpop.f32.mrf.mxu3 }
 0x40e   : > { %v9226_v56 = vadd.f32 %v5380_v3, %v4560_v50  ;;  %v8106_v50 = vld [vmem:[#allocation8 + $0x16c] sm:$0xf]  ;;  %v7431_v3 = vld [vmem:[#allocation8 + $0x17c] sm:$0xf0] }
 0x40f   : > { %v5592_v4 = vpop.f32.mrf.mxu0 }
 0x410   : > { %9382 = vst [vmem:[#allocation20_spill] sm:$0xff] %v9226_v56  ;;  %v5296_v56 = vadd.f32 %v9135_v62, %v9133_v61  ;;  %v8112_v62 = vld [vmem:[#allocation8 + $0x19c] sm:$0xf] }
 0x411   : > { %5431 = vmatmul.bf16.gmra.mxu2 %v7414_v57  ;;  %v7437_v57 = vld [vmem:[#allocation8 + $0x170] sm:$0xf] }
 0x412   : > { %5530 = vmatmul.bf16.gmra.mxu3 %v7418_v63  ;;  %v8109_v63 = vld [vmem:[#allocation8 + $0x180] sm:$0xf0] }
 0x413   : > { %v7438_v16 = vor.u32 %v8109_v63, %v7437_v57 }
 0x414   : > { %v5392_v17 = vpop.f32.mrf.mxu2 }
 0x415   : > { %v5491_v26 = vpop.f32.mrf.mxu3  ;;  %v5393_v34 = vadd.f32 %v5392_v17, %v9129_v6 }
 0x417   : > { %v5492_v55 = vadd.f32 %v5491_v26, %v5393_v34  ;;  %v5595_v45 = vpop.f32.mrf.mxu0  ;;  %v5689_v7 = vpop.f32.mrf.mxu1 }
 0x419   : > { %v5591_v47 = vadd.f32 %v5590_v37, %v5492_v55  ;;  %v7434_v37 = vor.u32 %v8106_v50, %v7431_v3 }
 0x41a   : > { %5634 = vmatmul.bf16.gmra.mxu0 %v7442_v54  ;;  %7759 = vmatmul.msk.bf16.gmra.mxu1 %vm5229_vm5, %v7426_v0  ;;  %v7459_v54 = vld [vmem:[#allocation8 + $0x1ac] sm:$0xf0] }
 0x41b   : > { %v5690_v35 = vadd.f32 %v5689_v7, %v5591_v47  ;;  %v7445_v7 = vld [vmem:[#allocation8 + $0x178] sm:$0xf]  ;;  %v8110_v47 = vld [vmem:[#allocation8 + $0x188] sm:$0xf0] }
 0x41c   : > { %v5394_v6 = vpop.f32.mrf.mxu2  ;;  %v7446_v3 = vor.u32 %v8110_v47, %v7445_v7  ;;  %v8117_v47 = vld [vmem:[#allocation8 + $0x1c4] sm:$0xf] }
 0x41d   : > { %v5493_v17 = vpop.f32.mrf.mxu3  ;;  %5779 = vst [vmem:[%s9237_s29] sm:$0xff] %v5690_v35  ;;  %v5395_v31 = vadd.f32 %v5394_v6, %v5296_v56  ;;  %v7462_v56 = vor.u32 %v8112_v62, %v7459_v54 }
 0x41f   : > { %v5494_v26 = vadd.f32 %v5493_v17, %v5395_v31  ;;  %v5597_v48 = vpop.f32.mrf.mxu0  ;;  %v5691_v29 = vpop.f32.mrf.mxu1  ;;  %v7451_v17 = vld [vmem:[#allocation8 + $0x1a4] sm:$0xf0]  ;;  %v7457_v31 = vld [vmem:[#allocation8 + $0x198] sm:$0xf] }
 0x421   : > { %v5593_v34 = vadd.f32 %v5592_v4, %v5494_v26  ;;  %5436 = vmatmul.bf16.gmra.mxu2 %v7434_v37  ;;  %v8111_v4 = vld [vmem:[#allocation8 + $0x194] sm:$0xf]  ;;  %v8114_v37 = vld [vmem:[#allocation8 + $0x1a8] sm:$0xf0] }
 0x422   : > { %5535 = vmatmul.bf16.gmra.mxu3 %v7438_v16  ;;  %v5301_v16 = vadd.f32 %v9146_v25, %v9144_v24  ;;  %v7458_v62 = vor.u32 %v8114_v37, %v7457_v31 }
 0x423   : > { %v5692_v61 = vadd.f32 %v5691_v29, %v5593_v34 }
 0x424   : > { %v5397_v55 = vpop.f32.mrf.mxu2 }
 0x425   : > { %v5496_v0 = vpop.f32.mrf.mxu3  ;;  %5780 = vst [vmem:[%s9237_s29 + $0x8] sm:$0xff] %v5692_v61  ;;  %v5398_v35 = vadd.f32 %v5397_v55, %v9140_v30  ;;  %v7454_v61 = vor.u32 %v8111_v4, %v7451_v17 }
 0x427   : > { %v5497_v50 = vadd.f32 %v5496_v0, %v5398_v35  ;;  %v5600_v57 = vpop.f32.mrf.mxu0  ;;  %v5694_v63 = vpop.f32.mrf.mxu1  ;;  %v7479_v35 = vld [vmem:[#allocation8 + $0x1d4] sm:$0xf0] }
 0x429   : > { %v5596_v6 = vadd.f32 %v5595_v45, %v5497_v50  ;;  %v8115_v50 = vld [vmem:[#allocation8 + $0x1b0] sm:$0xf0] }
 0x42a   : > { %5639 = vmatmul.bf16.gmra.mxu0 %v7462_v56  ;;  %7760 = vmatmul.msk.bf16.gmra.mxu1 %vm5229_vm5, %v7446_v3  ;;  %v7465_v56 = vld [vmem:[#allocation8 + $0x1a0] sm:$0xf] }
 0x42b   : > { %v5695_v26 = vadd.f32 %v5694_v63, %v5596_v6  ;;  %v7482_v63 = vor.u32 %v8117_v47, %v7479_v35  ;;  %v7466_v4 = vor.u32 %v8115_v50, %v7465_v56  ;;  %v7485_v56 = vld [vmem:[#allocation8 + $0x1c8] sm:$0xf]  ;;  %v8120_v50 = vld [vmem:[#allocation8 + $0x1d8] sm:$0xf0] }
 0x42c   : > { %v5399_v29 = vpop.f32.mrf.mxu2 }
 0x42d   : > { %v5498_v30 = vpop.f32.mrf.mxu3  ;;  %5781 = vst [vmem:[%s9237_s29 + $0x10] sm:$0xff] %v5695_v26  ;;  %v5400_v34 = vadd.f32 %v5399_v29, %v5301_v16  ;;  %v7471_v16 = vld [vmem:[#allocation8 + $0x1cc] sm:$0xf0]  ;;  %v7477_v26 = vld [vmem:[#allocation8 + $0x1c0] sm:$0xf] }
 0x42e   : > { %v8119_v29 = vld [vmem:[#allocation8 + $0x1d0] sm:$0xf0] }
 0x42f   : > { %v5499_v54 = vadd.f32 %v5498_v30, %v5400_v34  ;;  %v5602_v45 = vpop.f32.mrf.mxu0  ;;  %v5696_v55 = vpop.f32.mrf.mxu1  ;;  %v5306_v30 = vadd.f32 %v9157_v44, %v9155_v59 }
 0x431   : > { %v5598_v0 = vadd.f32 %v5597_v48, %v5499_v54  ;;  %5441 = vmatmul.bf16.gmra.mxu2 %v7454_v61  ;;  %v8116_v48 = vld [vmem:[#allocation8 + $0x1bc] sm:$0xf] }
 0x432   : > { %5540 = vmatmul.bf16.gmra.mxu3 %v7458_v62  ;;  %v7474_v54 = vor.u32 %v8116_v48, %v7471_v16  ;;  %v7491_v16 = vld [vmem:[#allocation8 + $0x1f4] sm:$0xf0] }
 0x433   : > { %v5697_v7 = vadd.f32 %v5696_v55, %v5598_v0  ;;  %v7478_v55 = vor.u32 %v8119_v29, %v7477_v26  ;;  %v7497_v26 = vld [vmem:[#allocation8 + $0x1e8] sm:$0xf]  ;;  %v8124_v29 = vld [vmem:[#allocation8 + $0x1f8] sm:$0xf0] }
 0x434   : > { %v5402_v24 = vpop.f32.mrf.mxu2 }
 0x435   : > { %v5501_v25 = vpop.f32.mrf.mxu3  ;;  %5782 = vst [vmem:[%s9237_s29 + $0x18] sm:$0xff] %v5697_v7  ;;  %v5403_v3 = vadd.f32 %v5402_v24, %v9150_v38  ;;  %v8122_v24 = vld [vmem:[#allocation8 + $0x1ec] sm:$0xf] }
 0x437   : > { %v5502_v6 = vadd.f32 %v5501_v25, %v5403_v3  ;;  %v5605_v17 = vpop.f32.mrf.mxu0  ;;  %v5699_v31 = vpop.f32.mrf.mxu1  ;;  %v7499_v25 = vld [vmem:[#allocation8 + $0x1fc] sm:$0xf0] }
 0x439   : > { %v5601_v37 = vadd.f32 %v5600_v57, %v5502_v6 }
 0x43a   : > { %5644 = vmatmul.bf16.gmra.mxu0 %v7482_v63  ;;  %7761 = vmatmul.msk.bf16.gmra.mxu1 %vm5229_vm5, %v7466_v4  ;;  %v7502_v63 = vor.u32 %v8122_v24, %v7499_v25  ;;  %v7486_v4 = vor.u32 %v8120_v50, %v7485_v56  ;;  %v7519_v24 = vld [vmem:[#allocation8 + $0x224] sm:$0xf0]  ;;  %v7505_v25 = vld [vmem:[#allocation8 + $0x1f0] sm:$0xf] }
 0x43b   : > { %v5700_v34 = vadd.f32 %v5699_v31, %v5601_v37 }
 0x43c   : > { %v5404_v61 = vpop.f32.mrf.mxu2 }
 0x43d   : > { %v5503_v38 = vpop.f32.mrf.mxu3  ;;  %5783 = vst [vmem:[%s9237_s29 + $0x20] sm:$0xff] %v5700_v34  ;;  %v5405_v62 = vadd.f32 %v5404_v61, %v5306_v30  ;;  %v5311_v30 = vadd.f32 %v9168_v13, %v9166_v12 }
 0x43f   : > { %v5504_v0 = vadd.f32 %v5503_v38, %v5405_v62  ;;  %v5607_v57 = vpop.f32.mrf.mxu0  ;;  %v5701_v7 = vpop.f32.mrf.mxu1 }
 0x441   : > { %v5603_v47 = vadd.f32 %v5602_v45, %v5504_v0  ;;  %5446 = vmatmul.bf16.gmra.mxu2 %v7474_v54  ;;  %v8121_v45 = vld [vmem:[#allocation8 + $0x1e4] sm:$0xf]  ;;  %v7498_v54 = vor.u32 %v8124_v29, %v7497_v26 }
 0x442   : > { %5545 = vmatmul.bf16.gmra.mxu3 %v7478_v55  ;;  %v7494_v62 = vor.u32 %v8121_v45, %v7491_v16  ;;  %v8129_v45 = vld [vmem:[#allocation8 + $0x220] sm:$0xf0]  ;;  %v5316_v16 = vadd.f32 %v9179_v40, %v9177_v39 }
 0x443   : > { %v5702_v35 = vadd.f32 %v5701_v7, %v5603_v47 }
 0x444   : > { %v5407_v59 = vpop.f32.mrf.mxu2 }
 0x445   : > { %v5506_v44 = vpop.f32.mrf.mxu3  ;;  %5784 = vst [vmem:[%s9237_s29 + $0x28] sm:$0xff] %v5702_v35  ;;  %v5408_v3 = vadd.f32 %v5407_v59, %v9161_v60  ;;  %v8127_v35 = vld [vmem:[#allocation8 + $0x214] sm:$0xf]  ;;  %v8125_v59 = vld [vmem:[#allocation8 + $0x200] sm:$0xf0] }
 0x446   : > { %v7522_v56 = vor.u32 %v8127_v35, %v7519_v24 }
 0x447   : > { %v5507_v6 = vadd.f32 %v5506_v44, %v5408_v3  ;;  %v5610_v31 = vpop.f32.mrf.mxu0  ;;  %v5704_v37 = vpop.f32.mrf.mxu1  ;;  %v7506_v3 = vor.u32 %v8125_v59, %v7505_v25 }
 0x449   : > { %v5606_v48 = vadd.f32 %v5605_v17, %v5507_v6 }
 0x44a   : > { %5649 = vmatmul.bf16.gmra.mxu0 %v7502_v63  ;;  %7762 = vmatmul.msk.bf16.gmra.mxu1 %vm5229_vm5, %v7486_v4 }
 0x44b   : > { %v5705_v34 = vadd.f32 %v5704_v37, %v5606_v48  ;;  %v7511_v37 = vld [vmem:[#allocation8 + $0x21c] sm:$0xf0]  ;;  %v7517_v48 = vld [vmem:[#allocation8 + $0x210] sm:$0xf] }
 0x44c   : > { %v5409_v61 = vpop.f32.mrf.mxu2 }
 0x44d   : > { %v5508_v60 = vpop.f32.mrf.mxu3  ;;  %5785 = vst [vmem:[%s9237_s29 + $0x30] sm:$0xff] %v5705_v34  ;;  %v5410_v38 = vadd.f32 %v5409_v61, %v5311_v30  ;;  %v7518_v61 = vor.u32 %v8129_v45, %v7517_v48 }
 0x44f   : > { %v5509_v55 = vadd.f32 %v5508_v60, %v5410_v38  ;;  %v5612_v17 = vpop.f32.mrf.mxu0  ;;  %v5706_v0 = vpop.f32.mrf.mxu1 }
 0x451   : > { %v5608_v7 = vadd.f32 %v5607_v57, %v5509_v55  ;;  %5451 = vmatmul.bf16.gmra.mxu2 %v7494_v62  ;;  %v8126_v57 = vld [vmem:[#allocation8 + $0x20c] sm:$0xf]  ;;  %v8132_v55 = vld [vmem:[#allocation8 + $0x23c] sm:$0xf] }
 0x452   : > { %5550 = vmatmul.bf16.gmra.mxu3 %v7498_v54  ;;  %v7514_v34 = vor.u32 %v8126_v57, %v7511_v37 }
 0x453   : > { %v5707_v47 = vadd.f32 %v5706_v0, %v5608_v7  ;;  %v7539_v0 = vld [vmem:[#allocation8 + $0x24c] sm:$0xf0]  ;;  %v7525_v7 = vld [vmem:[#allocation8 + $0x218] sm:$0xf] }
 0x454   : > { %v5412_v12 = vpop.f32.mrf.mxu2  ;;  %v7542_v24 = vor.u32 %v8132_v55, %v7539_v0 }
 0x455   : > { %v5511_v13 = vpop.f32.mrf.mxu3  ;;  %5786 = vst [vmem:[%s9237_s29 + $0x38] sm:$0xff] %v5707_v47  ;;  %v5413_v44 = vadd.f32 %v5412_v12, %v9172_v28  ;;  %v8130_v47 = vld [vmem:[#allocation8 + $0x228] sm:$0xf0] }
 0x457   : > { %v5512_v50 = vadd.f32 %v5511_v13, %v5413_v44  ;;  %v5615_v63 = vpop.f32.mrf.mxu0  ;;  %v5709_v6 = vpop.f32.mrf.mxu1  ;;  %v7526_v13 = vor.u32 %v8130_v47, %v7525_v7  ;;  %v7551_v7 = vld [vmem:[#allocation8 + $0x26c] sm:$0xf0]  ;;  %v7557_v47 = vld [vmem:[#allocation8 + $0x260] sm:$0xf] }
 0x459   : > { %v5611_v4 = vadd.f32 %v5610_v31, %v5512_v50  ;;  %v7537_v50 = vld [vmem:[#allocation8 + $0x238] sm:$0xf] }
 0x45a   : > { %5654 = vmatmul.bf16.gmra.mxu0 %v7522_v56  ;;  %7763 = vmatmul.msk.bf16.gmra.mxu1 %vm5229_vm5, %v7506_v3  ;;  %v7531_v56 = vld [vmem:[#allocation8 + $0x244] sm:$0xf0]  ;;  %v8134_v3 = vld [vmem:[#allocation8 + $0x248] sm:$0xf0] }
 0x45b   : > { %v5710_v26 = vadd.f32 %v5709_v6, %v5611_v4  ;;  %v5321_v6 = vadd.f32 %v9190_v11, %v9188_v10  ;;  %v7538_v45 = vor.u32 %v8134_v3, %v7537_v50 }
 0x45c   : > { %v5414_v29 = vpop.f32.mrf.mxu2 }
 0x45d   : > { %v5513_v28 = vpop.f32.mrf.mxu3  ;;  %5787 = vst [vmem:[%s9237_s29 + $0x40] sm:$0xff] %v5710_v26  ;;  %v5415_v30 = vadd.f32 %v5414_v29, %v5316_v16 }
 0x45f   : > { %v5514_v60 = vadd.f32 %v5513_v28, %v5415_v30  ;;  %v5617_v31 = vpop.f32.mrf.mxu0  ;;  %v5711_v38 = vpop.f32.mrf.mxu1  ;;  %v8137_v30 = vld [vmem:[#allocation8 + $0x264] sm:$0xf] }
 0x461   : > { %v5613_v62 = vadd.f32 %v5612_v17, %v5514_v60  ;;  %5456 = vmatmul.bf16.gmra.mxu2 %v7514_v34  ;;  %v8131_v17 = vld [vmem:[#allocation8 + $0x234] sm:$0xf]  ;;  %v7559_v34 = vld [vmem:[#allocation8 + $0x274] sm:$0xf0] }
 0x462   : > { %5555 = vmatmul.bf16.gmra.mxu3 %v7518_v61  ;;  %v7534_v48 = vor.u32 %v8131_v17, %v7531_v56  ;;  %v7545_v61 = vld [vmem:[#allocation8 + $0x240] sm:$0xf]  ;;  %v8135_v60 = vld [vmem:[#allocation8 + $0x250] sm:$0xf0] }
 0x463   : > { %v5712_v54 = vadd.f32 %v5711_v38, %v5613_v62  ;;  %v7562_v62 = vor.u32 %v8137_v30, %v7559_v34  ;;  %v7546_v55 = vor.u32 %v8135_v60, %v7545_v61  ;;  %v7571_v34 = vld [vmem:[#allocation8 + $0x294] sm:$0xf0]  ;;  %v5331_v61 = vadd.f32 %v9212_v27, %v9210_v49 }
 0x464   : > { %v5417_v39 = vpop.f32.mrf.mxu2 }
 0x465   : > { %v5516_v40 = vpop.f32.mrf.mxu3  ;;  %5788 = vst [vmem:[%s9237_s29 + $0x48] sm:$0xff] %v5712_v54  ;;  %v5418_v35 = vadd.f32 %v5417_v39, %v9183_v52 }
 0x467   : > { %v5517_v12 = vadd.f32 %v5516_v40, %v5418_v35  ;;  %v5620_v25 = vpop.f32.mrf.mxu0  ;;  %v5714_v59 = vpop.f32.mrf.mxu1  ;;  %v8139_v35 = vld [vmem:[#allocation8 + $0x270] sm:$0xf0] }
 0x468   : > { %v7558_v17 = vor.u32 %v8139_v35, %v7557_v47  ;;  %v8147_v47 = vld [vmem:[#allocation8 + $0x2b4] sm:$0xf]  ;;  %v7599_v35 = vld [vmem:[#allocation8 + $0x2c4] sm:$0xf0] }
 0x469   : > { %v5616_v44 = vadd.f32 %v5615_v63, %v5517_v12 }
 0x46a   : > { %5659 = vmatmul.bf16.gmra.mxu0 %v7542_v24  ;;  %7764 = vmatmul.msk.bf16.gmra.mxu1 %vm5229_vm5, %v7526_v13  ;;  %v5326_v24 = vadd.f32 %v9201_v1, %v9199_v43 }
 0x46b   : > { %v5715_v4 = vadd.f32 %v5714_v59, %v5616_v44 }
 0x46c   : > { %v5419_v57 = vpop.f32.mrf.mxu2 }
 0x46d   : > { %v5518_v52 = vpop.f32.mrf.mxu3  ;;  %5789 = vst [vmem:[%s9237_s29 + $0x50] sm:$0xff] %v5715_v4  ;;  %v5420_v37 = vadd.f32 %v5419_v57, %v5321_v6  ;;  %v8142_v4 = vld [vmem:[#allocation8 + $0x28c] sm:$0xf]  ;;  %v7579_v57 = vld [vmem:[#allocation8 + $0x29c] sm:$0xf0] }
 0x46f   : > { %v5519_v16 = vadd.f32 %v5518_v52, %v5420_v37  ;;  %v5622_v63 = vpop.f32.mrf.mxu0  ;;  %v5716_v26 = vpop.f32.mrf.mxu1  ;;  %v7565_v52 = vld [vmem:[#allocation8 + $0x268] sm:$0xf]  ;;  %v8140_v37 = vld [vmem:[#allocation8 + $0x278] sm:$0xf0] }
 0x471   : > { %v5618_v29 = vadd.f32 %v5617_v31, %v5519_v16  ;;  %5461 = vmatmul.bf16.gmra.mxu2 %v7534_v48  ;;  %v8136_v31 = vld [vmem:[#allocation8 + $0x25c] sm:$0xf] }
 0x472   : > { %5560 = vmatmul.bf16.gmra.mxu3 %v7538_v45  ;;  %v7554_v44 = vor.u32 %v8136_v31, %v7551_v7  ;;  %v7582_v45 = vor.u32 %v8142_v4, %v7579_v57  ;;  %v8149_v4 = vld [vmem:[#allocation8 + $0x2c0] sm:$0xf0]  ;;  %v5336_v57 = vadd.f32 %v9228_v14, %v9221_v15  ;;  %v7605_v14 = vld [vmem:[#allocation8 + $0x2b8] sm:$0xf] }
 0x473   : > { %v5717_v28 = vadd.f32 %v5716_v26, %v5618_v29  ;;  %v7566_v26 = vor.u32 %v8140_v37, %v7565_v52 }
 0x474   : > { %v5422_v10 = vpop.f32.mrf.mxu2 }
 0x475   : > { %v5521_v11 = vpop.f32.mrf.mxu3  ;;  %5790 = vst [vmem:[%s9237_s29 + $0x58] sm:$0xff] %v5717_v28  ;;  %v5423_v38 = vadd.f32 %v5422_v10, %v9194_v32  ;;  %v7577_v10 = vld [vmem:[#allocation8 + $0x288] sm:$0xf] }
 0x477   : > { %v5522_v54 = vadd.f32 %v5521_v11, %v5423_v38  ;;  %v5625_v0 = vpop.f32.mrf.mxu0  ;;  %v5719_v39 = vpop.f32.mrf.mxu1  ;;  %v8144_v11 = vld [vmem:[#allocation8 + $0x298] sm:$0xf0] }
 0x479   : > { %v5621_v40 = vadd.f32 %v5620_v25, %v5522_v54 }
 0x47a   : > { %5664 = vmatmul.bf16.gmra.mxu0 %v7562_v62  ;;  %7765 = vmatmul.msk.bf16.gmra.mxu1 %vm5229_vm5, %v7546_v55  ;;  %v7578_v55 = vor.u32 %v8144_v11, %v7577_v10 }
 0x47b   : > { %v5720_v12 = vadd.f32 %v5719_v39, %v5621_v40 }
 0x47c   : > { %v5424_v13 = vpop.f32.mrf.mxu2 }
 0x47d   : > { %v5523_v32 = vpop.f32.mrf.mxu3  ;;  %5791 = vst [vmem:[%s9237_s29 + $0x60] sm:$0xff] %v5720_v12  ;;  %v5425_v59 = vadd.f32 %v5424_v13, %v5326_v24  ;;  %v7585_v24 = vld [vmem:[#allocation8 + $0x290] sm:$0xf]  ;;  %v8145_v12 = vld [vmem:[#allocation8 + $0x2a0] sm:$0xf0] }
 0x47f   : > { %v5524_v56 = vadd.f32 %v5523_v32, %v5425_v59  ;;  %v5627_v25 = vpop.f32.mrf.mxu0  ;;  %v5721_v50 = vpop.f32.mrf.mxu1  ;;  %v7602_v32 = vor.u32 %v8147_v47, %v7599_v35 }
 0x481   : > { %v5623_v3 = vadd.f32 %v5622_v63, %v5524_v56  ;;  %5466 = vmatmul.bf16.gmra.mxu2 %v7554_v44  ;;  %v8141_v63 = vld [vmem:[#allocation8 + $0x284] sm:$0xf]  ;;  %v7586_v44 = vor.u32 %v8145_v12, %v7585_v24 }
 0x482   : > { %5565 = vmatmul.bf16.gmra.mxu3 %v7558_v17  ;;  %v7574_v54 = vor.u32 %v8141_v63, %v7571_v34  ;;  %v8150_v63 = vld [vmem:[#allocation8 + $0x2c8] sm:$0xf0] }
 0x483   : > { %v5722_v6 = vadd.f32 %v5721_v50, %v5623_v3  ;;  %v7591_v3 = vld [vmem:[#allocation8 + $0x2bc] sm:$0xf0]  ;;  %v7606_v11 = vor.u32 %v8150_v63, %v7605_v14 }
 0x484   : > { %v5427_v43 = vpop.f32.mrf.mxu2 }
 0x485   : > { %v5526_v1 = vpop.f32.mrf.mxu3  ;;  %5792 = vst [vmem:[%s9237_s29 + $0x68] sm:$0xff] %v5722_v6  ;;  %v5428_v48 = vadd.f32 %v5427_v43, %v9205_v5  ;;  %v7597_v6 = vld [vmem:[#allocation8 + $0x2b0] sm:$0xf] }
 0x487   : > { %v5527_v16 = vadd.f32 %v5526_v1, %v5428_v48  ;;  %v5630_v29 = vpop.f32.mrf.mxu0  ;;  %v5724_v28 = vpop.f32.mrf.mxu1  ;;  %v7598_v48 = vor.u32 %v8149_v4, %v7597_v6 }
 0x489   : > { %v5626_v30 = vadd.f32 %v5625_v0, %v5527_v16 }
 0x48a   : > { %5669 = vmatmul.bf16.gmra.mxu0 %v7582_v45  ;;  %7766 = vmatmul.msk.bf16.gmra.mxu1 %vm5229_vm5, %v7566_v26 }
 0x48b   : > { %v5725_v60 = vadd.f32 %v5724_v28, %v5626_v30 }
 0x48c   : > { %v5429_v38 = vpop.f32.mrf.mxu2 }
 0x48d   : > { %v5528_v5 = vpop.f32.mrf.mxu3  ;;  %5793 = vst [vmem:[%s9237_s29 + $0x70] sm:$0xff] %v5725_v60  ;;  %v5430_v62 = vadd.f32 %v5429_v38, %v5331_v61 }
 0x48f   : > { %v5529_v39 = vadd.f32 %v5528_v5, %v5430_v62  ;;  %v5632_v0 = vpop.f32.mrf.mxu0  ;;  %v5726_v40 = vpop.f32.mrf.mxu1 }
 0x491   : > { %v5628_v31 = vadd.f32 %v5627_v25, %v5529_v39  ;;  %5471 = vmatmul.bf16.gmra.mxu2 %v7574_v54  ;;  %v8146_v25 = vld [vmem:[#allocation8 + $0x2ac] sm:$0xf] }
 0x492   : > { %5570 = vmatmul.bf16.gmra.mxu3 %v7578_v55  ;;  %v7594_v37 = vor.u32 %v8146_v25, %v7591_v3 }
 0x493   : > { %v5727_v7 = vadd.f32 %v5726_v40, %v5628_v31 }
 0x494   : > { %v5432_v49 = vpop.f32.mrf.mxu2 }
 0x495   : > { %v5531_v27 = vpop.f32.mrf.mxu3  ;;  %5794 = vst [vmem:[%s9237_s29 + $0x78] sm:$0xff] %v5727_v7  ;;  %v5433_v13 = vadd.f32 %v5432_v49, %v9216_v51 }
 0x497   : > { %v5532_v59 = vadd.f32 %v5531_v27, %v5433_v13  ;;  %v5635_v17 = vpop.f32.mrf.mxu0  ;;  %v5729_v56 = vpop.f32.mrf.mxu1 }
 0x499   : > { %v5631_v50 = vadd.f32 %v5630_v29, %v5532_v59 }
 0x49a   : > { %5674 = vmatmul.bf16.gmra.mxu0 %v7602_v32  ;;  %7767 = vmatmul.msk.bf16.gmra.mxu1 %vm5229_vm5, %v7586_v44 }
 0x49b   : > { %v5730_v43 = vadd.f32 %v5729_v56, %v5631_v50 }
 0x49c   : > { %v5434_v1 = vpop.f32.mrf.mxu2 }
 0x49d   : > { %v5533_v51 = vpop.f32.mrf.mxu3  ;;  %5795 = vst [vmem:[%s9237_s29 + $0x80] sm:$0xff] %v5730_v43  ;;  %v5435_v52 = vadd.f32 %v5434_v1, %v5336_v57 }
 0x49f   : > { %v5534_v45 = vadd.f32 %v5533_v51, %v5435_v52  ;;  %v5637_v16 = vpop.f32.mrf.mxu0  ;;  %v5731_v26 = vpop.f32.mrf.mxu1 }
 0x4a1   : > { %v5633_v29 = vadd.f32 %v5632_v0, %v5534_v45  ;;  %5476 = vmatmul.bf16.gmra.mxu2 %v7594_v37 }
 0x4a2   : > { %5575 = vmatmul.bf16.gmra.mxu3 %v7598_v48 }
 0x4a3   : > { %v5732_v28 = vadd.f32 %v5731_v26, %v5633_v29 }
 0x4a4   : > { %v5437_v30 = vpop.f32.mrf.mxu2 }
 0x4a5   : > { %v5536_v15 = vpop.f32.mrf.mxu3  ;;  %5796 = vst [vmem:[%s9237_s29 + $0x88] sm:$0xff] %v5732_v28  ;;  %v5438_v34 = vadd.f32 %v5437_v30, %v9138_v8 }
 0x4a7   : > { %v5537_v10 = vadd.f32 %v5536_v15, %v5438_v34  ;;  %v5640_v61 = vpop.f32.mrf.mxu0  ;;  %v5734_v60 = vpop.f32.mrf.mxu1 }
 0x4a9   : > { %v5636_v38 = vadd.f32 %v5635_v17, %v5537_v10 }
 0x4aa   : > { %7768 = vmatmul.msk.bf16.gmra.mxu1 %vm5229_vm5, %v7606_v11 }
 0x4ab   : > { %v5735_v5 = vadd.f32 %v5734_v60, %v5636_v38 }
 0x4ac   : > { %v5439_v62 = vpop.f32.mrf.mxu2 }
 0x4ad   : > { %v5538_v54 = vpop.f32.mrf.mxu3  ;;  %5797 = vst [vmem:[%s9237_s29 + $0x90] sm:$0xff] %v5735_v5  ;;  %v5440_v55 = vadd.f32 %v5439_v62, %v9142_v20 }
 0x4af   : > { %v5539_v39 = vadd.f32 %v5538_v54, %v5440_v55  ;;  %v5642_v0 = vpop.f32.mrf.mxu0  ;;  %v5736_v40 = vpop.f32.mrf.mxu1 }
 0x4b1   : > { %v5638_v31 = vadd.f32 %v5637_v16, %v5539_v39 }
 0x4b3   : > { %v5737_v8 = vadd.f32 %v5736_v40, %v5638_v31 }
 0x4b4   : > { %v5442_v7 = vpop.f32.mrf.mxu2 }
 0x4b5   : > { %v5541_v47 = vpop.f32.mrf.mxu3  ;;  %5798 = vst [vmem:[%s9237_s29 + $0x98] sm:$0xff] %v5737_v8  ;;  %v5443_v35 = vadd.f32 %v5442_v7, %v9148_v33 }
 0x4b7   : > { %v5542_v49 = vadd.f32 %v5541_v47, %v5443_v35  ;;  %v5645_v27 = vpop.f32.mrf.mxu0  ;;  %v5739_v24 = vpop.f32.mrf.mxu1 }
 0x4b9   : > { %v5641_v12 = vadd.f32 %v5640_v61, %v5542_v49 }
 0x4bb   : > { %v5740_v13 = vadd.f32 %v5739_v24, %v5641_v12 }
 0x4bc   : > { %v5444_v32 = vpop.f32.mrf.mxu2 }
 0x4bd   : > { %v5543_v59 = vpop.f32.mrf.mxu3  ;;  %5799 = vst [vmem:[%s9237_s29 + $0xa0] sm:$0xff] %v5740_v13  ;;  %v5445_v20 = vadd.f32 %v5444_v32, %v9153_v42 }
 0x4bf   : > { %v5544_v44 = vadd.f32 %v5543_v59, %v5445_v20  ;;  %v5647_v17 = vpop.f32.mrf.mxu0  ;;  %v5741_v56 = vpop.f32.mrf.mxu1 }
 0x4c1   : > { %v5643_v50 = vadd.f32 %v5642_v0, %v5544_v44 }
 0x4c3   : > { %v5742_v25 = vadd.f32 %v5741_v56, %v5643_v50 }
 0x4c4   : > { %v5447_v3 = vpop.f32.mrf.mxu2 }
 0x4c5   : > { %v5546_v6 = vpop.f32.mrf.mxu3  ;;  %5800 = vst [vmem:[%s9237_s29 + $0xa8] sm:$0xff] %v5742_v25  ;;  %v5448_v33 = vadd.f32 %v5447_v3, %v9159_v2 }
 0x4c7   : > { %v5547_v4 = vadd.f32 %v5546_v6, %v5448_v33  ;;  %v5650_v57 = vpop.f32.mrf.mxu0  ;;  %v5744_v43 = vpop.f32.mrf.mxu1 }
 0x4c9   : > { %v5646_v1 = vadd.f32 %v5645_v27, %v5547_v4 }
 0x4cb   : > { %v5745_v51 = vadd.f32 %v5744_v43, %v5646_v1 }
 0x4cc   : > { %v5449_v52 = vpop.f32.mrf.mxu2 }
 0x4cd   : > { %v5548_v37 = vpop.f32.mrf.mxu3  ;;  %5801 = vst [vmem:[%s9237_s29 + $0xb0] sm:$0xff] %v5745_v51  ;;  %v5450_v42 = vadd.f32 %v5449_v52, %v9164_v9 }
 0x4cf   : > { %v5549_v48 = vadd.f32 %v5548_v37, %v5450_v42  ;;  %v5652_v45 = vpop.f32.mrf.mxu0  ;;  %v5746_v16 = vpop.f32.mrf.mxu1 }
 0x4d1   : > { %v5648_v26 = vadd.f32 %v5647_v17, %v5549_v48 }
 0x4d3   : > { %v5747_v29 = vadd.f32 %v5746_v16, %v5648_v26 }
 0x4d4   : > { %v5452_v28 = vpop.f32.mrf.mxu2 }
 0x4d5   : > { %v5551_v30 = vpop.f32.mrf.mxu3  ;;  %5802 = vst [vmem:[%s9237_s29 + $0xb8] sm:$0xff] %v5747_v29  ;;  %v5453_v2 = vadd.f32 %v5452_v28, %v9170_v22 }
 0x4d7   : > { %v5552_v15 = vadd.f32 %v5551_v30, %v5453_v2  ;;  %v5655_v14 = vpop.f32.mrf.mxu0  ;;  %v5749_v63 = vpop.f32.mrf.mxu1 }
 0x4d9   : > { %v5651_v34 = vadd.f32 %v5650_v57, %v5552_v15 }
 0x4db   : > { %v5750_v10 = vadd.f32 %v5749_v63, %v5651_v34 }
 0x4dc   : > { %v5454_v11 = vpop.f32.mrf.mxu2 }
 0x4dd   : > { %v5553_v61 = vpop.f32.mrf.mxu3  ;;  %5803 = vst [vmem:[%s9237_s29 + $0xc0] sm:$0xff] %v5750_v10  ;;  %v5455_v9 = vadd.f32 %v5454_v11, %v9175_v36 }
 0x4df   : > { %v5554_v60 = vadd.f32 %v5553_v61, %v5455_v9  ;;  %v5657_v38 = vpop.f32.mrf.mxu0  ;;  %v5751_v5 = vpop.f32.mrf.mxu1 }
 0x4e1   : > { %v5653_v62 = vadd.f32 %v5652_v45, %v5554_v60 }
 0x4e3   : > { %v5752_v54 = vadd.f32 %v5751_v5, %v5653_v62 }
 0x4e4   : > { %v5457_v55 = vpop.f32.mrf.mxu2 }
 0x4e5   : > { %v5556_v39 = vpop.f32.mrf.mxu3  ;;  %5804 = vst [vmem:[%s9237_s29 + $0xc8] sm:$0xff] %v5752_v54  ;;  %v5458_v22 = vadd.f32 %v5457_v55, %v9181_v46 }
 0x4e7   : > { %v5557_v0 = vadd.f32 %v5556_v39, %v5458_v22  ;;  %v5754_v40 = vpop.f32.mrf.mxu1  ;;  %v5660_v8 = vpop.f32.mrf.mxu0  ;;  %v9383_v39 = vld [vmem:[#allocation19_spill] sm:$0xff] }
 0x4e9   : > { %v5656_v31 = vadd.f32 %v5655_v14, %v5557_v0 }
 0x4eb   : > { %v5755_v7 = vadd.f32 %v5754_v40, %v5656_v31 }
 0x4ec   : > { %v5459_v47 = vpop.f32.mrf.mxu2 }
 0x4ed   : > { %v5558_v35 = vpop.f32.mrf.mxu3  ;;  %5805 = vst [vmem:[%s9237_s29 + $0xd0] sm:$0xff] %v5755_v7  ;;  %v5460_v36 = vadd.f32 %v5459_v47, %v9186_v18  ;;  %v9384_v47 = vld [vmem:[#allocation20_spill] sm:$0xff] }
 0x4ef   : > { %v5559_v49 = vadd.f32 %v5558_v35, %v5460_v36  ;;  %v5756_v27 = vpop.f32.mrf.mxu1  ;;  %v5662_v13 = vpop.f32.mrf.mxu0 }
 0x4f1   : > { %v5658_v24 = vadd.f32 %v5657_v38, %v5559_v49 }
 0x4f3   : > { %v5757_v12 = vadd.f32 %v5756_v27, %v5658_v24 }
 0x4f4   : > { %v5462_v32 = vpop.f32.mrf.mxu2 }
 0x4f5   : > { %v5561_v59 = vpop.f32.mrf.mxu3  ;;  %5806 = vst [vmem:[%s9237_s29 + $0xd8] sm:$0xff] %v5757_v12  ;;  %v5463_v46 = vadd.f32 %v5462_v32, %v9192_v23 }
 0x4f7   : > { %v5562_v20 = vadd.f32 %v5561_v59, %v5463_v46  ;;  %v5759_v44 = vpop.f32.mrf.mxu1  ;;  %v5665_v3 = vpop.f32.mrf.mxu0 }
 0x4f9   : > { %v5661_v17 = vadd.f32 %v5660_v8, %v5562_v20 }
 0x4fb   : > { %v5760_v56 = vadd.f32 %v5759_v44, %v5661_v17 }
 0x4fc   : > { %v5464_v50 = vpop.f32.mrf.mxu2 }
 0x4fd   : > { %v5563_v25 = vpop.f32.mrf.mxu3  ;;  %5807 = vst [vmem:[%s9237_s29 + $0xe0] sm:$0xff] %v5760_v56  ;;  %v5465_v18 = vadd.f32 %v5464_v50, %v9197_v41 }
 0x4ff   : > { %v5564_v6 = vadd.f32 %v5563_v25, %v5465_v18  ;;  %v5761_v33 = vpop.f32.mrf.mxu1  ;;  %v5667_v52 = vpop.f32.mrf.mxu0 }
 0x501   : > { %v5663_v4 = vadd.f32 %v5662_v13, %v5564_v6 }
 0x503   : > { %v5762_v57 = vadd.f32 %v5761_v33, %v5663_v4 }
 0x504   : > { %v5467_v43 = vpop.f32.mrf.mxu2 }
 0x505   : > { %v5566_v1 = vpop.f32.mrf.mxu3  ;;  %5808 = vst [vmem:[%s9237_s29 + $0xe8] sm:$0xff] %v5762_v57  ;;  %v5468_v23 = vadd.f32 %v5467_v43, %v9203_v53 }
 0x507   : > { %v5567_v51 = vadd.f32 %v5566_v1, %v5468_v23  ;;  %v5764_v37 = vpop.f32.mrf.mxu1  ;;  %v5670_v30 = vpop.f32.mrf.mxu0 }
 0x509   : > { %v5666_v42 = vadd.f32 %v5665_v3, %v5567_v51 }
 0x50b   : > { %v5765_v48 = vadd.f32 %v5764_v37, %v5666_v42 }
 0x50c   : > { %v5469_v45 = vpop.f32.mrf.mxu2 }
 0x50d   : > { %v5568_v16 = vpop.f32.mrf.mxu3  ;;  %5809 = vst [vmem:[%s9237_s29 + $0xf0] sm:$0xff] %v5765_v48  ;;  %v5470_v41 = vadd.f32 %v5469_v45, %v9208_v21 }
 0x50f   : > { %v5569_v26 = vadd.f32 %v5568_v16, %v5470_v41  ;;  %v5766_v29 = vpop.f32.mrf.mxu1  ;;  %v5672_v61 = vpop.f32.mrf.mxu0 }
 0x511   : > { %v5668_v28 = vadd.f32 %v5667_v52, %v5569_v26 }
 0x513   : > { %v5767_v2 = vadd.f32 %v5766_v29, %v5668_v28 }
 0x514   : > { %v5472_v15 = vpop.f32.mrf.mxu2 }
 0x515   : > { %v5571_v14 = vpop.f32.mrf.mxu3  ;;  %5810 = vst [vmem:[%s9237_s29 + $0xf8] sm:$0xff] %v5767_v2  ;;  %v5473_v53 = vadd.f32 %v5472_v15, %v9214_v58 }
 0x517   : > { %v5572_v63 = vadd.f32 %v5571_v14, %v5473_v53  ;;  %v5769_v34 = vpop.f32.mrf.mxu1  ;;  %v5675_v0 = vpop.f32.mrf.mxu0 }
 0x519   : > { %v5671_v10 = vadd.f32 %v5670_v30, %v5572_v63 }
 0x51b   : > { %v5770_v11 = vadd.f32 %v5769_v34, %v5671_v10 }
 0x51c   : > { %v5474_v9 = vpop.f32.mrf.mxu2 }
 0x51d   : > { %v5573_v21 = vpop.f32.mrf.mxu3  ;;  %5811 = vst [vmem:[%s9237_s29 + $0x100] sm:$0xff] %v5770_v11  ;;  %v5475_v60 = vadd.f32 %v5474_v9, %v9219_v19 }
 0x51f   : > { %v5574_v38 = vadd.f32 %v5573_v21, %v5475_v60  ;;  %v5771_v5 = vpop.f32.mrf.mxu1  ;;  %v5677_v27 = vpop.f32.mrf.mxu0 }
 0x521   : > { %v5673_v62 = vadd.f32 %v5672_v61, %v5574_v38 }
 0x523   : > { %v5772_v54 = vadd.f32 %v5771_v5, %v5673_v62 }
 0x524   : > { %v5477_v55 = vpop.f32.mrf.mxu2 }
 0x525   : > { %v5576_v58 = vpop.f32.mrf.mxu3  ;;  %5812 = vst [vmem:[%s9237_s29 + $0x108] sm:$0xff] %v5772_v54  ;;  %v5478_v22 = vadd.f32 %v5477_v55, %v9383_v39 }
 0x527   : > { %v5577_v40 = vadd.f32 %v5576_v58, %v5478_v22  ;;  %v5774_v31 = vpop.f32.mrf.mxu1 }
 0x529   : > { %v5676_v8 = vadd.f32 %v5675_v0, %v5577_v40 }
 0x52b   : > { %v5775_v7 = vadd.f32 %v5774_v31, %v5676_v8 }
 0x52c   : > { %v5479_v19 = vpop.f32.mrf.mxu2 }
 0x52d   : > { %5813 = vst [vmem:[%s9237_s29 + $0x110] sm:$0xff] %v5775_v7  ;;  %v5480_v35 = vadd.f32 %v5479_v19, %v9384_v47  ;;  %v5578_v36 = vpop.f32.mrf.mxu3 }
 0x52f   : > { %v5579_v49 = vadd.f32 %v5578_v36, %v5480_v35  ;;  %v5776_v12 = vpop.f32.mrf.mxu1 }
 0x531   : > { %v5678_v24 = vadd.f32 %v5677_v27, %v5579_v49 }
 0x533   : > { %v5777_v13 = vadd.f32 %v5776_v12, %v5678_v24 }
 0x535   : > { %5814 = vst [vmem:[%s9237_s29 + $0x118] sm:$0xff] %v5777_v13 }
 0x536   : > { %8672 = shalt.err (!%p8669_p8)
}
 0x537   : > { %s8732_s9 = smov 128   ;;  %s8733_s15 = smov 8  }
 0x538   : > { %8452 = dma.vmem_to_hbm [thread:$0]  (%p8807_p5), %s5829_s17, 4608, %s5831_s12, %s5816_s25, %s8732_s9, %s8732_s9, %s8733_s15  }
 0x539 PF: > { %p8479_p9 = scmp.ge.s32.totalorder %s8719_s24, 2  ;;  %s5845_s18 = sand.u32 1, %s8707_s21  }
 0x53a   : > { %s5846_s19 = scalar_lea.sflag [#allocation5], %s5845_s18 }
 0x53b   : > { %p8468_p10 = pnand %p8479_p9, %p8811_p6 }
 0x53d   : > { %p8469_p11 = pneg %p8468_p10 }
 0x53f   : > { %8702 = dma.done.wait (%p8469_p11), %s5846_s19, 4608  }
 0x540   : > { %8704 = vsyncadd (%p8469_p11), %s5846_s19, 4294962688  ;;  %s9385_s24 = sld [smem:[#allocation17_spill]]  ;;  %s9388_s21 = smov %s8711_s22 }
 0x541   : > { %s9386_s20 = sld [smem:[#allocation16_spill]] }
 0x542   : > { %s9387_s23 = sld [smem:[#allocation18_spill]] }
 0x546   : > { %p19_p12 = scmp.ge.s32.totalorder %s9385_s24, 4  }
 0x547   : > { %s9389_s22 = smov %s9386_s20 }
 0x548   :  { %21 = sbr.rel (!%p19_p12) target bundleno = 9 (0x9), region = 107 }
 0x54d   :  { %5852 = vsyncpa [#allocation4], 1 }
 0x54e   :  { %5854 = vsyncpa [#allocation4 + $0x1], 1 }
 0x54f   :  { %5855 = vsyncpa [#allocation7], 1 }
 0x550   :  { %5856 = vsyncpa [#allocation10], 1 }
 0x551   :  { %5857 = vsyncpa [#allocation5], 1 }
 0x552   :  { %5859 = vsyncpa [#allocation5 + $0x1], 1 }

</bundles_post_ra>
